<compile_context>
chip_gen: v5e
topology: v5e:2x2
jax: 0.10.0
libtpu: 0.0.40
codegen_flags: <defaults>
</compile_context>

<pallas_src>
import numpy as np

import jax
import jax.numpy as jnp
from jax.experimental import pallas as pl
from jax.experimental.pallas import tpu as pltpu


# ----------------------------------------------------------------------------
# Fused Pallas kernel: conv1 + ReLU + maxpool(2,2) + conv2, per image
# ----------------------------------------------------------------------------
def _fused_vgg_kernel(xq_ref, w1_ref, b1_ref, w2_ref, b2_ref, sm1_ref, sp1_ref,
                      o_ref, pad_ref):
    # xq_ref : (4, H+2, Wo, Cin)  4 w-shifted stride-2 views of the padded input
    #                             xq_ref[q, r, j, :] == x_pad[r, 2*j + q, :]
    # w1_ref : (9, Cin, C1)       conv1 weights, k = kh*3 + kw
    # b1_ref : (1, C1)
    # w2_ref : (9, C1, C2)        conv2 weights
    # b2_ref : (1, C2)
    # sm1/sp1: (Ho*Wo, Ho*Wo)     constant 0/1 shift matrices (conv2 w-padding)
    # o_ref  : (Ho*Wo, C2)        output block (lane-dense: C2 = 128 lanes)
    # pad_ref: (Ho+2, Wo, C1)     VMEM scratch: h-zero-padded pooled map
    f32 = jnp.float32
    _, hp2, wo, cin = xq_ref.shape
    h = hp2 - 2
    ho = h // 2
    c1 = w1_ref.shape[2]
    c2 = w2_ref.shape[2]

    # ---- conv1 (3x3, pad=1): 9 shifted-tap MXU dots per output-w parity ------
    # acc[p][h*Wo + j, :] = conv1 pre-activation at spatial (h, 2*j + p)
    acc = []
    for p in range(2):
        a = jnp.zeros((h * wo, c1), f32)
        for kh in range(3):
            for kw in range(3):
                q = p + kw                                   # which shifted view
                tap = xq_ref[q, kh:kh + h, :, :]             # (H, Wo, Cin)
                tap = tap.reshape(h * wo, cin)               # rows = h*Wo + j
                a = a + jnp.dot(tap, w1_ref[kh * 3 + kw, :, :],
                                preferred_element_type=f32)
        acc.append(a)

    # ---- fused 2x2 max-pool (bias + ReLU commute with the spatial max) -------
    pw = jnp.maximum(acc[0], acc[1])                         # max over the w pair
    pw = pw.reshape(ho, 2, wo, c1)                           # h = 2*a + b
    pooled = jnp.maximum(pw[:, 0, :, :], pw[:, 1, :, :])     # max over the h pair
    pooled = jnp.maximum(pooled + b1_ref[...], 0.0)          # (Ho, Wo, C1)

    # ---- h-zero-padded pooled map, kept in VMEM scratch -----------------------
    pad_ref[0, :, :] = jnp.zeros((wo, c1), f32)
    pad_ref[ho + 1, :, :] = jnp.zeros((wo, c1), f32)
    pad_ref[1:ho + 1, :, :] = pooled

    # ---- conv2 (3x3, pad=1) + bias --------------------------------------------
    sm1 = sm1_ref[...]
    sp1 = sp1_ref[...]
    acc2 = jnp.zeros((ho * wo, c2), f32)
    for kh in range(3):
        hs = pad_ref[kh:kh + ho, :, :].reshape(ho * wo, c1)  # (Ho*Wo, C1)
        c_l = jnp.dot(hs, w2_ref[kh * 3 + 0, :, :], preferred_element_type=f32)
        c_c = jnp.dot(hs, w2_ref[kh * 3 + 1, :, :], preferred_element_type=f32)
        c_r = jnp.dot(hs, w2_ref[kh * 3 + 2, :, :], preferred_element_type=f32)
        acc2 = acc2 + c_c
        acc2 = acc2 + jnp.dot(sm1, c_l, preferred_element_type=f32)  # kw=0 -> w-1
        acc2 = acc2 + jnp.dot(sp1, c_r, preferred_element_type=f32)  # kw=2 -> w+1
    o_ref[...] = (acc2 + b2_ref[...]).astype(o_ref.dtype)


# ----------------------------------------------------------------------------
# Wrapper (layout plumbing only: transpose, pad, strided views, weight reshape)
# ----------------------------------------------------------------------------
def _make_shift_mats(ho, wo):
    """0/1 matrices S with (S @ X)[r] = X[r±1] within each row-block of `wo`."""
    n = ho * wo
    r = np.arange(n)
    sp1 = np.zeros((n, n), np.float32)      # (sp1 @ X)[r] = X[r+1] if r % wo != wo-1
    sm1 = np.zeros((n, n), np.float32)      # (sm1 @ X)[r] = X[r-1] if r % wo != 0
    keep_p = r[(r % wo) != (wo - 1)]
    sp1[keep_p, keep_p + 1] = 1.0
    keep_m = r[(r % wo) != 0]
    sm1[keep_m, keep_m - 1] = 1.0
    return sm1, sp1


def vgg_forward(x_nchw, params):
    """Pallas equivalent of VGG.forward(x) for vgg11 truncated to features[:4]."""
    # TODO(synk): checkpoint loading and the stateful forward_stage / block_end
    # bookkeeping have no kernel equivalent; only the feature pipeline is implemented.
    n, cin, h, w = x_nchw.shape
    assert h % 2 == 0 and w % 2 == 0
    ho, wo = h // 2, w // 2
    c1 = params["w1"].shape[-1]
    c2 = params["w2"].shape[-1]

    x = jnp.transpose(x_nchw, (0, 2, 3, 1))                      # NCHW -> NHWC
    xp = jnp.pad(x, ((0, 0), (1, 1), (1, 1), (0, 0)))            # (N, H+2, W+2, Cin)
    # Four w-shift/parity views: xq[n, q, r, j, :] = xp[n, r, 2*j + q, :]
    xq = jnp.stack([xp[:, :, q:q + w:2, :] for q in range(4)], axis=1)

    w1 = params["w1"].reshape(9, cin, c1)                        # (kh*3+kw, ci, co)
    w2 = params["w2"].reshape(9, c1, c2)
    b1 = params["b1"].reshape(1, c1)
    b2 = params["b2"].reshape(1, c2)
    sm1_np, sp1_np = _make_shift_mats(ho, wo)
    sm1 = jnp.asarray(sm1_np)
    sp1 = jnp.asarray(sp1_np)

    out_flat = pl.pallas_call(
        _fused_vgg_kernel,
        out_shape=jax.ShapeDtypeStruct((n, ho * wo, c2), x.dtype),
        grid_spec=pltpu.PrefetchScalarGridSpec(
            num_scalar_prefetch=0,
            grid=(n,),
            in_specs=[
                pl.BlockSpec((None, 4, h + 2, wo, cin), lambda i: (i, 0, 0, 0, 0)),
                pl.BlockSpec((9, cin, c1), lambda i: (0, 0, 0)),
                pl.BlockSpec((1, c1), lambda i: (0, 0)),
                pl.BlockSpec((9, c1, c2), lambda i: (0, 0, 0)),
                pl.BlockSpec((1, c2), lambda i: (0, 0)),
                pl.BlockSpec((ho * wo, ho * wo), lambda i: (0, 0)),
                pl.BlockSpec((ho * wo, ho * wo), lambda i: (0, 0)),
            ],
            out_specs=pl.BlockSpec((None, ho * wo, c2), lambda i: (i, 0, 0)),
            scratch_shapes=[pltpu.VMEM((ho + 2, wo, c1), jnp.float32)],
        ),
        compiler_params=pltpu.CompilerParams(
            dimension_semantics=("parallel",)),
    )(xq, w1, b1, w2, b2, sm1, sp1)

    out = out_flat.reshape(n, ho, wo, c2)
    return jnp.transpose(out, (0, 3, 1, 2))                      # NHWC -> NCHW


# ----------------------------------------------------------------------------
# Parameters + pure-JAX reference
# ----------------------------------------------------------------------------
def init_params(key, in_channels):
    """Deterministic synthetic parameters (shapes from vgg11 features[:4])."""
    k1, k2, k3, k4 = jax.random.split(key, 4)
    w1 = jax.random.normal(k1, (3, 3, in_channels, 64), jnp.float32) / jnp.sqrt(9.0 * in_channels)
    b1 = jax.random.normal(k2, (64,), jnp.float32) * 0.01
    w2 = jax.random.normal(k3, (3, 3, 64, 128), jnp.float32) / jnp.sqrt(9.0 * 64)
    b2 = jax.random.normal(k4, (128,), jnp.float32) * 0.01
    return {"w1": w1, "b1": b1, "w2": w2, "b2": b2}


def vgg_forward_reference(x_nchw, params):
    """Pure-JAX reference for correctness checking."""
    x = jnp.transpose(x_nchw, (0, 2, 3, 1))
    dn = ("NHWC", "HWIO", "NHWC")
    x = jax.lax.conv_general_dilated(x, params["w1"], (1, 1), "SAME", dimension_numbers=dn)
    x = jnp.maximum(x + params["b1"], 0.0)
    x = jax.lax.reduce_window(x, -jnp.inf, jax.lax.max, (1, 2, 2, 1), (1, 2, 2, 1), "VALID")
    x = jax.lax.conv_general_dilated(x, params["w2"], (1, 1), "SAME", dimension_numbers=dn)
    x = x + params["b2"]
    return jnp.transpose(x, (0, 3, 1, 2))


if __name__ == "__main__":
    key = jax.random.PRNGKey(0)
    kx, kp = jax.random.split(key)

    N, C_in, H, W = 2, 4, 16, 16
    x = jax.random.normal(kx, (N, C_in, H, W), jnp.float32)
    params = init_params(kp, C_in)

    out = jax.jit(vgg_forward)(x, params)
    out = jax.block_until_ready(out)
    assert out.shape == (N, 128, H // 2, W // 2), out.shape

    ref = jax.block_until_ready(vgg_forward_reference(x, params))
    err = jnp.max(jnp.abs(out - ref))
    assert jnp.allclose(out, ref, rtol=5e-2, atol=5e-2), f"max abs err {err}"

    print("KERNEL_OK")
</pallas_src>

<mosaic_0001>
module attributes {stable_mosaic.version = 11 : i64} {
  func.func @_fused_vgg_kernel(%arg0: i32, %arg1: memref<1x4x18x8x4xf32, #tpu.memory_space<vmem>>, %arg2: memref<9x4x64xf32, #tpu.memory_space<vmem>>, %arg3: memref<1x64xf32, #tpu.memory_space<vmem>>, %arg4: memref<9x64x128xf32, #tpu.memory_space<vmem>>, %arg5: memref<1x128xf32, #tpu.memory_space<vmem>>, %arg6: memref<64x64xf32, #tpu.memory_space<vmem>>, %arg7: memref<64x64xf32, #tpu.memory_space<vmem>>, %arg8: memref<1x64x128xf32, #tpu.memory_space<vmem>>, %arg9: memref<10x8x64xf32, #tpu.memory_space<vmem>>) attributes {dimension_semantics = [#tpu.dimension_semantics<parallel>], iteration_bounds = array<i64: 2>, scalar_prefetch = 0 : i64, scratch_operands = 1 : i64, tpu.core_type = #tpu.core_type<tc>, window_params = [{transform_indices = @transform_0, window_bounds = array<i64: 1, 4, 18, 8, 4>}, {pipeline_mode = #tpu.pipeline_mode<synchronous>, transform_indices = @transform_1, window_bounds = array<i64: 9, 4, 64>}, {pipeline_mode = #tpu.pipeline_mode<synchronous>, transform_indices = @transform_2, window_bounds = array<i64: 1, 64>}, {pipeline_mode = #tpu.pipeline_mode<synchronous>, transform_indices = @transform_3, window_bounds = array<i64: 9, 64, 128>}, {pipeline_mode = #tpu.pipeline_mode<synchronous>, transform_indices = @transform_4, window_bounds = array<i64: 1, 128>}, {pipeline_mode = #tpu.pipeline_mode<synchronous>, transform_indices = @transform_5, window_bounds = array<i64: 64, 64>}, {pipeline_mode = #tpu.pipeline_mode<synchronous>, transform_indices = @transform_6, window_bounds = array<i64: 64, 64>}, {transform_indices = @transform_7, window_bounds = array<i64: 1, 64, 128>}]} {
    %cst = arith.constant 0.000000e+00 : f32
    %0 = vector.broadcast %cst : f32 to vector<128x64xf32>
    %c0 = arith.constant 0 : index
    %c0_0 = arith.constant 0 : index
    %c0_1 = arith.constant 0 : index
    %c0_2 = arith.constant 0 : index
    %c0_3 = arith.constant 0 : index
    %1 = vector.load %arg1[%c0, %c0_0, %c0_1, %c0_2, %c0_3] : memref<1x4x18x8x4xf32, #tpu.memory_space<vmem>>, vector<1x1x16x8x4xf32>
    %2 = vector.shape_cast %1 : vector<1x1x16x8x4xf32> to vector<16x8x4xf32>
    %3 = vector.shape_cast %2 : vector<16x8x4xf32> to vector<128x4xf32>
    %c0_4 = arith.constant 0 : index
    %c0_5 = arith.constant 0 : index
    %c0_6 = arith.constant 0 : index
    %4 = vector.load %arg2[%c0_4, %c0_5, %c0_6] : memref<9x4x64xf32, #tpu.memory_space<vmem>>, vector<1x4x64xf32>
    %5 = vector.shape_cast %4 : vector<1x4x64xf32> to vector<4x64xf32>
    %cst_7 = arith.constant dense<0.000000e+00> : vector<128x64xf32>
    %6 = tpu.matmul %3, %5, %cst_7 {dimension_numbers = #tpu.dot_dimension_numbers<[1], [0], [0], [1], [0, 0, 1, 1], [], []>} : vector<128x4xf32>, vector<4x64xf32>, vector<128x64xf32> -> vector<128x64xf32>
    %7 = arith.addf %0, %6 : vector<128x64xf32>
    %c0_8 = arith.constant 0 : index
    %c1 = arith.constant 1 : index
    %c0_9 = arith.constant 0 : index
    %c0_10 = arith.constant 0 : index
    %c0_11 = arith.constant 0 : index
    %8 = vector.load %arg1[%c0_8, %c1, %c0_9, %c0_10, %c0_11] : memref<1x4x18x8x4xf32, #tpu.memory_space<vmem>>, vector<1x1x16x8x4xf32>
    %9 = vector.shape_cast %8 : vector<1x1x16x8x4xf32> to vector<16x8x4xf32>
    %10 = vector.shape_cast %9 : vector<16x8x4xf32> to vector<128x4xf32>
    %c1_12 = arith.constant 1 : index
    %c0_13 = arith.constant 0 : index
    %c0_14 = arith.constant 0 : index
    %11 = vector.load %arg2[%c1_12, %c0_13, %c0_14] : memref<9x4x64xf32, #tpu.memory_space<vmem>>, vector<1x4x64xf32>
    %12 = vector.shape_cast %11 : vector<1x4x64xf32> to vector<4x64xf32>
    %cst_15 = arith.constant dense<0.000000e+00> : vector<128x64xf32>
    %13 = tpu.matmul %10, %12, %cst_15 {dimension_numbers = #tpu.dot_dimension_numbers<[1], [0], [0], [1], [0, 0, 1, 1], [], []>} : vector<128x4xf32>, vector<4x64xf32>, vector<128x64xf32> -> vector<128x64xf32>
    %14 = arith.addf %7, %13 : vector<128x64xf32>
    %c0_16 = arith.constant 0 : index
    %c2 = arith.constant 2 : index
    %c0_17 = arith.constant 0 : index
    %c0_18 = arith.constant 0 : index
    %c0_19 = arith.constant 0 : index
    %15 = vector.load %arg1[%c0_16, %c2, %c0_17, %c0_18, %c0_19] : memref<1x4x18x8x4xf32, #tpu.memory_space<vmem>>, vector<1x1x16x8x4xf32>
    %16 = vector.shape_cast %15 : vector<1x1x16x8x4xf32> to vector<16x8x4xf32>
    %17 = vector.shape_cast %16 : vector<16x8x4xf32> to vector<128x4xf32>
    %c2_20 = arith.constant 2 : index
    %c0_21 = arith.constant 0 : index
    %c0_22 = arith.constant 0 : index
    %18 = vector.load %arg2[%c2_20, %c0_21, %c0_22] : memref<9x4x64xf32, #tpu.memory_space<vmem>>, vector<1x4x64xf32>
    %19 = vector.shape_cast %18 : vector<1x4x64xf32> to vector<4x64xf32>
    %cst_23 = arith.constant dense<0.000000e+00> : vector<128x64xf32>
    %20 = tpu.matmul %17, %19, %cst_23 {dimension_numbers = #tpu.dot_dimension_numbers<[1], [0], [0], [1], [0, 0, 1, 1], [], []>} : vector<128x4xf32>, vector<4x64xf32>, vector<128x64xf32> -> vector<128x64xf32>
    %21 = arith.addf %14, %20 : vector<128x64xf32>
    %c0_24 = arith.constant 0 : index
    %c0_25 = arith.constant 0 : index
    %c1_26 = arith.constant 1 : index
    %c0_27 = arith.constant 0 : index
    %c0_28 = arith.constant 0 : index
    %22 = vector.load %arg1[%c0_24, %c0_25, %c1_26, %c0_27, %c0_28] : memref<1x4x18x8x4xf32, #tpu.memory_space<vmem>>, vector<1x1x16x8x4xf32>
    %23 = vector.shape_cast %22 : vector<1x1x16x8x4xf32> to vector<16x8x4xf32>
    %24 = vector.shape_cast %23 : vector<16x8x4xf32> to vector<128x4xf32>
    %c3 = arith.constant 3 : index
    %c0_29 = arith.constant 0 : index
    %c0_30 = arith.constant 0 : index
    %25 = vector.load %arg2[%c3, %c0_29, %c0_30] : memref<9x4x64xf32, #tpu.memory_space<vmem>>, vector<1x4x64xf32>
    %26 = vector.shape_cast %25 : vector<1x4x64xf32> to vector<4x64xf32>
    %cst_31 = arith.constant dense<0.000000e+00> : vector<128x64xf32>
    %27 = tpu.matmul %24, %26, %cst_31 {dimension_numbers = #tpu.dot_dimension_numbers<[1], [0], [0], [1], [0, 0, 1, 1], [], []>} : vector<128x4xf32>, vector<4x64xf32>, vector<128x64xf32> -> vector<128x64xf32>
    %28 = arith.addf %21, %27 : vector<128x64xf32>
    %c0_32 = arith.constant 0 : index
    %c1_33 = arith.constant 1 : index
    %c1_34 = arith.constant 1 : index
    %c0_35 = arith.constant 0 : index
    %c0_36 = arith.constant 0 : index
    %29 = vector.load %arg1[%c0_32, %c1_33, %c1_34, %c0_35, %c0_36] : memref<1x4x18x8x4xf32, #tpu.memory_space<vmem>>, vector<1x1x16x8x4xf32>
    %30 = vector.shape_cast %29 : vector<1x1x16x8x4xf32> to vector<16x8x4xf32>
    %31 = vector.shape_cast %30 : vector<16x8x4xf32> to vector<128x4xf32>
    %c4 = arith.constant 4 : index
    %c0_37 = arith.constant 0 : index
    %c0_38 = arith.constant 0 : index
    %32 = vector.load %arg2[%c4, %c0_37, %c0_38] : memref<9x4x64xf32, #tpu.memory_space<vmem>>, vector<1x4x64xf32>
    %33 = vector.shape_cast %32 : vector<1x4x64xf32> to vector<4x64xf32>
    %cst_39 = arith.constant dense<0.000000e+00> : vector<128x64xf32>
    %34 = tpu.matmul %31, %33, %cst_39 {dimension_numbers = #tpu.dot_dimension_numbers<[1], [0], [0], [1], [0, 0, 1, 1], [], []>} : vector<128x4xf32>, vector<4x64xf32>, vector<128x64xf32> -> vector<128x64xf32>
    %35 = arith.addf %28, %34 : vector<128x64xf32>
    %c0_40 = arith.constant 0 : index
    %c2_41 = arith.constant 2 : index
    %c1_42 = arith.constant 1 : index
    %c0_43 = arith.constant 0 : index
    %c0_44 = arith.constant 0 : index
    %36 = vector.load %arg1[%c0_40, %c2_41, %c1_42, %c0_43, %c0_44] : memref<1x4x18x8x4xf32, #tpu.memory_space<vmem>>, vector<1x1x16x8x4xf32>
    %37 = vector.shape_cast %36 : vector<1x1x16x8x4xf32> to vector<16x8x4xf32>
    %38 = vector.shape_cast %37 : vector<16x8x4xf32> to vector<128x4xf32>
    %c5 = arith.constant 5 : index
    %c0_45 = arith.constant 0 : index
    %c0_46 = arith.constant 0 : index
    %39 = vector.load %arg2[%c5, %c0_45, %c0_46] : memref<9x4x64xf32, #tpu.memory_space<vmem>>, vector<1x4x64xf32>
    %40 = vector.shape_cast %39 : vector<1x4x64xf32> to vector<4x64xf32>
    %cst_47 = arith.constant dense<0.000000e+00> : vector<128x64xf32>
    %41 = tpu.matmul %38, %40, %cst_47 {dimension_numbers = #tpu.dot_dimension_numbers<[1], [0], [0], [1], [0, 0, 1, 1], [], []>} : vector<128x4xf32>, vector<4x64xf32>, vector<128x64xf32> -> vector<128x64xf32>
    %42 = arith.addf %35, %41 : vector<128x64xf32>
    %c0_48 = arith.constant 0 : index
    %c0_49 = arith.constant 0 : index
    %c2_50 = arith.constant 2 : index
    %c0_51 = arith.constant 0 : index
    %c0_52 = arith.constant 0 : index
    %43 = vector.load %arg1[%c0_48, %c0_49, %c2_50, %c0_51, %c0_52] : memref<1x4x18x8x4xf32, #tpu.memory_space<vmem>>, vector<1x1x16x8x4xf32>
    %44 = vector.shape_cast %43 : vector<1x1x16x8x4xf32> to vector<16x8x4xf32>
    %45 = vector.shape_cast %44 : vector<16x8x4xf32> to vector<128x4xf32>
    %c6 = arith.constant 6 : index
    %c0_53 = arith.constant 0 : index
    %c0_54 = arith.constant 0 : index
    %46 = vector.load %arg2[%c6, %c0_53, %c0_54] : memref<9x4x64xf32, #tpu.memory_space<vmem>>, vector<1x4x64xf32>
    %47 = vector.shape_cast %46 : vector<1x4x64xf32> to vector<4x64xf32>
    %cst_55 = arith.constant dense<0.000000e+00> : vector<128x64xf32>
    %48 = tpu.matmul %45, %47, %cst_55 {dimension_numbers = #tpu.dot_dimension_numbers<[1], [0], [0], [1], [0, 0, 1, 1], [], []>} : vector<128x4xf32>, vector<4x64xf32>, vector<128x64xf32> -> vector<128x64xf32>
    %49 = arith.addf %42, %48 : vector<128x64xf32>
    %c0_56 = arith.constant 0 : index
    %c1_57 = arith.constant 1 : index
    %c2_58 = arith.constant 2 : index
    %c0_59 = arith.constant 0 : index
    %c0_60 = arith.constant 0 : index
    %50 = vector.load %arg1[%c0_56, %c1_57, %c2_58, %c0_59, %c0_60] : memref<1x4x18x8x4xf32, #tpu.memory_space<vmem>>, vector<1x1x16x8x4xf32>
    %51 = vector.shape_cast %50 : vector<1x1x16x8x4xf32> to vector<16x8x4xf32>
    %52 = vector.shape_cast %51 : vector<16x8x4xf32> to vector<128x4xf32>
    %c7 = arith.constant 7 : index
    %c0_61 = arith.constant 0 : index
    %c0_62 = arith.constant 0 : index
    %53 = vector.load %arg2[%c7, %c0_61, %c0_62] : memref<9x4x64xf32, #tpu.memory_space<vmem>>, vector<1x4x64xf32>
    %54 = vector.shape_cast %53 : vector<1x4x64xf32> to vector<4x64xf32>
    %cst_63 = arith.constant dense<0.000000e+00> : vector<128x64xf32>
    %55 = tpu.matmul %52, %54, %cst_63 {dimension_numbers = #tpu.dot_dimension_numbers<[1], [0], [0], [1], [0, 0, 1, 1], [], []>} : vector<128x4xf32>, vector<4x64xf32>, vector<128x64xf32> -> vector<128x64xf32>
    %56 = arith.addf %49, %55 : vector<128x64xf32>
    %c0_64 = arith.constant 0 : index
    %c2_65 = arith.constant 2 : index
    %c2_66 = arith.constant 2 : index
    %c0_67 = arith.constant 0 : index
    %c0_68 = arith.constant 0 : index
    %57 = vector.load %arg1[%c0_64, %c2_65, %c2_66, %c0_67, %c0_68] : memref<1x4x18x8x4xf32, #tpu.memory_space<vmem>>, vector<1x1x16x8x4xf32>
    %58 = vector.shape_cast %57 : vector<1x1x16x8x4xf32> to vector<16x8x4xf32>
    %59 = vector.shape_cast %58 : vector<16x8x4xf32> to vector<128x4xf32>
    %c8 = arith.constant 8 : index
    %c0_69 = arith.constant 0 : index
    %c0_70 = arith.constant 0 : index
    %60 = vector.load %arg2[%c8, %c0_69, %c0_70] : memref<9x4x64xf32, #tpu.memory_space<vmem>>, vector<1x4x64xf32>
    %61 = vector.shape_cast %60 : vector<1x4x64xf32> to vector<4x64xf32>
    %cst_71 = arith.constant dense<0.000000e+00> : vector<128x64xf32>
    %62 = tpu.matmul %59, %61, %cst_71 {dimension_numbers = #tpu.dot_dimension_numbers<[1], [0], [0], [1], [0, 0, 1, 1], [], []>} : vector<128x4xf32>, vector<4x64xf32>, vector<128x64xf32> -> vector<128x64xf32>
    %63 = arith.addf %56, %62 : vector<128x64xf32>
    %cst_72 = arith.constant 0.000000e+00 : f32
    %64 = vector.broadcast %cst_72 : f32 to vector<128x64xf32>
    %c0_73 = arith.constant 0 : index
    %c1_74 = arith.constant 1 : index
    %c0_75 = arith.constant 0 : index
    %c0_76 = arith.constant 0 : index
    %c0_77 = arith.constant 0 : index
    %65 = vector.load %arg1[%c0_73, %c1_74, %c0_75, %c0_76, %c0_77] : memref<1x4x18x8x4xf32, #tpu.memory_space<vmem>>, vector<1x1x16x8x4xf32>
    %66 = vector.shape_cast %65 : vector<1x1x16x8x4xf32> to vector<16x8x4xf32>
    %67 = vector.shape_cast %66 : vector<16x8x4xf32> to vector<128x4xf32>
    %c0_78 = arith.constant 0 : index
    %c0_79 = arith.constant 0 : index
    %c0_80 = arith.constant 0 : index
    %68 = vector.load %arg2[%c0_78, %c0_79, %c0_80] : memref<9x4x64xf32, #tpu.memory_space<vmem>>, vector<1x4x64xf32>
    %69 = vector.shape_cast %68 : vector<1x4x64xf32> to vector<4x64xf32>
    %cst_81 = arith.constant dense<0.000000e+00> : vector<128x64xf32>
    %70 = tpu.matmul %67, %69, %cst_81 {dimension_numbers = #tpu.dot_dimension_numbers<[1], [0], [0], [1], [0, 0, 1, 1], [], []>} : vector<128x4xf32>, vector<4x64xf32>, vector<128x64xf32> -> vector<128x64xf32>
    %71 = arith.addf %64, %70 : vector<128x64xf32>
    %c0_82 = arith.constant 0 : index
    %c2_83 = arith.constant 2 : index
    %c0_84 = arith.constant 0 : index
    %c0_85 = arith.constant 0 : index
    %c0_86 = arith.constant 0 : index
    %72 = vector.load %arg1[%c0_82, %c2_83, %c0_84, %c0_85, %c0_86] : memref<1x4x18x8x4xf32, #tpu.memory_space<vmem>>, vector<1x1x16x8x4xf32>
    %73 = vector.shape_cast %72 : vector<1x1x16x8x4xf32> to vector<16x8x4xf32>
    %74 = vector.shape_cast %73 : vector<16x8x4xf32> to vector<128x4xf32>
    %c1_87 = arith.constant 1 : index
    %c0_88 = arith.constant 0 : index
    %c0_89 = arith.constant 0 : index
    %75 = vector.load %arg2[%c1_87, %c0_88, %c0_89] : memref<9x4x64xf32, #tpu.memory_space<vmem>>, vector<1x4x64xf32>
    %76 = vector.shape_cast %75 : vector<1x4x64xf32> to vector<4x64xf32>
    %cst_90 = arith.constant dense<0.000000e+00> : vector<128x64xf32>
    %77 = tpu.matmul %74, %76, %cst_90 {dimension_numbers = #tpu.dot_dimension_numbers<[1], [0], [0], [1], [0, 0, 1, 1], [], []>} : vector<128x4xf32>, vector<4x64xf32>, vector<128x64xf32> -> vector<128x64xf32>
    %78 = arith.addf %71, %77 : vector<128x64xf32>
    %c0_91 = arith.constant 0 : index
    %c3_92 = arith.constant 3 : index
    %c0_93 = arith.constant 0 : index
    %c0_94 = arith.constant 0 : index
    %c0_95 = arith.constant 0 : index
    %79 = vector.load %arg1[%c0_91, %c3_92, %c0_93, %c0_94, %c0_95] : memref<1x4x18x8x4xf32, #tpu.memory_space<vmem>>, vector<1x1x16x8x4xf32>
    %80 = vector.shape_cast %79 : vector<1x1x16x8x4xf32> to vector<16x8x4xf32>
    %81 = vector.shape_cast %80 : vector<16x8x4xf32> to vector<128x4xf32>
    %c2_96 = arith.constant 2 : index
    %c0_97 = arith.constant 0 : index
    %c0_98 = arith.constant 0 : index
    %82 = vector.load %arg2[%c2_96, %c0_97, %c0_98] : memref<9x4x64xf32, #tpu.memory_space<vmem>>, vector<1x4x64xf32>
    %83 = vector.shape_cast %82 : vector<1x4x64xf32> to vector<4x64xf32>
    %cst_99 = arith.constant dense<0.000000e+00> : vector<128x64xf32>
    %84 = tpu.matmul %81, %83, %cst_99 {dimension_numbers = #tpu.dot_dimension_numbers<[1], [0], [0], [1], [0, 0, 1, 1], [], []>} : vector<128x4xf32>, vector<4x64xf32>, vector<128x64xf32> -> vector<128x64xf32>
    %85 = arith.addf %78, %84 : vector<128x64xf32>
    %c0_100 = arith.constant 0 : index
    %c1_101 = arith.constant 1 : index
    %c1_102 = arith.constant 1 : index
    %c0_103 = arith.constant 0 : index
    %c0_104 = arith.constant 0 : index
    %86 = vector.load %arg1[%c0_100, %c1_101, %c1_102, %c0_103, %c0_104] : memref<1x4x18x8x4xf32, #tpu.memory_space<vmem>>, vector<1x1x16x8x4xf32>
    %87 = vector.shape_cast %86 : vector<1x1x16x8x4xf32> to vector<16x8x4xf32>
    %88 = vector.shape_cast %87 : vector<16x8x4xf32> to vector<128x4xf32>
    %c3_105 = arith.constant 3 : index
    %c0_106 = arith.constant 0 : index
    %c0_107 = arith.constant 0 : index
    %89 = vector.load %arg2[%c3_105, %c0_106, %c0_107] : memref<9x4x64xf32, #tpu.memory_space<vmem>>, vector<1x4x64xf32>
    %90 = vector.shape_cast %89 : vector<1x4x64xf32> to vector<4x64xf32>
    %cst_108 = arith.constant dense<0.000000e+00> : vector<128x64xf32>
    %91 = tpu.matmul %88, %90, %cst_108 {dimension_numbers = #tpu.dot_dimension_numbers<[1], [0], [0], [1], [0, 0, 1, 1], [], []>} : vector<128x4xf32>, vector<4x64xf32>, vector<128x64xf32> -> vector<128x64xf32>
    %92 = arith.addf %85, %91 : vector<128x64xf32>
    %c0_109 = arith.constant 0 : index
    %c2_110 = arith.constant 2 : index
    %c1_111 = arith.constant 1 : index
    %c0_112 = arith.constant 0 : index
    %c0_113 = arith.constant 0 : index
    %93 = vector.load %arg1[%c0_109, %c2_110, %c1_111, %c0_112, %c0_113] : memref<1x4x18x8x4xf32, #tpu.memory_space<vmem>>, vector<1x1x16x8x4xf32>
    %94 = vector.shape_cast %93 : vector<1x1x16x8x4xf32> to vector<16x8x4xf32>
    %95 = vector.shape_cast %94 : vector<16x8x4xf32> to vector<128x4xf32>
    %c4_114 = arith.constant 4 : index
    %c0_115 = arith.constant 0 : index
    %c0_116 = arith.constant 0 : index
    %96 = vector.load %arg2[%c4_114, %c0_115, %c0_116] : memref<9x4x64xf32, #tpu.memory_space<vmem>>, vector<1x4x64xf32>
    %97 = vector.shape_cast %96 : vector<1x4x64xf32> to vector<4x64xf32>
    %cst_117 = arith.constant dense<0.000000e+00> : vector<128x64xf32>
    %98 = tpu.matmul %95, %97, %cst_117 {dimension_numbers = #tpu.dot_dimension_numbers<[1], [0], [0], [1], [0, 0, 1, 1], [], []>} : vector<128x4xf32>, vector<4x64xf32>, vector<128x64xf32> -> vector<128x64xf32>
    %99 = arith.addf %92, %98 : vector<128x64xf32>
    %c0_118 = arith.constant 0 : index
    %c3_119 = arith.constant 3 : index
    %c1_120 = arith.constant 1 : index
    %c0_121 = arith.constant 0 : index
    %c0_122 = arith.constant 0 : index
    %100 = vector.load %arg1[%c0_118, %c3_119, %c1_120, %c0_121, %c0_122] : memref<1x4x18x8x4xf32, #tpu.memory_space<vmem>>, vector<1x1x16x8x4xf32>
    %101 = vector.shape_cast %100 : vector<1x1x16x8x4xf32> to vector<16x8x4xf32>
    %102 = vector.shape_cast %101 : vector<16x8x4xf32> to vector<128x4xf32>
    %c5_123 = arith.constant 5 : index
    %c0_124 = arith.constant 0 : index
    %c0_125 = arith.constant 0 : index
    %103 = vector.load %arg2[%c5_123, %c0_124, %c0_125] : memref<9x4x64xf32, #tpu.memory_space<vmem>>, vector<1x4x64xf32>
    %104 = vector.shape_cast %103 : vector<1x4x64xf32> to vector<4x64xf32>
    %cst_126 = arith.constant dense<0.000000e+00> : vector<128x64xf32>
    %105 = tpu.matmul %102, %104, %cst_126 {dimension_numbers = #tpu.dot_dimension_numbers<[1], [0], [0], [1], [0, 0, 1, 1], [], []>} : vector<128x4xf32>, vector<4x64xf32>, vector<128x64xf32> -> vector<128x64xf32>
    %106 = arith.addf %99, %105 : vector<128x64xf32>
    %c0_127 = arith.constant 0 : index
    %c1_128 = arith.constant 1 : index
    %c2_129 = arith.constant 2 : index
    %c0_130 = arith.constant 0 : index
    %c0_131 = arith.constant 0 : index
    %107 = vector.load %arg1[%c0_127, %c1_128, %c2_129, %c0_130, %c0_131] : memref<1x4x18x8x4xf32, #tpu.memory_space<vmem>>, vector<1x1x16x8x4xf32>
    %108 = vector.shape_cast %107 : vector<1x1x16x8x4xf32> to vector<16x8x4xf32>
    %109 = vector.shape_cast %108 : vector<16x8x4xf32> to vector<128x4xf32>
    %c6_132 = arith.constant 6 : index
    %c0_133 = arith.constant 0 : index
    %c0_134 = arith.constant 0 : index
    %110 = vector.load %arg2[%c6_132, %c0_133, %c0_134] : memref<9x4x64xf32, #tpu.memory_space<vmem>>, vector<1x4x64xf32>
    %111 = vector.shape_cast %110 : vector<1x4x64xf32> to vector<4x64xf32>
    %cst_135 = arith.constant dense<0.000000e+00> : vector<128x64xf32>
    %112 = tpu.matmul %109, %111, %cst_135 {dimension_numbers = #tpu.dot_dimension_numbers<[1], [0], [0], [1], [0, 0, 1, 1], [], []>} : vector<128x4xf32>, vector<4x64xf32>, vector<128x64xf32> -> vector<128x64xf32>
    %113 = arith.addf %106, %112 : vector<128x64xf32>
    %c0_136 = arith.constant 0 : index
    %c2_137 = arith.constant 2 : index
    %c2_138 = arith.constant 2 : index
    %c0_139 = arith.constant 0 : index
    %c0_140 = arith.constant 0 : index
    %114 = vector.load %arg1[%c0_136, %c2_137, %c2_138, %c0_139, %c0_140] : memref<1x4x18x8x4xf32, #tpu.memory_space<vmem>>, vector<1x1x16x8x4xf32>
    %115 = vector.shape_cast %114 : vector<1x1x16x8x4xf32> to vector<16x8x4xf32>
    %116 = vector.shape_cast %115 : vector<16x8x4xf32> to vector<128x4xf32>
    %c7_141 = arith.constant 7 : index
    %c0_142 = arith.constant 0 : index
    %c0_143 = arith.constant 0 : index
    %117 = vector.load %arg2[%c7_141, %c0_142, %c0_143] : memref<9x4x64xf32, #tpu.memory_space<vmem>>, vector<1x4x64xf32>
    %118 = vector.shape_cast %117 : vector<1x4x64xf32> to vector<4x64xf32>
    %cst_144 = arith.constant dense<0.000000e+00> : vector<128x64xf32>
    %119 = tpu.matmul %116, %118, %cst_144 {dimension_numbers = #tpu.dot_dimension_numbers<[1], [0], [0], [1], [0, 0, 1, 1], [], []>} : vector<128x4xf32>, vector<4x64xf32>, vector<128x64xf32> -> vector<128x64xf32>
    %120 = arith.addf %113, %119 : vector<128x64xf32>
    %c0_145 = arith.constant 0 : index
    %c3_146 = arith.constant 3 : index
    %c2_147 = arith.constant 2 : index
    %c0_148 = arith.constant 0 : index
    %c0_149 = arith.constant 0 : index
    %121 = vector.load %arg1[%c0_145, %c3_146, %c2_147, %c0_148, %c0_149] : memref<1x4x18x8x4xf32, #tpu.memory_space<vmem>>, vector<1x1x16x8x4xf32>
    %122 = vector.shape_cast %121 : vector<1x1x16x8x4xf32> to vector<16x8x4xf32>
    %123 = vector.shape_cast %122 : vector<16x8x4xf32> to vector<128x4xf32>
    %c8_150 = arith.constant 8 : index
    %c0_151 = arith.constant 0 : index
    %c0_152 = arith.constant 0 : index
    %124 = vector.load %arg2[%c8_150, %c0_151, %c0_152] : memref<9x4x64xf32, #tpu.memory_space<vmem>>, vector<1x4x64xf32>
    %125 = vector.shape_cast %124 : vector<1x4x64xf32> to vector<4x64xf32>
    %cst_153 = arith.constant dense<0.000000e+00> : vector<128x64xf32>
    %126 = tpu.matmul %123, %125, %cst_153 {dimension_numbers = #tpu.dot_dimension_numbers<[1], [0], [0], [1], [0, 0, 1, 1], [], []>} : vector<128x4xf32>, vector<4x64xf32>, vector<128x64xf32> -> vector<128x64xf32>
    %127 = arith.addf %120, %126 : vector<128x64xf32>
    %128 = arith.maximumf %63, %127 : vector<128x64xf32>
    %129 = vector.shape_cast %128 : vector<128x64xf32> to vector<8x2x8x64xf32>
    %130 = vector.extract_strided_slice %129 {offsets = [0, 0, 0, 0], sizes = [8, 1, 8, 64], strides = [1, 1, 1, 1]} : vector<8x2x8x64xf32> to vector<8x1x8x64xf32>
    %131 = vector.shape_cast %130 : vector<8x1x8x64xf32> to vector<8x8x64xf32>
    %132 = vector.extract_strided_slice %129 {offsets = [0, 1, 0, 0], sizes = [8, 1, 8, 64], strides = [1, 1, 1, 1]} : vector<8x2x8x64xf32> to vector<8x1x8x64xf32>
    %133 = vector.shape_cast %132 : vector<8x1x8x64xf32> to vector<8x8x64xf32>
    %134 = arith.maximumf %131, %133 : vector<8x8x64xf32>
    %c0_154 = arith.constant 0 : index
    %c0_155 = arith.constant 0 : index
    %135 = vector.load %arg3[%c0_154, %c0_155] : memref<1x64xf32, #tpu.memory_space<vmem>>, vector<1x64xf32>
    %136 = vector.shape_cast %135 : vector<1x64xf32> to vector<1x1x64xf32>
    %137 = vector.broadcast %136 : vector<1x1x64xf32> to vector<8x8x64xf32>
    %138 = arith.addf %134, %137 : vector<8x8x64xf32>
    %cst_156 = arith.constant 0.000000e+00 : f32
    %139 = vector.broadcast %cst_156 : f32 to vector<8x8x64xf32>
    %140 = arith.maximumf %138, %139 : vector<8x8x64xf32>
    %cst_157 = arith.constant 0.000000e+00 : f32
    %141 = vector.broadcast %cst_157 : f32 to vector<8x64xf32>
    %c0_158 = arith.constant 0 : index
    %c0_159 = arith.constant 0 : index
    %c0_160 = arith.constant 0 : index
    %142 = vector.load %arg9[%c0_158, %c0_159, %c0_160] : memref<10x8x64xf32, #tpu.memory_space<vmem>>, vector<1x8x64xf32>
    %143 = vector.shape_cast %142 : vector<1x8x64xf32> to vector<8x64xf32>
    %144 = vector.shape_cast %141 : vector<8x64xf32> to vector<1x8x64xf32>
    tpu.vector_store %arg9[%c0_158, %c0_159, %c0_160], %144 {strides = array<i32>} : memref<10x8x64xf32, #tpu.memory_space<vmem>>, vector<1x8x64xf32>,
    %cst_161 = arith.constant 0.000000e+00 : f32
    %145 = vector.broadcast %cst_161 : f32 to vector<8x64xf32>
    %c9 = arith.constant 9 : index
    %c0_162 = arith.constant 0 : index
    %c0_163 = arith.constant 0 : index
    %146 = vector.load %arg9[%c9, %c0_162, %c0_163] : memref<10x8x64xf32, #tpu.memory_space<vmem>>, vector<1x8x64xf32>
    %147 = vector.shape_cast %146 : vector<1x8x64xf32> to vector<8x64xf32>
    %148 = vector.shape_cast %145 : vector<8x64xf32> to vector<1x8x64xf32>
    tpu.vector_store %arg9[%c9, %c0_162, %c0_163], %148 {strides = array<i32>} : memref<10x8x64xf32, #tpu.memory_space<vmem>>, vector<1x8x64xf32>,
    %c1_164 = arith.constant 1 : index
    %c0_165 = arith.constant 0 : index
    %c0_166 = arith.constant 0 : index
    %149 = vector.load %arg9[%c1_164, %c0_165, %c0_166] : memref<10x8x64xf32, #tpu.memory_space<vmem>>, vector<8x8x64xf32>
    tpu.vector_store %arg9[%c1_164, %c0_165, %c0_166], %140 {strides = array<i32>} : memref<10x8x64xf32, #tpu.memory_space<vmem>>, vector<8x8x64xf32>,
    %c0_167 = arith.constant 0 : index
    %c0_168 = arith.constant 0 : index
    %150 = vector.load %arg6[%c0_167, %c0_168] : memref<64x64xf32, #tpu.memory_space<vmem>>, vector<64x64xf32>
    %c0_169 = arith.constant 0 : index
    %c0_170 = arith.constant 0 : index
    %151 = vector.load %arg7[%c0_169, %c0_170] : memref<64x64xf32, #tpu.memory_space<vmem>>, vector<64x64xf32>
    %cst_171 = arith.constant 0.000000e+00 : f32
    %152 = vector.broadcast %cst_171 : f32 to vector<64x128xf32>
    %c0_172 = arith.constant 0 : index
    %c0_173 = arith.constant 0 : index
    %c0_174 = arith.constant 0 : index
    %153 = vector.load %arg9[%c0_172, %c0_173, %c0_174] : memref<10x8x64xf32, #tpu.memory_space<vmem>>, vector<8x8x64xf32>
    %154 = vector.shape_cast %153 : vector<8x8x64xf32> to vector<64x64xf32>
    %c0_175 = arith.constant 0 : index
    %c0_176 = arith.constant 0 : index
    %c0_177 = arith.constant 0 : index
    %155 = vector.load %arg4[%c0_175, %c0_176, %c0_177] : memref<9x64x128xf32, #tpu.memory_space<vmem>>, vector<1x64x128xf32>
    %156 = vector.shape_cast %155 : vector<1x64x128xf32> to vector<64x128xf32>
    %cst_178 = arith.constant dense<0.000000e+00> : vector<64x128xf32>
    %157 = tpu.matmul %154, %156, %cst_178 {dimension_numbers = #tpu.dot_dimension_numbers<[1], [0], [0], [1], [0, 0, 1, 1], [], []>} : vector<64x64xf32>, vector<64x128xf32>, vector<64x128xf32> -> vector<64x128xf32>
    %c1_179 = arith.constant 1 : index
    %c0_180 = arith.constant 0 : index
    %c0_181 = arith.constant 0 : index
    %158 = vector.load %arg4[%c1_179, %c0_180, %c0_181] : memref<9x64x128xf32, #tpu.memory_space<vmem>>, vector<1x64x128xf32>
    %159 = vector.shape_cast %158 : vector<1x64x128xf32> to vector<64x128xf32>
    %cst_182 = arith.constant dense<0.000000e+00> : vector<64x128xf32>
    %160 = tpu.matmul %154, %159, %cst_182 {dimension_numbers = #tpu.dot_dimension_numbers<[1], [0], [0], [1], [0, 0, 1, 1], [], []>} : vector<64x64xf32>, vector<64x128xf32>, vector<64x128xf32> -> vector<64x128xf32>
    %c2_183 = arith.constant 2 : index
    %c0_184 = arith.constant 0 : index
    %c0_185 = arith.constant 0 : index
    %161 = vector.load %arg4[%c2_183, %c0_184, %c0_185] : memref<9x64x128xf32, #tpu.memory_space<vmem>>, vector<1x64x128xf32>
    %162 = vector.shape_cast %161 : vector<1x64x128xf32> to vector<64x128xf32>
    %cst_186 = arith.constant dense<0.000000e+00> : vector<64x128xf32>
    %163 = tpu.matmul %154, %162, %cst_186 {dimension_numbers = #tpu.dot_dimension_numbers<[1], [0], [0], [1], [0, 0, 1, 1], [], []>} : vector<64x64xf32>, vector<64x128xf32>, vector<64x128xf32> -> vector<64x128xf32>
    %164 = arith.addf %152, %160 : vector<64x128xf32>
    %cst_187 = arith.constant dense<0.000000e+00> : vector<64x128xf32>
    %165 = tpu.matmul %150, %157, %cst_187 {dimension_numbers = #tpu.dot_dimension_numbers<[1], [0], [0], [1], [0, 0, 1, 1], [], []>} : vector<64x64xf32>, vector<64x128xf32>, vector<64x128xf32> -> vector<64x128xf32>
    %166 = arith.addf %164, %165 : vector<64x128xf32>
    %cst_188 = arith.constant dense<0.000000e+00> : vector<64x128xf32>
    %167 = tpu.matmul %151, %163, %cst_188 {dimension_numbers = #tpu.dot_dimension_numbers<[1], [0], [0], [1], [0, 0, 1, 1], [], []>} : vector<64x64xf32>, vector<64x128xf32>, vector<64x128xf32> -> vector<64x128xf32>
    %168 = arith.addf %166, %167 : vector<64x128xf32>
    %c1_189 = arith.constant 1 : index
    %c0_190 = arith.constant 0 : index
    %c0_191 = arith.constant 0 : index
    %169 = vector.load %arg9[%c1_189, %c0_190, %c0_191] : memref<10x8x64xf32, #tpu.memory_space<vmem>>, vector<8x8x64xf32>
    %170 = vector.shape_cast %169 : vector<8x8x64xf32> to vector<64x64xf32>
    %c3_192 = arith.constant 3 : index
    %c0_193 = arith.constant 0 : index
    %c0_194 = arith.constant 0 : index
    %171 = vector.load %arg4[%c3_192, %c0_193, %c0_194] : memref<9x64x128xf32, #tpu.memory_space<vmem>>, vector<1x64x128xf32>
    %172 = vector.shape_cast %171 : vector<1x64x128xf32> to vector<64x128xf32>
    %cst_195 = arith.constant dense<0.000000e+00> : vector<64x128xf32>
    %173 = tpu.matmul %170, %172, %cst_195 {dimension_numbers = #tpu.dot_dimension_numbers<[1], [0], [0], [1], [0, 0, 1, 1], [], []>} : vector<64x64xf32>, vector<64x128xf32>, vector<64x128xf32> -> vector<64x128xf32>
    %c4_196 = arith.constant 4 : index
    %c0_197 = arith.constant 0 : index
    %c0_198 = arith.constant 0 : index
    %174 = vector.load %arg4[%c4_196, %c0_197, %c0_198] : memref<9x64x128xf32, #tpu.memory_space<vmem>>, vector<1x64x128xf32>
    %175 = vector.shape_cast %174 : vector<1x64x128xf32> to vector<64x128xf32>
    %cst_199 = arith.constant dense<0.000000e+00> : vector<64x128xf32>
    %176 = tpu.matmul %170, %175, %cst_199 {dimension_numbers = #tpu.dot_dimension_numbers<[1], [0], [0], [1], [0, 0, 1, 1], [], []>} : vector<64x64xf32>, vector<64x128xf32>, vector<64x128xf32> -> vector<64x128xf32>
    %c5_200 = arith.constant 5 : index
    %c0_201 = arith.constant 0 : index
    %c0_202 = arith.constant 0 : index
    %177 = vector.load %arg4[%c5_200, %c0_201, %c0_202] : memref<9x64x128xf32, #tpu.memory_space<vmem>>, vector<1x64x128xf32>
    %178 = vector.shape_cast %177 : vector<1x64x128xf32> to vector<64x128xf32>
    %cst_203 = arith.constant dense<0.000000e+00> : vector<64x128xf32>
    %179 = tpu.matmul %170, %178, %cst_203 {dimension_numbers = #tpu.dot_dimension_numbers<[1], [0], [0], [1], [0, 0, 1, 1], [], []>} : vector<64x64xf32>, vector<64x128xf32>, vector<64x128xf32> -> vector<64x128xf32>
    %180 = arith.addf %168, %176 : vector<64x128xf32>
    %cst_204 = arith.constant dense<0.000000e+00> : vector<64x128xf32>
    %181 = tpu.matmul %150, %173, %cst_204 {dimension_numbers = #tpu.dot_dimension_numbers<[1], [0], [0], [1], [0, 0, 1, 1], [], []>} : vector<64x64xf32>, vector<64x128xf32>, vector<64x128xf32> -> vector<64x128xf32>
    %182 = arith.addf %180, %181 : vector<64x128xf32>
    %cst_205 = arith.constant dense<0.000000e+00> : vector<64x128xf32>
    %183 = tpu.matmul %151, %179, %cst_205 {dimension_numbers = #tpu.dot_dimension_numbers<[1], [0], [0], [1], [0, 0, 1, 1], [], []>} : vector<64x64xf32>, vector<64x128xf32>, vector<64x128xf32> -> vector<64x128xf32>
    %184 = arith.addf %182, %183 : vector<64x128xf32>
    %c2_206 = arith.constant 2 : index
    %c0_207 = arith.constant 0 : index
    %c0_208 = arith.constant 0 : index
    %185 = vector.load %arg9[%c2_206, %c0_207, %c0_208] : memref<10x8x64xf32, #tpu.memory_space<vmem>>, vector<8x8x64xf32>
    %186 = vector.shape_cast %185 : vector<8x8x64xf32> to vector<64x64xf32>
    %c6_209 = arith.constant 6 : index
    %c0_210 = arith.constant 0 : index
    %c0_211 = arith.constant 0 : index
    %187 = vector.load %arg4[%c6_209, %c0_210, %c0_211] : memref<9x64x128xf32, #tpu.memory_space<vmem>>, vector<1x64x128xf32>
    %188 = vector.shape_cast %187 : vector<1x64x128xf32> to vector<64x128xf32>
    %cst_212 = arith.constant dense<0.000000e+00> : vector<64x128xf32>
    %189 = tpu.matmul %186, %188, %cst_212 {dimension_numbers = #tpu.dot_dimension_numbers<[1], [0], [0], [1], [0, 0, 1, 1], [], []>} : vector<64x64xf32>, vector<64x128xf32>, vector<64x128xf32> -> vector<64x128xf32>
    %c7_213 = arith.constant 7 : index
    %c0_214 = arith.constant 0 : index
    %c0_215 = arith.constant 0 : index
    %190 = vector.load %arg4[%c7_213, %c0_214, %c0_215] : memref<9x64x128xf32, #tpu.memory_space<vmem>>, vector<1x64x128xf32>
    %191 = vector.shape_cast %190 : vector<1x64x128xf32> to vector<64x128xf32>
    %cst_216 = arith.constant dense<0.000000e+00> : vector<64x128xf32>
    %192 = tpu.matmul %186, %191, %cst_216 {dimension_numbers = #tpu.dot_dimension_numbers<[1], [0], [0], [1], [0, 0, 1, 1], [], []>} : vector<64x64xf32>, vector<64x128xf32>, vector<64x128xf32> -> vector<64x128xf32>
    %c8_217 = arith.constant 8 : index
    %c0_218 = arith.constant 0 : index
    %c0_219 = arith.constant 0 : index
    %193 = vector.load %arg4[%c8_217, %c0_218, %c0_219] : memref<9x64x128xf32, #tpu.memory_space<vmem>>, vector<1x64x128xf32>
    %194 = vector.shape_cast %193 : vector<1x64x128xf32> to vector<64x128xf32>
    %cst_220 = arith.constant dense<0.000000e+00> : vector<64x128xf32>
    %195 = tpu.matmul %186, %194, %cst_220 {dimension_numbers = #tpu.dot_dimension_numbers<[1], [0], [0], [1], [0, 0, 1, 1], [], []>} : vector<64x64xf32>, vector<64x128xf32>, vector<64x128xf32> -> vector<64x128xf32>
    %196 = arith.addf %184, %192 : vector<64x128xf32>
    %cst_221 = arith.constant dense<0.000000e+00> : vector<64x128xf32>
    %197 = tpu.matmul %150, %189, %cst_221 {dimension_numbers = #tpu.dot_dimension_numbers<[1], [0], [0], [1], [0, 0, 1, 1], [], []>} : vector<64x64xf32>, vector<64x128xf32>, vector<64x128xf32> -> vector<64x128xf32>
    %198 = arith.addf %196, %197 : vector<64x128xf32>
    %cst_222 = arith.constant dense<0.000000e+00> : vector<64x128xf32>
    %199 = tpu.matmul %151, %195, %cst_222 {dimension_numbers = #tpu.dot_dimension_numbers<[1], [0], [0], [1], [0, 0, 1, 1], [], []>} : vector<64x64xf32>, vector<64x128xf32>, vector<64x128xf32> -> vector<64x128xf32>
    %200 = arith.addf %198, %199 : vector<64x128xf32>
    %c0_223 = arith.constant 0 : index
    %c0_224 = arith.constant 0 : index
    %201 = vector.load %arg5[%c0_223, %c0_224] : memref<1x128xf32, #tpu.memory_space<vmem>>, vector<1x128xf32>
    %202 = vector.broadcast %201 : vector<1x128xf32> to vector<64x128xf32>
    %203 = arith.addf %200, %202 : vector<64x128xf32>
    %c0_225 = arith.constant 0 : index
    %c0_226 = arith.constant 0 : index
    %c0_227 = arith.constant 0 : index
    %204 = vector.load %arg8[%c0_225, %c0_226, %c0_227] : memref<1x64x128xf32, #tpu.memory_space<vmem>>, vector<1x64x128xf32>
    %205 = vector.shape_cast %204 : vector<1x64x128xf32> to vector<64x128xf32>
    %206 = vector.shape_cast %203 : vector<64x128xf32> to vector<1x64x128xf32>
    tpu.vector_store %arg8[%c0_225, %c0_226, %c0_227], %206 {strides = array<i32>} : memref<1x64x128xf32, #tpu.memory_space<vmem>>, vector<1x64x128xf32>,
    return
  }
  func.func @transform_0(%arg0: i32) -> (i32, i32, i32, i32, i32) {
    %c0_i32 = arith.constant 0 : i32
    %c0_i32_0 = arith.constant 0 : i32
    %c0_i32_1 = arith.constant 0 : i32
    %c0_i32_2 = arith.constant 0 : i32
    %c0_i32_3 = arith.constant 0 : i32
    return %arg0, %c0_i32, %c0_i32_0, %c0_i32_1, %c0_i32_2 : i32, i32, i32, i32, i32
  }
  func.func @transform_1(%arg0: i32) -> (i32, i32, i32) {
    %c0_i32 = arith.constant 0 : i32
    %c0_i32_0 = arith.constant 0 : i32
    %c0_i32_1 = arith.constant 0 : i32
    %c0_i32_2 = arith.constant 0 : i32
    return %c0_i32, %c0_i32_0, %c0_i32_1 : i32, i32, i32
  }
  func.func @transform_2(%arg0: i32) -> (i32, i32) {
    %c0_i32 = arith.constant 0 : i32
    %c0_i32_0 = arith.constant 0 : i32
    %c0_i32_1 = arith.constant 0 : i32
    return %c0_i32, %c0_i32_0 : i32, i32
  }
  func.func @transform_3(%arg0: i32) -> (i32, i32, i32) {
    %c0_i32 = arith.constant 0 : i32
    %c0_i32_0 = arith.constant 0 : i32
    %c0_i32_1 = arith.constant 0 : i32
    %c0_i32_2 = arith.constant 0 : i32
    return %c0_i32, %c0_i32_0, %c0_i32_1 : i32, i32, i32
  }
  func.func @transform_4(%arg0: i32) -> (i32, i32) {
    %c0_i32 = arith.constant 0 : i32
    %c0_i32_0 = arith.constant 0 : i32
    %c0_i32_1 = arith.constant 0 : i32
    return %c0_i32, %c0_i32_0 : i32, i32
  }
  func.func @transform_5(%arg0: i32) -> (i32, i32) {
    %c0_i32 = arith.constant 0 : i32
    %c0_i32_0 = arith.constant 0 : i32
    %c0_i32_1 = arith.constant 0 : i32
    return %c0_i32, %c0_i32_0 : i32, i32
  }
  func.func @transform_6(%arg0: i32) -> (i32, i32) {
    %c0_i32 = arith.constant 0 : i32
    %c0_i32_0 = arith.constant 0 : i32
    %c0_i32_1 = arith.constant 0 : i32
    return %c0_i32, %c0_i32_0 : i32, i32
  }
  func.func @transform_7(%arg0: i32) -> (i32, i32, i32) {
    %c0_i32 = arith.constant 0 : i32
    %c0_i32_0 = arith.constant 0 : i32
    %c0_i32_1 = arith.constant 0 : i32
    return %arg0, %c0_i32, %c0_i32_0 : i32, i32, i32
  }
}

</mosaic_0001>

<bundles_post_ra>
// kernel: vgg_forward.1
= control target key start
LH: loop header
LB: loop body
LE: loop exit
PB: predicated region body
PF: predicated region fallthrough
CT: control target
= control target key end

     0   :  { %12 = vsyncpa [#allocation4], 0  ;;  %s6584_s0 = inlined_call_operand.vmem [shape: f32[2,4,18,8,4], index: 0, kind: input, shape index: {}]   ;;  %s6585_s1 = inlined_call_operand.vmem [shape: f32[9,4,64], index: 1, kind: input, shape index: {}]   ;;  %s6586_s2 = inlined_call_operand.vmem [shape: f32[1,64], index: 2, kind: input, shape index: {}]   ;;  %s6587_s3 = inlined_call_operand.vmem [shape: f32[9,64,128], index: 3, kind: input, shape index: {}]   ;;  %s6588_s4 = inlined_call_operand.vmem [shape: f32[1,128], index: 4, kind: input, shape index: {}]   ;;  %s6589_s5 = inlined_call_operand.vmem [shape: f32[64,64], index: 5, kind: input, shape index: {}]   ;;  %s6590_s6 = inlined_call_operand.vmem [shape: f32[64,64], index: 6, kind: input, shape index: {}]   ;;  %s6591_s7 = inlined_call_operand.hbm [shape: f32[2,64,128], index: 7, kind: output, shape index: {}]  }
   0x1   :  { %14 = vsyncpa [#allocation4 + $0x1], 0  ;;  %s4432_s24 = smov 0   ;;  %s4434_s25 = smov 0  }
   0x2   :  { %s4436_s26 = smov 0   ;;  %s4438_s27 = smov 0  }
   0x3 LB: > { %s4453_s28 = sadd.s32 4294967295, %s4387_s27   ;;  %s3563_s29 = sadd.s32 4294967294, %s4387_s27   ;;  %s4387_s27 = sphi %s4438_s27, %s6734_s27   ;;  %s4383_s26 = sphi %s4436_s26, %s6733_s26   ;;  %s4379_s25 = sphi %s4434_s25, %s6732_s25   ;;  %s4375_s24 = sphi %s4432_s24, %s6731_s24  }
   0x4   : > { %s4457_s30 = sadd.s32 1, %s4387_s27   ;;  %s179_s8 = sadd.s32 1, %s4383_s26 }
   0x5   : > { %s176_s9 = ssub.s32 %s4387_s27, %s4457_s30  ;;  %p189_p0 = scmp.ne.s32.totalorder %s4383_s26, %s4379_s25 }
   0x6   : > { %p177_p1 = scmp.eq.s32.totalorder %s176_s9, 0  ;;  %p190_p2 = scmp.eq.s32.totalorder %s4453_s28, 1 }
   0x7   : > { %p195_p3 = scmp.ne.s32.totalorder %s4379_s25, %s4375_s24  ;;  %p196_p4 = scmp.eq.s32.totalorder %s3563_s29, 1 }
   0x8   : > { %s4468_s10 = scalar_select %p177_p1, %s4383_s26, %s179_s8  }
   0x9   : > { %p4470_p5 = por %p190_p2, %p189_p0  ;;  %p4474_p6 = por %p196_p4, %p195_p3 }
   0xa   : > { %p3566_p7 = scmp.ge.s32.totalorder %s4387_s27, 1  ;;  %p240_p8 = scmp.lt.s32.totalorder %s4387_s27, 3 }
   0xc   : > { %p241_p9 = pnand %p3566_p7, %p240_p8 }
   0xe   : > { %244 = sbr.rel (%p241_p9) target bundleno = 1443 (0x5a3), region = 48 }
  0x13   : > { %v4483_v0 = vld [vmem:[%s6585_s1 + $0x4] sm:$0xf]  ;;  %vm362_vm0 = vcmask 1043456   ;;  %v4488_v1 = vld [vmem:[%s6585_s1] sm:$0xf]  ;;  %p272_p10 = scmp.lt.s32.totalorder %s4453_s28, 1 }
  0x14   : > { %3586 = vmatpush.msk.msra.mxu0 %vm362_vm0, %v4483_v0  ;;  %4249 = vmatpush.msk.msra.mxu3 %vm362_vm0, %v4483_v0  ;;  %v4498_v2 = vld [vmem:[%s6585_s1 + $0x8] sm:$0xf]  ;;  %vm313_vm1 = vcmask 31744   ;;  %v4563_v15 = vld [vmem:[%s6585_s1 + $0xc] sm:$0xf]  ;;  %vm2540_vm2 = vcmask 523264  }
  0x15   : > { %3603 = vmatpush.msk.msra.mxu1 %vm362_vm0, %v4488_v1  ;;  %3637 = vmatpush.msk.msra.mxu2 %vm362_vm0, %v4498_v2  ;;  %s273_s19 = scalar_select %p272_p10, %s4453_s28, 1  ;;  %v3704_v40 = vld [vmem:[%s6585_s1 + $0x10] sm:$0xf]  ;;  %v4708_v41 = vld [vmem:[%s6585_s1 + $0x18] sm:$0xf] }
  0x16   : > { %4250 = vmatpush.msk.msrb.mxu3 %vm362_vm0, %v4488_v1  ;;  %3705 = vmatpush.msk.msrb.mxu0 %vm362_vm0, %v3704_v40  ;;  %v3738_v45 = vld [vmem:[%s6585_s1 + $0x14] sm:$0xf]  ;;  %s269_s21 = sand.u32 1, %s4379_s25   ;;  %s4248_s13 = sshll.u32 %s4453_s28, 6 }
  0x17   : > { %s4252_s20 = smul.u32 576, %s273_s19  ;;  %3773 = vmatpush.msk.msrb.mxu2 %vm362_vm0, %v4708_v41  ;;  %3739 = vmatpush.msk.msrb.mxu1 %vm362_vm0, %v3738_v45  ;;  %s3567_s22 = sshll.u32 %s269_s21, 6 }
  0x18   : > { %s6526_s9 = scalar_lea.vmem [#allocation3], %s3567_s22  ;;  %s3497_s16 = scalar_lea.hbm %s6591_s7, %s4248_s13 }
  0x19   : > { %s4510_s23 = scalar_lea.vmem %s6584_s0, %s4252_s20  ;;  %s3498_s17 = sshll.u32 %s6526_s9, 4  ;;  %s3499_s17 = int_to_ptr.vmem [resolvable:$true] %s3498_s17 }
  0x1a   : > { %v4513_v3 = vld [vmem:[%s4510_s23 + $0x90] sm:$0xff]  ;;  %v4516_v4 = vld [vmem:[%s4510_s23 + $0x100] sm:$0xff]  ;;  %v4532_v7 = vld [vmem:[%s4510_s23 + $0x98] sm:$0xff]  ;;  %s3486_s28 = scalar_lea.sflag [#allocation4], %s269_s21  ;;  %s4345_s29 = scalar_lea.hbm %s6591_s7, 128 }
  0x1b   : > { %v277_v5 = vld [vmem:[%s4510_s23] sm:$0xff]  ;;  %3587 = vmatmul.msk.f32.vlgmr.msra.gmra.mxu0 %vm313_vm1, %v4513_v3  ;;  %3601 = vmatmul.msk.f32.vlgmr.msra.gmra.mxu3 %vm313_vm1, %v4516_v4  ;;  %v4535_v8 = vld [vmem:[%s4510_s23 + $0x108] sm:$0xff]  ;;  %v4552_v12 = vld [vmem:[%s4510_s23 + $0x70] sm:$0xff] }
  0x1c   : > { %v4524_v6 = vld [vmem:[%s4510_s23 + $0x120] sm:$0xff]  ;;  %3604 = vmatmul.msk.f32.vlgmr.msra.gmra.mxu1 %vm313_vm1, %v277_v5  ;;  %4251 = vmatpush.msk.msra.mxu3 %vm362_vm0, %v4498_v2  ;;  %v278_v9 = vld [vmem:[%s4510_s23 + $0x8] sm:$0xff]  ;;  %v4555_v13 = vld [vmem:[%s4510_s23 + $0x10] sm:$0xff] }
  0x1d   : > { %3638 = vmatmul.msk.f32.vlgmr.msra.gmra.mxu2 %vm313_vm1, %v4524_v6  ;;  %v4539_v10 = vld [vmem:[%s4510_s23 + $0x128] sm:$0xff]  ;;  %v4549_v11 = vld [vmem:[%s4510_s23 + $0xa0] sm:$0xff]  ;;  %v4558_v14 = vld [vmem:[%s4510_s23 + $0x130] sm:$0xff]  ;;  %3858 = vmatpush.msk.msra.mxu1 %vm362_vm0, %v4483_v0 }
  0x1e   : > { %v4576_v16 = vld [vmem:[%s4510_s23 + $0xa8] sm:$0xff]  ;;  %v4579_v17 = vld [vmem:[%s4510_s23 + $0x78] sm:$0xff]  ;;  %v4596_v20 = vld [vmem:[%s4510_s23 + $0xb0] sm:$0xff]  ;;  %3875 = vmatpush.msk.msra.mxu2 %vm362_vm0, %v4488_v1 }
  0x1f   : > { %v4582_v18 = vld [vmem:[%s4510_s23 + $0x18] sm:$0xff]  ;;  %v4599_v21 = vld [vmem:[%s4510_s23 + $0x190] sm:$0xff]  ;;  %v4602_v22 = vld [vmem:[%s4510_s23 + $0x20] sm:$0xff] }
  0x20   : > { %v4585_v19 = vld [vmem:[%s4510_s23 + $0x138] sm:$0xff]  ;;  %6609 = vst [vmem:[#allocation6_spill] sm:$0xff] %v4599_v21  ;;  %v4605_v23 = vld [vmem:[%s4510_s23 + $0x140] sm:$0xff]  ;;  %v4622_v26 = vld [vmem:[%s4510_s23 + $0x28] sm:$0xff] }
  0x21   : > { %v4616_v24 = vld [vmem:[%s4510_s23 + $0xb8] sm:$0xff]  ;;  %v4625_v27 = vld [vmem:[%s4510_s23 + $0x148] sm:$0xff]  ;;  %v4636_v28 = vld [vmem:[%s4510_s23 + $0xc0] sm:$0xff] }
  0x22   : > { %v4619_v25 = vld [vmem:[%s4510_s23 + $0x198] sm:$0xff]  ;;  %6611 = vst [vmem:[#allocation8_spill] sm:$0xff] %v4625_v27  ;;  %v4639_v29 = vld [vmem:[%s4510_s23 + $0x30] sm:$0xff]  ;;  %v4652_v31 = vld [vmem:[%s4510_s23 + $0xc8] sm:$0xff] }
  0x23   : > { %3588 = vmatmul.msk.f32.gmra.mxu0 %vm313_vm1, %v4532_v7  ;;  %3602 = vmatmul.msk.f32.gmra.mxu3 %vm313_vm1, %v4535_v8  ;;  %6610 = vst [vmem:[#allocation7_spill] sm:$0xff] %v4619_v25  ;;  %v4642_v30 = vld [vmem:[%s4510_s23 + $0x150] sm:$0xff]  ;;  %v4655_v32 = vld [vmem:[%s4510_s23 + $0x38] sm:$0xff]  ;;  %v4672_v35 = vld [vmem:[%s4510_s23 + $0x40] sm:$0xff] }
  0x24   : > { %3605 = vmatmul.msk.f32.gmra.mxu1 %vm313_vm1, %v278_v9  ;;  %6612 = vst [vmem:[#allocation9_spill] sm:$0xff] %v4642_v30  ;;  %v4658_v33 = vld [vmem:[%s4510_s23 + $0x158] sm:$0xff]  ;;  %v4669_v34 = vld [vmem:[%s4510_s23 + $0xd0] sm:$0xff]  ;;  %v4675_v36 = vld [vmem:[%s4510_s23 + $0x160] sm:$0xff] }
  0x25   : > { %3639 = vmatmul.msk.f32.gmra.mxu2 %vm313_vm1, %v4539_v10  ;;  %6613 = vst [vmem:[#allocation10_spill] sm:$0xff] %v4658_v33  ;;  %v4686_v37 = vld [vmem:[%s4510_s23 + $0xd8] sm:$0xff]  ;;  %v4689_v38 = vld [vmem:[%s4510_s23 + $0x48] sm:$0xff]  ;;  %v4716_v42 = vld [vmem:[%s4510_s23 + $0xe0] sm:$0xff] }
  0x26   : > { %6614 = vst [vmem:[#allocation11_spill] sm:$0xff] %v4675_v36  ;;  %v4692_v39 = vld [vmem:[%s4510_s23 + $0x168] sm:$0xff]  ;;  %v4719_v43 = vld [vmem:[%s4510_s23 + $0x50] sm:$0xff]  ;;  %v4742_v47 = vld [vmem:[%s4510_s23 + $0x58] sm:$0xff] }
  0x27   : > { %v4722_v44 = vld [vmem:[%s4510_s23 + $0x170] sm:$0xff]  ;;  %v4739_v46 = vld [vmem:[%s4510_s23 + $0xe8] sm:$0xff]  ;;  %v4745_v48 = vld [vmem:[%s4510_s23 + $0x178] sm:$0xff] }
  0x28   : > { %v4756_v49 = vld [vmem:[%s4510_s23 + $0xf0] sm:$0xff]  ;;  %v4759_v50 = vld [vmem:[%s4510_s23 + $0x60] sm:$0xff]  ;;  %v4773_v52 = vld [vmem:[%s4510_s23 + $0xf8] sm:$0xff] }
  0x29   : > { %v4762_v51 = vld [vmem:[%s4510_s23 + $0x180] sm:$0xff]  ;;  %v4776_v53 = vld [vmem:[%s4510_s23 + $0x68] sm:$0xff]  ;;  %v4830_v1 = vld [vmem:[%s6585_s1 + $0x1c] sm:$0xf] }
  0x2a   : > { %v4779_v54 = vld [vmem:[%s4510_s23 + $0x188] sm:$0xff] }
  0x2b   : > { %3589 = vmatmul.msk.f32.gmra.mxu0 %vm313_vm1, %v4549_v11  ;;  %3618 = vmatmul.msk.f32.vlgmr.msrb.gmra.mxu3 %vm313_vm1, %v4552_v12  ;;  %6615 = vst [vmem:[#allocation12_spill] sm:$0xff] %v4779_v54 }
  0x2c   : > { %3606 = vmatmul.msk.f32.gmra.mxu1 %vm313_vm1, %v4555_v13  ;;  %3671 = vmatpush.msk.msrb.mxu3 %vm362_vm0, %v4563_v15 }
  0x2d   : > { %3640 = vmatmul.msk.f32.gmra.mxu2 %vm313_vm1, %v4558_v14 }
  0x33   : > { %3590 = vmatmul.msk.f32.gmra.mxu0 %vm313_vm1, %v4576_v16  ;;  %3619 = vmatmul.msk.f32.gmra.mxu3 %vm313_vm1, %v4579_v17 }
  0x34   : > { %3607 = vmatmul.msk.f32.gmra.mxu1 %vm313_vm1, %v4582_v18 }
  0x35   : > { %3641 = vmatmul.msk.f32.gmra.mxu2 %vm313_vm1, %v4585_v19 }
  0x3b   : > { %3591 = vmatmul.msk.f32.gmra.mxu0 %vm313_vm1, %v4596_v20  ;;  %3652 = vmatmul.msk.f32.vlgmr.msra.gmra.mxu3 %vm313_vm1, %v4599_v21 }
  0x3c   : > { %3608 = vmatmul.msk.f32.gmra.mxu1 %vm313_vm1, %v4602_v22  ;;  %3807 = vmatpush.msk.msra.mxu3 %vm362_vm0, %v4830_v1 }
  0x3d   : > { %3642 = vmatmul.msk.f32.gmra.mxu2 %vm313_vm1, %v4605_v23 }
  0x43   : > { %3592 = vmatmul.msk.f32.gmra.mxu0 %vm313_vm1, %v4616_v24  ;;  %3653 = vmatmul.msk.f32.gmra.mxu3 %vm313_vm1, %v4619_v25 }
  0x44   : > { %3609 = vmatmul.msk.f32.gmra.mxu1 %vm313_vm1, %v4622_v26 }
  0x45   : > { %3643 = vmatmul.msk.f32.gmra.mxu2 %vm313_vm1, %v4625_v27 }
  0x4b   : > { %3593 = vmatmul.msk.f32.gmra.mxu0 %vm313_vm1, %v4636_v28  ;;  %3672 = vmatmul.msk.f32.vlgmr.msrb.gmra.mxu3 %vm313_vm1, %v278_v9 }
  0x4c   : > { %3610 = vmatmul.msk.f32.gmra.mxu1 %vm313_vm1, %v4639_v29  ;;  %3908 = vmatpush.msk.msrb.mxu3 %vm362_vm0, %v4498_v2 }
  0x4d   : > { %3644 = vmatmul.msk.f32.gmra.mxu2 %vm313_vm1, %v4642_v30 }
  0x53   : > { %3594 = vmatmul.msk.f32.gmra.mxu0 %vm313_vm1, %v4652_v31  ;;  %3673 = vmatmul.msk.f32.gmra.mxu3 %vm313_vm1, %v4555_v13 }
  0x54   : > { %3611 = vmatmul.msk.f32.gmra.mxu1 %vm313_vm1, %v4655_v32 }
  0x55   : > { %3645 = vmatmul.msk.f32.gmra.mxu2 %vm313_vm1, %v4658_v33 }
  0x5b   : > { %3595 = vmatmul.msk.f32.gmra.mxu0 %vm313_vm1, %v4669_v34  ;;  %3674 = vmatmul.msk.f32.gmra.mxu3 %vm313_vm1, %v4582_v18 }
  0x5c   : > { %3612 = vmatmul.msk.f32.gmra.mxu1 %vm313_vm1, %v4672_v35 }
  0x5d   : > { %3646 = vmatmul.msk.f32.gmra.mxu2 %vm313_vm1, %v4675_v36 }
  0x63   : > { %3596 = vmatmul.msk.f32.gmra.mxu0 %vm313_vm1, %v4686_v37  ;;  %3675 = vmatmul.msk.f32.gmra.mxu3 %vm313_vm1, %v4602_v22 }
  0x64   : > { %3613 = vmatmul.msk.f32.gmra.mxu1 %vm313_vm1, %v4689_v38 }
  0x65   : > { %3647 = vmatmul.msk.f32.gmra.mxu2 %vm313_vm1, %v4692_v39 }
  0x6b   : > { %3597 = vmatmul.msk.f32.gmra.mxu0 %vm313_vm1, %v4716_v42  ;;  %3676 = vmatmul.msk.f32.gmra.mxu3 %vm313_vm1, %v4622_v26 }
  0x6c   : > { %3614 = vmatmul.msk.f32.gmra.mxu1 %vm313_vm1, %v4719_v43 }
  0x6d   : > { %3648 = vmatmul.msk.f32.gmra.mxu2 %vm313_vm1, %v4722_v44 }
  0x73   : > { %3598 = vmatmul.msk.f32.gmra.mxu0 %vm313_vm1, %v4739_v46  ;;  %3677 = vmatmul.msk.f32.gmra.mxu3 %vm313_vm1, %v4639_v29 }
  0x74   : > { %3615 = vmatmul.msk.f32.gmra.mxu1 %vm313_vm1, %v4742_v47 }
  0x75   : > { %3649 = vmatmul.msk.f32.gmra.mxu2 %vm313_vm1, %v4745_v48 }
  0x7b   : > { %3599 = vmatmul.msk.f32.gmra.mxu0 %vm313_vm1, %v4756_v49  ;;  %3678 = vmatmul.msk.f32.gmra.mxu3 %vm313_vm1, %v4655_v32 }
  0x7c   : > { %3616 = vmatmul.msk.f32.gmra.mxu1 %vm313_vm1, %v4759_v50 }
  0x7d   : > { %3650 = vmatmul.msk.f32.gmra.mxu2 %vm313_vm1, %v4762_v51 }
  0x83   : > { %3600 = vmatmul.msk.f32.gmra.mxu0 %vm313_vm1, %v4773_v52  ;;  %3679 = vmatmul.msk.f32.gmra.mxu3 %vm313_vm1, %v4672_v35 }
  0x84   : > { %3617 = vmatmul.msk.f32.gmra.mxu1 %vm313_vm1, %v4776_v53 }
  0x85   : > { %3651 = vmatmul.msk.f32.gmra.mxu2 %vm313_vm1, %v4779_v54 }
  0x8b   : > { %3680 = vmatmul.msk.f32.gmra.mxu3 %vm313_vm1, %v4689_v38  ;;  %3706 = vmatmul.msk.f32.vlgmr.msrb.gmra.mxu0 %vm313_vm1, %v4532_v7 }
  0x8c   : > { %3740 = vmatmul.msk.f32.vlgmr.msrb.gmra.mxu1 %vm313_vm1, %v4539_v10 }
  0x8d   : > { %3774 = vmatmul.msk.f32.vlgmr.msrb.gmra.mxu2 %vm313_vm1, %v4555_v13  ;;  %3942 = vmatpush.msk.msrb.mxu1 %vm362_vm0, %v3704_v40 }
  0x8e   : > { %3975 = vmatpush.msk.msrb.mxu2 %vm362_vm0, %v3738_v45 }
  0x93   : > { %3681 = vmatmul.msk.f32.gmra.mxu3 %vm313_vm1, %v4719_v43  ;;  %3707 = vmatmul.msk.f32.gmra.mxu0 %vm313_vm1, %v4549_v11 }
  0x94   : > { %3741 = vmatmul.msk.f32.gmra.mxu1 %vm313_vm1, %v4558_v14 }
  0x95   : > { %3775 = vmatmul.msk.f32.gmra.mxu2 %vm313_vm1, %v4582_v18 }
  0x98   : > { %v383_v55 = vpop.f32.mrf.mxu0 }
  0x99   : > { %v499_v56 = vpop.f32.mrf.mxu1 }
  0x9b   : > { %3682 = vmatmul.msk.f32.gmra.mxu3 %vm313_vm1, %v4742_v47  ;;  %3708 = vmatmul.msk.f32.gmra.mxu0 %vm313_vm1, %v4576_v16 }
  0x9c   : > { %3742 = vmatmul.msk.f32.gmra.mxu1 %vm313_vm1, %v4585_v19 }
  0x9d   : > { %3776 = vmatmul.msk.f32.gmra.mxu2 %vm313_vm1, %v4602_v22 }
  0x9e   : > { %v425_v57 = vpop.f32.mrf.mxu3 }
  0xa0   : > { %v634_v58 = vpop.f32.mrf.mxu2  ;;  %v386_v59 = vpop.f32.mrf.mxu0 }
  0xa1   : > { %v502_v60 = vpop.f32.mrf.mxu1 }
  0xa3   : > { %3683 = vmatmul.msk.f32.gmra.mxu3 %vm313_vm1, %v4759_v50  ;;  %3709 = vmatmul.msk.f32.gmra.mxu0 %vm313_vm1, %v4596_v20 }
  0xa4   : > { %3743 = vmatmul.msk.f32.gmra.mxu1 %vm313_vm1, %v4605_v23 }
  0xa5   : > { %3777 = vmatmul.msk.f32.gmra.mxu2 %vm313_vm1, %v4622_v26 }
  0xa6   : > { %v428_v61 = vpop.f32.mrf.mxu3 }
  0xa8   : > { %v637_v62 = vpop.f32.mrf.mxu2  ;;  %v4823_v63 = vpop.f32.mrf.mxu0 }
  0xa9   : > { %v4825_v0 = vpop.f32.mrf.mxu1 }
  0xab   : > { %3684 = vmatmul.msk.f32.gmra.mxu3 %vm313_vm1, %v4776_v53  ;;  %3710 = vmatmul.msk.f32.gmra.mxu0 %vm313_vm1, %v4616_v24 }
  0xac   : > { %3744 = vmatmul.msk.f32.gmra.mxu1 %vm313_vm1, %v4625_v27  ;;  %v500_v27 = vadd.f32 %v499_v56, %v383_v55 }
  0xad   : > { %3778 = vmatmul.msk.f32.gmra.mxu2 %vm313_vm1, %v4639_v29 }
  0xae   : > { %v541_v5 = vpop.f32.mrf.mxu3 }
  0xaf   : > { %v542_v9 = vadd.f32 %v541_v5, %v425_v57 }
  0xb0   : > { %v640_v13 = vpop.f32.mrf.mxu2  ;;  %v4844_v18 = vpop.f32.mrf.mxu0 }
  0xb1   : > { %v4846_v22 = vpop.f32.mrf.mxu1 }
  0xb3   : > { %3685 = vmatmul.msk.f32.gmra.mxu3 %vm313_vm1, %v4552_v12  ;;  %3711 = vmatmul.msk.f32.gmra.mxu0 %vm313_vm1, %v4636_v28 }
  0xb4   : > { %3745 = vmatmul.msk.f32.gmra.mxu1 %vm313_vm1, %v4642_v30 }
  0xb5   : > { %3779 = vmatmul.msk.f32.gmra.mxu2 %vm313_vm1, %v4655_v32 }
  0xb6   : > { %v544_v2 = vpop.f32.mrf.mxu3 }
  0xb7   : > { %v545_v26 = vadd.f32 %v544_v2, %v428_v61  ;;  %v4877_v2 = vld [vmem:[%s4510_s23 + $0x80] sm:$0xff] }
  0xb8   : > { %v4856_v29 = vpop.f32.mrf.mxu2  ;;  %v4858_v40 = vpop.f32.mrf.mxu0 }
  0xb9   : > { %v4860_v45 = vpop.f32.mrf.mxu1 }
  0xbb   : > { %3686 = vmatmul.msk.f32.gmra.mxu3 %vm313_vm1, %v4579_v17  ;;  %3712 = vmatmul.msk.f32.gmra.mxu0 %vm313_vm1, %v4652_v31 }
  0xbc   : > { %3746 = vmatmul.msk.f32.gmra.mxu1 %vm313_vm1, %v4658_v33 }
  0xbd   : > { %3780 = vmatmul.msk.f32.gmra.mxu2 %vm313_vm1, %v4672_v35 }
  0xbe   : > { %v676_v32 = vpop.f32.mrf.mxu3 }
  0xbf   : > { %v4872_v61 = vadd.f32 %v676_v32, %v542_v9 }
  0xc0   : > { %v4870_v57 = vpop.f32.mrf.mxu2  ;;  %v4874_v5 = vpop.f32.mrf.mxu0 }
  0xc1   : > { %6616 = vst [vmem:[#allocation13_spill] sm:$0xff] %v4872_v61  ;;  %v4879_v30 = vpop.f32.mrf.mxu1 }
  0xc3   : > { %3687 = vmatmul.msk.f32.gmra.mxu3 %vm313_vm1, %v4877_v2  ;;  %3713 = vmatmul.msk.f32.gmra.mxu0 %vm313_vm1, %v4669_v34 }
  0xc4   : > { %3747 = vmatmul.msk.f32.gmra.mxu1 %vm313_vm1, %v4675_v36  ;;  %v503_v36 = vadd.f32 %v502_v60, %v386_v59  ;;  %v4934_v60 = vld [vmem:[%s6585_s1 + $0x20] sm:$0xf] }
  0xc5   : > { %3781 = vmatmul.msk.f32.gmra.mxu2 %vm313_vm1, %v4689_v38  ;;  %v682_v38 = vadd.f32 %v634_v58, %v500_v27  ;;  %3841 = vmatpush.msk.msra.mxu0 %vm362_vm0, %v4934_v60 }
  0xc6   : > { %v679_v35 = vpop.f32.mrf.mxu3  ;;  %v683_v27 = vadd.f32 %v637_v62, %v503_v36 }
  0xc7   : > { %v4891_v32 = vadd.f32 %v679_v35, %v545_v26  ;;  %3925 = vmatpush.msk.msrb.mxu0 %vm362_vm0, %v4563_v15 }
  0xc8   : > { %v4889_v9 = vpop.f32.mrf.mxu2  ;;  %v4893_v61 = vpop.f32.mrf.mxu0 }
  0xc9   : > { %6617 = vst [vmem:[#allocation14_spill] sm:$0xff] %v4891_v32  ;;  %v4895_v33 = vpop.f32.mrf.mxu1 }
  0xcb   : > { %3714 = vmatmul.msk.f32.gmra.mxu0 %vm313_vm1, %v4686_v37  ;;  %3808 = vmatmul.msk.f32.vlgmr.msra.gmra.mxu3 %vm313_vm1, %v4549_v11 }
  0xcc   : > { %3748 = vmatmul.msk.f32.gmra.mxu1 %vm313_vm1, %v4692_v39  ;;  %3992 = vmatpush.msk.msra.mxu3 %vm362_vm0, %v4708_v41 }
  0xcd   : > { %3782 = vmatmul.msk.f32.gmra.mxu2 %vm313_vm1, %v4719_v43 }
  0xce   : > { %v785_v26 = vpop.f32.mrf.mxu3 }
  0xcf   : > { %v4909_v55 = vadd.f32 %v785_v26, %v682_v38 }
  0xd0   : > { %v4907_v35 = vpop.f32.mrf.mxu2  ;;  %v4911_v56 = vpop.f32.mrf.mxu0 }
  0xd1   : > { %v4913_v32 = vpop.f32.mrf.mxu1 }
  0xd3   : > { %3715 = vmatmul.msk.f32.gmra.mxu0 %vm313_vm1, %v4716_v42  ;;  %3809 = vmatmul.msk.f32.gmra.mxu3 %vm313_vm1, %v4576_v16 }
  0xd4   : > { %3749 = vmatmul.msk.f32.gmra.mxu1 %vm313_vm1, %v4722_v44 }
  0xd5   : > { %3783 = vmatmul.msk.f32.gmra.mxu2 %vm313_vm1, %v4742_v47  ;;  %v506_v47 = vadd.f32 %v4825_v0, %v4823_v63 }
  0xd6   : > { %v788_v41 = vpop.f32.mrf.mxu3 }
  0xd7   : > { %v4925_v58 = vadd.f32 %v788_v41, %v683_v27  ;;  %v684_v36 = vadd.f32 %v640_v13, %v506_v47 }
  0xd8   : > { %v4923_v43 = vpop.f32.mrf.mxu2  ;;  %v4927_v38 = vpop.f32.mrf.mxu0 }
  0xd9   : > { %v4929_v59 = vpop.f32.mrf.mxu1 }
  0xdb   : > { %3716 = vmatmul.msk.f32.gmra.mxu0 %vm313_vm1, %v4739_v46  ;;  %3810 = vmatmul.msk.f32.gmra.mxu3 %vm313_vm1, %v4596_v20 }
  0xdc   : > { %3750 = vmatmul.msk.f32.gmra.mxu1 %vm313_vm1, %v4745_v48 }
  0xdd   : > { %3784 = vmatmul.msk.f32.gmra.mxu2 %vm313_vm1, %v4759_v50  ;;  %v509_v50 = vadd.f32 %v4846_v22, %v4844_v18 }
  0xde   : > { %v791_v62 = vpop.f32.mrf.mxu3 }
  0xdf   : > { %v4952_v0 = vadd.f32 %v791_v62, %v684_v36  ;;  %v685_v15 = vadd.f32 %v4856_v29, %v509_v50  ;;  %v512_v36 = vadd.f32 %v4860_v45, %v4858_v40 }
  0xe0   : > { %v4950_v63 = vpop.f32.mrf.mxu2  ;;  %v4954_v26 = vpop.f32.mrf.mxu0 }
  0xe1   : > { %v4956_v27 = vpop.f32.mrf.mxu1 }
  0xe3   : > { %3717 = vmatmul.msk.f32.gmra.mxu0 %vm313_vm1, %v4756_v49  ;;  %3811 = vmatmul.msk.f32.gmra.mxu3 %vm313_vm1, %v4616_v24 }
  0xe4   : > { %3751 = vmatmul.msk.f32.gmra.mxu1 %vm313_vm1, %v4762_v51 }
  0xe5   : > { %3785 = vmatmul.msk.f32.gmra.mxu2 %vm313_vm1, %v4776_v53  ;;  %v686_v53 = vadd.f32 %v4870_v57, %v512_v36 }
  0xe6   : > { %v794_v13 = vpop.f32.mrf.mxu3 }
  0xe7   : > { %v4971_v47 = vadd.f32 %v794_v13, %v685_v15  ;;  %v515_v15 = vadd.f32 %v4879_v30, %v4874_v5 }
  0xe8   : > { %v4969_v41 = vpop.f32.mrf.mxu2  ;;  %v4973_v18 = vpop.f32.mrf.mxu0 }
  0xe9   : > { %v4975_v22 = vpop.f32.mrf.mxu1 }
  0xeb   : > { %3718 = vmatmul.msk.f32.gmra.mxu0 %vm313_vm1, %v4773_v52  ;;  %3812 = vmatmul.msk.f32.gmra.mxu3 %vm313_vm1, %v4636_v28 }
  0xec   : > { %3752 = vmatmul.msk.f32.gmra.mxu1 %vm313_vm1, %v4779_v54  ;;  %v524_v54 = vadd.f32 %v4929_v59, %v4927_v38 }
  0xed   : > { %3786 = vmatmul.msk.f32.gmra.mxu2 %vm313_vm1, %v4552_v12  ;;  %v687_v12 = vadd.f32 %v4889_v9, %v515_v15 }
  0xee   : > { %v797_v29 = vpop.f32.mrf.mxu3 }
  0xef   : > { %v4990_v50 = vadd.f32 %v797_v29, %v686_v53 }
  0xf0   : > { %v4988_v62 = vpop.f32.mrf.mxu2  ;;  %v4992_v40 = vpop.f32.mrf.mxu0 }
  0xf1   : > { %v4994_v45 = vpop.f32.mrf.mxu1 }
  0xf3   : > { %3719 = vmatmul.msk.f32.gmra.mxu0 %vm313_vm1, %v4516_v4  ;;  %3813 = vmatmul.msk.f32.gmra.mxu3 %vm313_vm1, %v4652_v31 }
  0xf4   : > { %3753 = vmatmul.msk.f32.gmra.mxu1 %vm313_vm1, %v4599_v21  ;;  %v5039_v21 = vld [vmem:[%s4510_s23 + $0x1a0] sm:$0xff] }
  0xf5   : > { %3787 = vmatmul.msk.f32.gmra.mxu2 %vm313_vm1, %v4579_v17  ;;  %v518_v17 = vadd.f32 %v4895_v33, %v4893_v61  ;;  %v5033_v61 = vld [vmem:[%s4510_s23 + $0x110] sm:$0xff] }
  0xf6   : > { %v800_v57 = vpop.f32.mrf.mxu3 }
  0xf7   : > { %v5009_v30 = vadd.f32 %v800_v57, %v687_v12  ;;  %v688_v9 = vadd.f32 %v4907_v35, %v518_v17  ;;  %v3771_v57 = vld [vmem:[%s4510_s23 + $0x88] sm:$0xff] }
  0xf8   : > { %v5007_v13 = vpop.f32.mrf.mxu2  ;;  %v5011_v5 = vpop.f32.mrf.mxu0 }
  0xf9   : > { %v5013_v36 = vpop.f32.mrf.mxu1 }
  0xfb   : > { %3720 = vmatmul.msk.f32.gmra.mxu0 %vm313_vm1, %v4535_v8  ;;  %3814 = vmatmul.msk.f32.gmra.mxu3 %vm313_vm1, %v4669_v34 }
  0xfc   : > { %3754 = vmatmul.msk.f32.gmra.mxu1 %vm313_vm1, %v4619_v25 }
  0xfd   : > { %3788 = vmatmul.msk.f32.gmra.mxu2 %vm313_vm1, %v4877_v2  ;;  %v521_v2 = vadd.f32 %v4913_v32, %v4911_v56 }
  0xfe   : > { %v803_v53 = vpop.f32.mrf.mxu3 }
  0xff   : > { %v5028_v15 = vadd.f32 %v803_v53, %v688_v9  ;;  %v689_v35 = vadd.f32 %v4923_v43, %v521_v2  ;;  %v690_v43 = vadd.f32 %v4950_v63, %v524_v54 }
 0x100   : > { %v5026_v29 = vpop.f32.mrf.mxu2  ;;  %v5030_v33 = vpop.f32.mrf.mxu0 }
 0x101   : > { %v5035_v12 = vpop.f32.mrf.mxu1 }
 0x103   : > { %3721 = vmatmul.msk.f32.gmra.mxu0 %vm313_vm1, %v5033_v61  ;;  %3815 = vmatmul.msk.f32.gmra.mxu3 %vm313_vm1, %v4686_v37 }
 0x104   : > { %3755 = vmatmul.msk.f32.gmra.mxu1 %vm313_vm1, %v5039_v21 }
 0x105   : > { %3789 = vmatmul.msk.f32.gmra.mxu2 %vm313_vm1, %v3771_v57 }
 0x106   : > { %v806_v17 = vpop.f32.mrf.mxu3 }
 0x107   : > { %v5053_v53 = vadd.f32 %v806_v17, %v689_v35 }
 0x108   : > { %v5051_v9 = vpop.f32.mrf.mxu2  ;;  %v936_v25 = vpop.f32.mrf.mxu0 }
 0x109   : > { %v1087_v32 = vpop.f32.mrf.mxu1  ;;  %v984_v56 = vadd.f32 %v936_v25, %v4909_v55 }
 0x10b   : > { %3816 = vmatmul.msk.f32.gmra.mxu3 %vm313_vm1, %v4716_v42  ;;  %3842 = vmatmul.msk.f32.vlgmr.msra.gmra.mxu0 %vm313_vm1, %v4558_v14  ;;  %v1135_v25 = vadd.f32 %v1087_v32, %v984_v56  ;;  %v530_v56 = vadd.f32 %v4975_v22, %v4973_v18 }
 0x10c   : > { %3859 = vmatmul.msk.f32.vlgmr.msra.gmra.mxu1 %vm313_vm1, %v4524_v6  ;;  %4009 = vmatpush.msk.msra.mxu0 %vm362_vm0, %v4830_v1  ;;  %v527_v6 = vadd.f32 %v4956_v27, %v4954_v26 }
 0x10d   : > { %3876 = vmatmul.msk.f32.vlgmr.msra.gmra.mxu2 %vm313_vm1, %v4513_v3  ;;  %4042 = vmatpush.msk.msra.mxu1 %vm362_vm0, %v4934_v60 }
 0x10e   : > { %v809_v55 = vpop.f32.mrf.mxu3  ;;  %v691_v54 = vadd.f32 %v4969_v41, %v527_v6  ;;  %v692_v41 = vadd.f32 %v4988_v62, %v530_v56 }
 0x10f   : > { %v5071_v38 = vadd.f32 %v809_v55, %v690_v43 }
 0x110   : > { %v1238_v59 = vpop.f32.mrf.mxu2  ;;  %v939_v2 = vpop.f32.mrf.mxu0 }
 0x111   : > { %v5073_v57 = vadd.f32 %v1238_v59, %v1135_v25  ;;  %v1090_v3 = vpop.f32.mrf.mxu1  ;;  %v985_v35 = vadd.f32 %v939_v2, %v4925_v58 }
 0x113   : > { %3817 = vmatmul.msk.f32.gmra.mxu3 %vm313_vm1, %v4739_v46  ;;  %3843 = vmatmul.msk.f32.gmra.mxu0 %vm313_vm1, %v4585_v19  ;;  %v1136_v1 = vadd.f32 %v1090_v3, %v985_v35  ;;  %v533_v3 = vadd.f32 %v4994_v45, %v4992_v40  ;;  %v6618_v35 = vld [vmem:[#allocation8_spill] sm:$0xff] }
 0x114   : > { %3860 = vmatmul.msk.f32.gmra.mxu1 %vm313_vm1, %v4539_v10 }
 0x115   : > { %3877 = vmatmul.msk.f32.gmra.mxu2 %vm313_vm1, %v4532_v7  ;;  %v693_v62 = vadd.f32 %v5007_v13, %v533_v3 }
 0x116   : > { %v812_v60 = vpop.f32.mrf.mxu3 }
 0x117   : > { %v5087_v58 = vadd.f32 %v812_v60, %v691_v54 }
 0x118   : > { %v1241_v63 = vpop.f32.mrf.mxu2  ;;  %v942_v27 = vpop.f32.mrf.mxu0 }
 0x119   : > { %v5089_v26 = vadd.f32 %v1241_v63, %v1136_v1  ;;  %v1093_v17 = vpop.f32.mrf.mxu1  ;;  %v986_v32 = vadd.f32 %v942_v27, %v4952_v0  ;;  %v536_v27 = vadd.f32 %v5013_v36, %v5011_v5 }
 0x11b   : > { %3818 = vmatmul.msk.f32.gmra.mxu3 %vm313_vm1, %v4756_v49  ;;  %3844 = vmatmul.msk.f32.gmra.mxu0 %vm313_vm1, %v4605_v23  ;;  %v1137_v43 = vadd.f32 %v1093_v17, %v986_v32  ;;  %v6619_v17 = vld [vmem:[#allocation9_spill] sm:$0xff]  ;;  %v694_v13 = vadd.f32 %v5026_v29, %v536_v27 }
 0x11c   : > { %3861 = vmatmul.msk.f32.gmra.mxu1 %vm313_vm1, %v4558_v14 }
 0x11d   : > { %3878 = vmatmul.msk.f32.gmra.mxu2 %vm313_vm1, %v4549_v11 }
 0x11e   : > { %v815_v25 = vpop.f32.mrf.mxu3 }
 0x11f   : > { %v5103_v0 = vadd.f32 %v815_v25, %v692_v41 }
 0x120   : > { %v1244_v55 = vpop.f32.mrf.mxu2  ;;  %v945_v22 = vpop.f32.mrf.mxu0 }
 0x121   : > { %v5105_v18 = vadd.f32 %v1244_v55, %v1137_v43  ;;  %v1096_v59 = vpop.f32.mrf.mxu1  ;;  %v987_v2 = vadd.f32 %v945_v22, %v4971_v47  ;;  %v539_v55 = vadd.f32 %v5035_v12, %v5030_v33  ;;  %v6620_v22 = vld [vmem:[#allocation10_spill] sm:$0xff] }
 0x123   : > { %3819 = vmatmul.msk.f32.gmra.mxu3 %vm313_vm1, %v4773_v52  ;;  %3845 = vmatmul.msk.f32.gmra.mxu0 %vm313_vm1, %v6618_v35  ;;  %v1138_v6 = vadd.f32 %v1096_v59, %v987_v2  ;;  %v695_v29 = vadd.f32 %v5051_v9, %v539_v55 }
 0x124   : > { %3862 = vmatmul.msk.f32.gmra.mxu1 %vm313_vm1, %v4585_v19 }
 0x125   : > { %3879 = vmatmul.msk.f32.gmra.mxu2 %vm313_vm1, %v4576_v16 }
 0x126   : > { %v818_v54 = vpop.f32.mrf.mxu3 }
 0x127   : > { %v5119_v47 = vadd.f32 %v818_v54, %v693_v62  ;;  %v6621_v54 = vld [vmem:[#allocation11_spill] sm:$0xff] }
 0x128   : > { %v1247_v1 = vpop.f32.mrf.mxu2  ;;  %v948_v45 = vpop.f32.mrf.mxu0 }
 0x129   : > { %v5121_v40 = vadd.f32 %v1247_v1, %v1138_v6  ;;  %v1099_v60 = vpop.f32.mrf.mxu1  ;;  %v988_v63 = vadd.f32 %v948_v45, %v4990_v50  ;;  %v6622_v45 = vld [vmem:[#allocation13_spill] sm:$0xff] }
 0x12b   : > { %3820 = vmatmul.msk.f32.gmra.mxu3 %vm313_vm1, %v4516_v4  ;;  %3846 = vmatmul.msk.f32.gmra.mxu0 %vm313_vm1, %v6619_v17  ;;  %v1139_v32 = vadd.f32 %v1099_v60, %v988_v63 }
 0x12c   : > { %3863 = vmatmul.msk.f32.gmra.mxu1 %vm313_vm1, %v4605_v23 }
 0x12d   : > { %3880 = vmatmul.msk.f32.gmra.mxu2 %vm313_vm1, %v4596_v20 }
 0x12e   : > { %v821_v56 = vpop.f32.mrf.mxu3 }
 0x12f   : > { %v5135_v50 = vadd.f32 %v821_v56, %v694_v13  ;;  %v5170_v13 = vld [vmem:[%s4510_s23 + $0x118] sm:$0xff] }
 0x130   : > { %v1250_v41 = vpop.f32.mrf.mxu2  ;;  %v951_v36 = vpop.f32.mrf.mxu0 }
 0x131   : > { %v5137_v5 = vadd.f32 %v1250_v41, %v1139_v32  ;;  %v1102_v43 = vpop.f32.mrf.mxu1  ;;  %v989_v25 = vadd.f32 %v951_v36, %v5009_v30 }
 0x133   : > { %3821 = vmatmul.msk.f32.gmra.mxu3 %vm313_vm1, %v4535_v8  ;;  %3847 = vmatmul.msk.f32.gmra.mxu0 %vm313_vm1, %v6620_v22  ;;  %v1140_v59 = vadd.f32 %v1102_v43, %v989_v25  ;;  %v6623_v43 = vld [vmem:[#allocation14_spill] sm:$0xff] }
 0x134   : > { %3864 = vmatmul.msk.f32.gmra.mxu1 %vm313_vm1, %v6618_v35 }
 0x135   : > { %3881 = vmatmul.msk.f32.gmra.mxu2 %vm313_vm1, %v4616_v24 }
 0x136   : > { %v824_v2 = vpop.f32.mrf.mxu3 }
 0x137   : > { %v5151_v30 = vadd.f32 %v824_v2, %v695_v29 }
 0x138   : > { %v1253_v33 = vpop.f32.mrf.mxu2  ;;  %v954_v3 = vpop.f32.mrf.mxu0 }
 0x139   : > { %v5153_v12 = vadd.f32 %v1253_v33, %v1140_v59  ;;  %v1105_v62 = vpop.f32.mrf.mxu1  ;;  %v990_v6 = vadd.f32 %v954_v3, %v5028_v15  ;;  %v3892_v59 = vld [vmem:[%s4510_s23 + $0x1b0] sm:$0xff] }
 0x13b   : > { %3822 = vmatmul.msk.f32.gmra.mxu3 %vm313_vm1, %v5033_v61  ;;  %3848 = vmatmul.msk.f32.gmra.mxu0 %vm313_vm1, %v6621_v54  ;;  %v1141_v9 = vadd.f32 %v1105_v62, %v990_v6 }
 0x13c   : > { %3865 = vmatmul.msk.f32.gmra.mxu1 %vm313_vm1, %v6619_v17 }
 0x13d   : > { %3882 = vmatmul.msk.f32.gmra.mxu2 %vm313_vm1, %v4636_v28 }
 0x13e   : > { %v827_v1 = vpop.f32.mrf.mxu3 }
 0x13f   : > { %v5165_v60 = vadd.f32 %v827_v1, %v6622_v45  ;;  %v5201_v45 = vld [vmem:[%s4510_s23 + $0x1b8] sm:$0xff] }
 0x140   : > { %v1256_v63 = vpop.f32.mrf.mxu2  ;;  %v957_v27 = vpop.f32.mrf.mxu0 }
 0x141   : > { %v5167_v15 = vadd.f32 %v1256_v63, %v1141_v9  ;;  %v1108_v32 = vpop.f32.mrf.mxu1  ;;  %v991_v56 = vadd.f32 %v957_v27, %v5053_v53 }
 0x143   : > { %3823 = vmatmul.msk.f32.gmra.mxu3 %vm313_vm1, %v5170_v13  ;;  %3849 = vmatmul.msk.f32.gmra.mxu0 %vm313_vm1, %v4692_v39  ;;  %v1142_v41 = vadd.f32 %v1108_v32, %v991_v56 }
 0x144   : > { %3866 = vmatmul.msk.f32.gmra.mxu1 %vm313_vm1, %v6620_v22 }
 0x145   : > { %3883 = vmatmul.msk.f32.gmra.mxu2 %vm313_vm1, %v4652_v31 }
 0x146   : > { %v830_v36 = vpop.f32.mrf.mxu3 }
 0x147   : > { %v5182_v25 = vadd.f32 %v830_v36, %v6623_v43  ;;  %v5218_v43 = vld [vmem:[%s4510_s23 + $0x1c0] sm:$0xff] }
 0x148   : > { %v1259_v55 = vpop.f32.mrf.mxu2  ;;  %v960_v29 = vpop.f32.mrf.mxu0 }
 0x149   : > { %v5184_v53 = vadd.f32 %v1259_v55, %v1142_v41  ;;  %v1111_v2 = vpop.f32.mrf.mxu1  ;;  %v992_v33 = vadd.f32 %v960_v29, %v5071_v38 }
 0x14b   : > { %3850 = vmatmul.msk.f32.gmra.mxu0 %vm313_vm1, %v4722_v44  ;;  %3909 = vmatmul.msk.f32.vlgmr.msrb.gmra.mxu3 %vm313_vm1, %v3892_v59  ;;  %v1143_v3 = vadd.f32 %v1111_v2, %v992_v33 }
 0x14c   : > { %3867 = vmatmul.msk.f32.gmra.mxu1 %vm313_vm1, %v6621_v54 }
 0x14d   : > { %3884 = vmatmul.msk.f32.gmra.mxu2 %vm313_vm1, %v4669_v34 }
 0x14e   : > { %v1389_v62 = vpop.f32.mrf.mxu3 }
 0x14f   : > { %v5196_v9 = vadd.f32 %v1389_v62, %v5073_v57  ;;  %v5235_v62 = vld [vmem:[%s4510_s23 + $0x1c8] sm:$0xff] }
 0x150   : > { %v1262_v6 = vpop.f32.mrf.mxu2  ;;  %v963_v38 = vpop.f32.mrf.mxu0 }
 0x151   : > { %v5198_v1 = vadd.f32 %v1262_v6, %v1143_v3  ;;  %v1114_v63 = vpop.f32.mrf.mxu1  ;;  %v993_v27 = vadd.f32 %v963_v38, %v5087_v58 }
 0x153   : > { %3851 = vmatmul.msk.f32.gmra.mxu0 %vm313_vm1, %v4745_v48  ;;  %3910 = vmatmul.msk.f32.gmra.mxu3 %vm313_vm1, %v5201_v45  ;;  %v1144_v57 = vadd.f32 %v1114_v63, %v993_v27  ;;  %v6624_v63 = vld [vmem:[#allocation12_spill] sm:$0xff] }
 0x154   : > { %3868 = vmatmul.msk.f32.gmra.mxu1 %vm313_vm1, %v4692_v39 }
 0x155   : > { %3885 = vmatmul.msk.f32.gmra.mxu2 %vm313_vm1, %v4686_v37 }
 0x156   : > { %v1392_v32 = vpop.f32.mrf.mxu3 }
 0x157   : > { %v5213_v41 = vadd.f32 %v1392_v32, %v5089_v26 }
 0x158   : > { %v1265_v56 = vpop.f32.mrf.mxu2  ;;  %v966_v36 = vpop.f32.mrf.mxu0 }
 0x159   : > { %v5215_v58 = vadd.f32 %v1265_v56, %v1144_v57  ;;  %v1117_v55 = vpop.f32.mrf.mxu1  ;;  %v994_v29 = vadd.f32 %v966_v36, %v5103_v0  ;;  %v5252_v36 = vld [vmem:[%s4510_s23 + $0x1d0] sm:$0xff] }
 0x15b   : > { %3852 = vmatmul.msk.f32.gmra.mxu0 %vm313_vm1, %v4762_v51  ;;  %3911 = vmatmul.msk.f32.gmra.mxu3 %vm313_vm1, %v5218_v43  ;;  %v1145_v26 = vadd.f32 %v1117_v55, %v994_v29 }
 0x15c   : > { %3869 = vmatmul.msk.f32.gmra.mxu1 %vm313_vm1, %v4722_v44 }
 0x15d   : > { %3886 = vmatmul.msk.f32.gmra.mxu2 %vm313_vm1, %v4716_v42 }
 0x15e   : > { %v1395_v59 = vpop.f32.mrf.mxu3 }
 0x15f   : > { %v5230_v33 = vadd.f32 %v1395_v59, %v5105_v18 }
 0x160   : > { %v1268_v2 = vpop.f32.mrf.mxu2  ;;  %v969_v3 = vpop.f32.mrf.mxu0 }
 0x161   : > { %v5232_v0 = vadd.f32 %v1268_v2, %v1145_v26  ;;  %v1120_v6 = vpop.f32.mrf.mxu1  ;;  %v995_v38 = vadd.f32 %v969_v3, %v5119_v47  ;;  %v6625_v26 = vld [vmem:[#allocation6_spill] sm:$0xff] }
 0x163   : > { %3853 = vmatmul.msk.f32.gmra.mxu0 %vm313_vm1, %v6624_v63  ;;  %3912 = vmatmul.msk.f32.gmra.mxu3 %vm313_vm1, %v5235_v62  ;;  %v1146_v18 = vadd.f32 %v1120_v6, %v995_v38  ;;  %v5269_v38 = vld [vmem:[%s4510_s23 + $0x1d8] sm:$0xff] }
 0x164   : > { %3870 = vmatmul.msk.f32.gmra.mxu1 %vm313_vm1, %v4745_v48 }
 0x165   : > { %3887 = vmatmul.msk.f32.gmra.mxu2 %vm313_vm1, %v4739_v46 }
 0x166   : > { %v1398_v27 = vpop.f32.mrf.mxu3 }
 0x167   : > { %v5247_v32 = vadd.f32 %v1398_v27, %v5121_v40 }
 0x168   : > { %v1271_v57 = vpop.f32.mrf.mxu2  ;;  %v972_v56 = vpop.f32.mrf.mxu0 }
 0x169   : > { %v5249_v47 = vadd.f32 %v1271_v57, %v1146_v18  ;;  %v1123_v55 = vpop.f32.mrf.mxu1  ;;  %v996_v29 = vadd.f32 %v972_v56, %v5135_v50  ;;  %v6626_v57 = vld [vmem:[#allocation7_spill] sm:$0xff] }
 0x16b   : > { %3854 = vmatmul.msk.f32.gmra.mxu0 %vm313_vm1, %v6625_v26  ;;  %3913 = vmatmul.msk.f32.gmra.mxu3 %vm313_vm1, %v5252_v36  ;;  %v1147_v40 = vadd.f32 %v1123_v55, %v996_v29 }
 0x16c   : > { %3871 = vmatmul.msk.f32.gmra.mxu1 %vm313_vm1, %v4762_v51 }
 0x16d   : > { %3888 = vmatmul.msk.f32.gmra.mxu2 %vm313_vm1, %v4756_v49 }
 0x16e   : > { %v1401_v59 = vpop.f32.mrf.mxu3 }
 0x16f   : > { %v5264_v3 = vadd.f32 %v1401_v59, %v5137_v5  ;;  %v5286_v59 = vld [vmem:[%s4510_s23 + $0x1e0] sm:$0xff] }
 0x170   : > { %v1274_v2 = vpop.f32.mrf.mxu2  ;;  %v975_v6 = vpop.f32.mrf.mxu0 }
 0x171   : > { %v5266_v50 = vadd.f32 %v1274_v2, %v1147_v40  ;;  %v1126_v18 = vpop.f32.mrf.mxu1  ;;  %v997_v27 = vadd.f32 %v975_v6, %v5151_v30 }
 0x173   : > { %3855 = vmatmul.msk.f32.gmra.mxu0 %vm313_vm1, %v6626_v57  ;;  %3914 = vmatmul.msk.f32.gmra.mxu3 %vm313_vm1, %v5269_v38  ;;  %v1148_v5 = vadd.f32 %v1126_v18, %v997_v27 }
 0x174   : > { %3872 = vmatmul.msk.f32.gmra.mxu1 %vm313_vm1, %v6624_v63 }
 0x175   : > { %3889 = vmatmul.msk.f32.gmra.mxu2 %vm313_vm1, %v4773_v52 }
 0x176   : > { %v1404_v56 = vpop.f32.mrf.mxu3 }
 0x177   : > { %v5281_v29 = vadd.f32 %v1404_v56, %v5153_v12 }
 0x178   : > { %v1277_v55 = vpop.f32.mrf.mxu2  ;;  %v978_v40 = vpop.f32.mrf.mxu0 }
 0x179   : > { %6627 = vst [vmem:[#allocation8_spill] sm:$0xff] %v5281_v29  ;;  %v5283_v30 = vadd.f32 %v1277_v55, %v1148_v5  ;;  %v1129_v2 = vpop.f32.mrf.mxu1  ;;  %v998_v6 = vadd.f32 %v978_v40, %v5165_v60  ;;  %v5303_v55 = vld [vmem:[%s4510_s23 + $0x1a8] sm:$0xff] }
 0x17a   : > { %v5306_v40 = vld [vmem:[%s4510_s23 + $0x1e8] sm:$0xff] }
 0x17b   : > { %3856 = vmatmul.msk.f32.gmra.mxu0 %vm313_vm1, %v5039_v21  ;;  %3915 = vmatmul.msk.f32.gmra.mxu3 %vm313_vm1, %v5286_v59  ;;  %v1149_v12 = vadd.f32 %v1129_v2, %v998_v6 }
 0x17c   : > { %3873 = vmatmul.msk.f32.gmra.mxu1 %vm313_vm1, %v6625_v26 }
 0x17d   : > { %3890 = vmatmul.msk.f32.gmra.mxu2 %vm313_vm1, %v4516_v4 }
 0x17e   : > { %v1407_v18 = vpop.f32.mrf.mxu3 }
 0x17f   : > { %v5298_v5 = vadd.f32 %v1407_v18, %v5167_v15  ;;  %v5325_v18 = vld [vmem:[%s4510_s23 + $0x1f0] sm:$0xff] }
 0x180   : > { %v1280_v27 = vpop.f32.mrf.mxu2  ;;  %v981_v60 = vpop.f32.mrf.mxu0 }
 0x181   : > { %v5300_v56 = vadd.f32 %v1280_v27, %v1149_v12  ;;  %v1132_v29 = vpop.f32.mrf.mxu1  ;;  %v999_v4 = vadd.f32 %v981_v60, %v5182_v25 }
 0x183   : > { %3857 = vmatmul.msk.f32.gmra.mxu0 %vm313_vm1, %v5303_v55  ;;  %3916 = vmatmul.msk.f32.gmra.mxu3 %vm313_vm1, %v5306_v40  ;;  %v1150_v15 = vadd.f32 %v1132_v29, %v999_v4  ;;  %v5343_v4 = vld [vmem:[%s4510_s23 + $0x1f8] sm:$0xff] }
 0x184   : > { %3874 = vmatmul.msk.f32.gmra.mxu1 %vm313_vm1, %v6626_v57 }
 0x185   : > { %3891 = vmatmul.msk.f32.gmra.mxu2 %vm313_vm1, %v4535_v8 }
 0x186   : > { %v1410_v26 = vpop.f32.mrf.mxu3 }
 0x187   : > { %v5318_v6 = vadd.f32 %v1410_v26, %v5184_v53 }
 0x188   : > { %v1283_v2 = vpop.f32.mrf.mxu2  ;;  %v5322_v12 = vpop.f32.mrf.mxu0 }
 0x189   : > { %v5320_v25 = vadd.f32 %v1283_v2, %v1150_v15  ;;  %v1621_v27 = vpop.f32.mrf.mxu1  ;;  %v5361_v2 = vld [vmem:[%s4510_s23 + $0x200] sm:$0xff] }
 0x18b   : > { %3917 = vmatmul.msk.f32.gmra.mxu3 %vm313_vm1, %v5325_v18  ;;  %3926 = vmatmul.msk.f32.vlgmr.msrb.gmra.mxu0 %vm313_vm1, %v4532_v7 }
 0x18c   : > { %3943 = vmatmul.msk.f32.vlgmr.msrb.gmra.mxu1 %vm313_vm1, %v4539_v10 }
 0x18d   : > { %3976 = vmatmul.msk.f32.vlgmr.msrb.gmra.mxu2 %vm313_vm1, %v5201_v45 }
 0x18e   : > { %v1413_v8 = vpop.f32.mrf.mxu3 }
 0x18f   : > { %v5336_v53 = vadd.f32 %v1413_v8, %v5198_v1 }
 0x190   : > { %v1686_v57 = vpop.f32.mrf.mxu2  ;;  %v5340_v60 = vpop.f32.mrf.mxu0 }
 0x191   : > { %6628 = vst [vmem:[#allocation9_spill] sm:$0xff] %v5336_v53  ;;  %v5338_v29 = vadd.f32 %v1686_v57, %v1621_v27  ;;  %v1624_v15 = vpop.f32.mrf.mxu1 }
 0x193   : > { %3918 = vmatmul.msk.f32.gmra.mxu3 %vm313_vm1, %v5343_v4  ;;  %3927 = vmatmul.msk.f32.gmra.mxu0 %vm313_vm1, %v4549_v11 }
 0x194   : > { %3944 = vmatmul.msk.f32.gmra.mxu1 %vm313_vm1, %v4558_v14 }
 0x195   : > { %3977 = vmatmul.msk.f32.gmra.mxu2 %vm313_vm1, %v5218_v43 }
 0x196   : > { %v1416_v7 = vpop.f32.mrf.mxu3 }
 0x197   : > { %v5354_v10 = vadd.f32 %v1416_v7, %v5215_v58 }
 0x198   : > { %v1689_v1 = vpop.f32.mrf.mxu2  ;;  %v5358_v26 = vpop.f32.mrf.mxu0 }
 0x199   : > { %6629 = vst [vmem:[#allocation10_spill] sm:$0xff] %v5354_v10  ;;  %v5356_v45 = vadd.f32 %v1689_v1, %v1624_v15  ;;  %v1627_v27 = vpop.f32.mrf.mxu1  ;;  %v5379_v15 = vld [vmem:[%s4510_s23 + $0x208] sm:$0xff]  ;;  %v4315_v10 = vld [vmem:[%s4510_s23 + $0xf8] sm:$0xff] }
 0x19b   : > { %3919 = vmatmul.msk.f32.gmra.mxu3 %vm313_vm1, %v5361_v2  ;;  %3928 = vmatmul.msk.f32.gmra.mxu0 %vm313_vm1, %v4576_v16 }
 0x19c   : > { %3945 = vmatmul.msk.f32.gmra.mxu1 %vm313_vm1, %v4585_v19 }
 0x19d   : > { %3978 = vmatmul.msk.f32.gmra.mxu2 %vm313_vm1, %v5235_v62 }
 0x19e   : > { %v1419_v11 = vpop.f32.mrf.mxu3 }
 0x19f   : > { %v5372_v14 = vadd.f32 %v1419_v11, %v5232_v0  ;;  %v5397_v11 = vld [vmem:[%s4510_s23 + $0x210] sm:$0xff] }
 0x1a0   : > { %v1692_v58 = vpop.f32.mrf.mxu2  ;;  %v5376_v57 = vpop.f32.mrf.mxu0 }
 0x1a1   : > { %6630 = vst [vmem:[#allocation11_spill] sm:$0xff] %v5372_v14  ;;  %v5374_v8 = vadd.f32 %v1692_v58, %v1627_v27  ;;  %v1630_v7 = vpop.f32.mrf.mxu1  ;;  %v4313_v14 = vld [vmem:[%s4510_s23 + $0xf0] sm:$0xff] }
 0x1a3   : > { %3920 = vmatmul.msk.f32.gmra.mxu3 %vm313_vm1, %v5379_v15  ;;  %3929 = vmatmul.msk.f32.gmra.mxu0 %vm313_vm1, %v4596_v20 }
 0x1a4   : > { %3946 = vmatmul.msk.f32.gmra.mxu1 %vm313_vm1, %v4605_v23 }
 0x1a5   : > { %3979 = vmatmul.msk.f32.gmra.mxu2 %vm313_vm1, %v5252_v36 }
 0x1a6   : > { %v1422_v16 = vpop.f32.mrf.mxu3 }
 0x1a7   : > { %v5390_v19 = vadd.f32 %v1422_v16, %v5249_v47 }
 0x1a8   : > { %v1695_v0 = vpop.f32.mrf.mxu2  ;;  %v5394_v27 = vpop.f32.mrf.mxu0 }
 0x1a9   : > { %6631 = vst [vmem:[#allocation13_spill] sm:$0xff] %v5390_v19  ;;  %v5392_v1 = vadd.f32 %v1695_v0, %v1630_v7  ;;  %v1633_v58 = vpop.f32.mrf.mxu1  ;;  %v5415_v0 = vld [vmem:[%s4510_s23 + $0x218] sm:$0xff] }
 0x1ab   : > { %3921 = vmatmul.msk.f32.gmra.mxu3 %vm313_vm1, %v5397_v11  ;;  %3930 = vmatmul.msk.f32.gmra.mxu0 %vm313_vm1, %v4616_v24 }
 0x1ac   : > { %3947 = vmatmul.msk.f32.gmra.mxu1 %vm313_vm1, %v6618_v35 }
 0x1ad   : > { %3980 = vmatmul.msk.f32.gmra.mxu2 %vm313_vm1, %v5269_v38 }
 0x1ae   : > { %v1425_v20 = vpop.f32.mrf.mxu3 }
 0x1af   : > { %v5408_v23 = vadd.f32 %v1425_v20, %v5266_v50 }
 0x1b0   : > { %v1698_v47 = vpop.f32.mrf.mxu2  ;;  %v5412_v16 = vpop.f32.mrf.mxu0 }
 0x1b1   : > { %6632 = vst [vmem:[#allocation14_spill] sm:$0xff] %v5408_v23  ;;  %v5410_v7 = vadd.f32 %v1698_v47, %v1633_v58  ;;  %v1636_v19 = vpop.f32.mrf.mxu1  ;;  %v5433_v47 = vld [vmem:[%s4510_s23 + $0x220] sm:$0xff] }
 0x1b3   : > { %3922 = vmatmul.msk.f32.gmra.mxu3 %vm313_vm1, %v5415_v0  ;;  %3931 = vmatmul.msk.f32.gmra.mxu0 %vm313_vm1, %v4636_v28 }
 0x1b4   : > { %3948 = vmatmul.msk.f32.gmra.mxu1 %vm313_vm1, %v6619_v17 }
 0x1b5   : > { %3981 = vmatmul.msk.f32.gmra.mxu2 %vm313_vm1, %v5286_v59 }
 0x1b6   : > { %v1428_v24 = vpop.f32.mrf.mxu3 }
 0x1b7   : > { %v5426_v35 = vadd.f32 %v1428_v24, %v5283_v30 }
 0x1b8   : > { %v1701_v50 = vpop.f32.mrf.mxu2  ;;  %v5430_v20 = vpop.f32.mrf.mxu0 }
 0x1b9   : > { %6633 = vst [vmem:[#allocation12_spill] sm:$0xff] %v5426_v35  ;;  %v5428_v58 = vadd.f32 %v1701_v50, %v1636_v19  ;;  %v1639_v23 = vpop.f32.mrf.mxu1  ;;  %v5451_v50 = vld [vmem:[%s4510_s23 + $0x228] sm:$0xff] }
 0x1bb   : > { %3923 = vmatmul.msk.f32.gmra.mxu3 %vm313_vm1, %v5433_v47  ;;  %3932 = vmatmul.msk.f32.gmra.mxu0 %vm313_vm1, %v4652_v31 }
 0x1bc   : > { %3949 = vmatmul.msk.f32.gmra.mxu1 %vm313_vm1, %v6620_v22 }
 0x1bd   : > { %3982 = vmatmul.msk.f32.gmra.mxu2 %vm313_vm1, %v5306_v40 }
 0x1be   : > { %v1431_v28 = vpop.f32.mrf.mxu3 }
 0x1bf   : > { %v5444_v17 = vadd.f32 %v1431_v28, %v5300_v56 }
 0x1c0   : > { %v1704_v30 = vpop.f32.mrf.mxu2  ;;  %v5448_v24 = vpop.f32.mrf.mxu0 }
 0x1c1   : > { %6634 = vst [vmem:[#allocation6_spill] sm:$0xff] %v5444_v17  ;;  %v5446_v19 = vadd.f32 %v1704_v30, %v1639_v23  ;;  %v1642_v35 = vpop.f32.mrf.mxu1  ;;  %v4305_v17 = vld [vmem:[%s4510_s23 + $0x108] sm:$0xff] }
 0x1c3   : > { %3924 = vmatmul.msk.f32.gmra.mxu3 %vm313_vm1, %v5451_v50  ;;  %3933 = vmatmul.msk.f32.gmra.mxu0 %vm313_vm1, %v4669_v34  ;;  %v4297_v34 = vld [vmem:[%s4510_s23 + $0xa0] sm:$0xff] }
 0x1c4   : > { %3950 = vmatmul.msk.f32.gmra.mxu1 %vm313_vm1, %v6621_v54 }
 0x1c5   : > { %3983 = vmatmul.msk.f32.gmra.mxu2 %vm313_vm1, %v5325_v18 }
 0x1c6   : > { %v1434_v31 = vpop.f32.mrf.mxu3 }
 0x1c7   : > { %v5462_v22 = vadd.f32 %v1434_v31, %v5320_v25 }
 0x1c8   : > { %v1707_v56 = vpop.f32.mrf.mxu2  ;;  %v5466_v28 = vpop.f32.mrf.mxu0 }
 0x1c9   : > { %6635 = vst [vmem:[#allocation7_spill] sm:$0xff] %v5462_v22  ;;  %v5464_v23 = vadd.f32 %v1707_v56, %v1642_v35  ;;  %v5468_v30 = vpop.f32.mrf.mxu1 }
 0x1ca   : > { %6636 = vst [vmem:[#allocation15_spill] sm:$0xff] %v5466_v28 }
 0x1cb   : > { %3934 = vmatmul.msk.f32.gmra.mxu0 %vm313_vm1, %v4686_v37  ;;  %3993 = vmatmul.msk.f32.vlgmr.msra.gmra.mxu3 %vm313_vm1, %v4297_v34  ;;  %v4298_v37 = vld [vmem:[%s4510_s23 + $0xa8] sm:$0xff] }
 0x1cc   : > { %3951 = vmatmul.msk.f32.gmra.mxu1 %vm313_vm1, %v4692_v39 }
 0x1cd   : > { %3984 = vmatmul.msk.f32.gmra.mxu2 %vm313_vm1, %v5343_v4 }
 0x1ce   : > { %v1816_v54 = vpop.f32.mrf.mxu3 }
 0x1cf   : > { %v5479_v25 = vadd.f32 %v1816_v54, %v5338_v29 }
 0x1d0   : > { %v5481_v35 = vpop.f32.mrf.mxu0 }
 0x1d1   : > { %6637 = vst [vmem:[#allocation16_spill] sm:$0xff] %v5481_v35  ;;  %v5483_v31 = vpop.f32.mrf.mxu1 }
 0x1d3   : > { %3935 = vmatmul.msk.f32.gmra.mxu0 %vm313_vm1, %v4716_v42  ;;  %3994 = vmatmul.msk.f32.gmra.mxu3 %vm313_vm1, %v4298_v37  ;;  %v4299_v42 = vld [vmem:[%s4510_s23 + $0xb0] sm:$0xff] }
 0x1d4   : > { %3952 = vmatmul.msk.f32.gmra.mxu1 %vm313_vm1, %v4722_v44 }
 0x1d5   : > { %3985 = vmatmul.msk.f32.gmra.mxu2 %vm313_vm1, %v5361_v2 }
 0x1d6   : > { %v1819_v39 = vpop.f32.mrf.mxu3 }
 0x1d7   : > { %v5494_v29 = vadd.f32 %v1819_v39, %v5356_v45 }
 0x1d8   : > { %v5496_v56 = vpop.f32.mrf.mxu0 }
 0x1d9   : > { %6638 = vst [vmem:[#allocation17_spill] sm:$0xff] %v5496_v56  ;;  %v5498_v34 = vpop.f32.mrf.mxu1  ;;  %v5616_v56 = vpop.f32.mrf.mxu2 }
 0x1da   : > { %6639 = vst [vmem:[#allocation18_spill] sm:$0xff] %v5498_v34 }
 0x1db   : > { %3936 = vmatmul.msk.f32.gmra.mxu0 %vm313_vm1, %v4739_v46  ;;  %3995 = vmatmul.msk.f32.gmra.mxu3 %vm313_vm1, %v4299_v42  ;;  %v4300_v46 = vld [vmem:[%s4510_s23 + $0xb8] sm:$0xff] }
 0x1dc   : > { %3953 = vmatmul.msk.f32.gmra.mxu1 %vm313_vm1, %v4745_v48 }
 0x1dd   : > { %3986 = vmatmul.msk.f32.gmra.mxu2 %vm313_vm1, %v5379_v15 }
 0x1de   : > { %v1822_v44 = vpop.f32.mrf.mxu3 }
 0x1df   : > { %v5509_v45 = vadd.f32 %v1822_v44, %v5374_v8 }
 0x1e0   : > { %v5511_v54 = vpop.f32.mrf.mxu0 }
 0x1e1   : > { %6640 = vst [vmem:[#allocation19_spill] sm:$0xff] %v5511_v54  ;;  %v5513_v37 = vpop.f32.mrf.mxu1 }
 0x1e2   : > { %6641 = vst [vmem:[#allocation20_spill] sm:$0xff] %v5513_v37 }
 0x1e3   : > { %3937 = vmatmul.msk.f32.gmra.mxu0 %vm313_vm1, %v4756_v49  ;;  %3996 = vmatmul.msk.f32.gmra.mxu3 %vm313_vm1, %v4300_v46  ;;  %v4301_v49 = vld [vmem:[%s4510_s23 + $0xc0] sm:$0xff] }
 0x1e4   : > { %3954 = vmatmul.msk.f32.gmra.mxu1 %vm313_vm1, %v4762_v51 }
 0x1e5   : > { %3987 = vmatmul.msk.f32.gmra.mxu2 %vm313_vm1, %v5397_v11 }
 0x1e6   : > { %v1825_v48 = vpop.f32.mrf.mxu3 }
 0x1e7   : > { %v5524_v8 = vadd.f32 %v1825_v48, %v5392_v1  ;;  %v4303_v48 = vld [vmem:[%s4510_s23 + $0xc8] sm:$0xff] }
 0x1e8   : > { %v5526_v39 = vpop.f32.mrf.mxu0 }
 0x1e9   : > { %6642 = vst [vmem:[#allocation21_spill] sm:$0xff] %v5526_v39  ;;  %v5528_v42 = vpop.f32.mrf.mxu1  ;;  %v5585_v39 = vld [vmem:[%s4510_s23 + $0x230] sm:$0xff] }
 0x1ea   : > { %6643 = vst [vmem:[#allocation22_spill] sm:$0xff] %v5528_v42 }
 0x1eb   : > { %3938 = vmatmul.msk.f32.gmra.mxu0 %vm313_vm1, %v4773_v52  ;;  %3997 = vmatmul.msk.f32.gmra.mxu3 %vm313_vm1, %v4301_v49  ;;  %v5546_v52 = vld [vmem:[%s4510_s23 + $0x100] sm:$0xff] }
 0x1ec   : > { %3955 = vmatmul.msk.f32.gmra.mxu1 %vm313_vm1, %v6624_v63  ;;  %v5555_v63 = vld [vmem:[%s4510_s23 + $0x190] sm:$0xff] }
 0x1ed   : > { %3988 = vmatmul.msk.f32.gmra.mxu2 %vm313_vm1, %v5415_v0 }
 0x1ee   : > { %v1828_v51 = vpop.f32.mrf.mxu3 }
 0x1ef   : > { %v5539_v1 = vadd.f32 %v1828_v51, %v5410_v7 }
 0x1f0   : > { %v5541_v44 = vpop.f32.mrf.mxu0 }
 0x1f1   : > { %6644 = vst [vmem:[#allocation23_spill] sm:$0xff] %v5541_v44  ;;  %v5543_v46 = vpop.f32.mrf.mxu1  ;;  %v5573_v44 = vld [vmem:[%s4510_s23 + $0x198] sm:$0xff] }
 0x1f2   : > { %6645 = vst [vmem:[#allocation24_spill] sm:$0xff] %v5543_v46  ;;  %v4309_v46 = vld [vmem:[%s4510_s23 + $0xe0] sm:$0xff] }
 0x1f3   : > { %3939 = vmatmul.msk.f32.gmra.mxu0 %vm313_vm1, %v5546_v52  ;;  %3998 = vmatmul.msk.f32.gmra.mxu3 %vm313_vm1, %v4303_v48  ;;  %v4306_v48 = vld [vmem:[%s4510_s23 + $0xd0] sm:$0xff] }
 0x1f4   : > { %3956 = vmatmul.msk.f32.gmra.mxu1 %vm313_vm1, %v5555_v63 }
 0x1f5   : > { %3989 = vmatmul.msk.f32.gmra.mxu2 %vm313_vm1, %v5433_v47 }
 0x1f6   : > { %v1831_v7 = vpop.f32.mrf.mxu3 }
 0x1f7   : > { %v5560_v49 = vadd.f32 %v1831_v7, %v5428_v58 }
 0x1f8   : > { %v5562_v51 = vpop.f32.mrf.mxu0 }
 0x1f9   : > { %6646 = vst [vmem:[#allocation25_spill] sm:$0xff] %v5562_v51  ;;  %v5564_v22 = vpop.f32.mrf.mxu1 }
 0x1fa   : > { %6647 = vst [vmem:[#allocation26_spill] sm:$0xff] %v5564_v22 }
 0x1fb   : > { %3940 = vmatmul.msk.f32.gmra.mxu0 %vm313_vm1, %v4305_v17  ;;  %3999 = vmatmul.msk.f32.gmra.mxu3 %vm313_vm1, %v4306_v48  ;;  %v4308_v48 = vld [vmem:[%s4510_s23 + $0xd8] sm:$0xff] }
 0x1fc   : > { %3957 = vmatmul.msk.f32.gmra.mxu1 %vm313_vm1, %v5573_v44 }
 0x1fd   : > { %3990 = vmatmul.msk.f32.gmra.mxu2 %vm313_vm1, %v5451_v50 }
 0x1fe   : > { %v1834_v58 = vpop.f32.mrf.mxu3 }
 0x1ff   : > { %v5578_v7 = vadd.f32 %v1834_v58, %v5446_v19 }
 0x200   : > { %v5580_v51 = vpop.f32.mrf.mxu0 }
 0x201   : > { %6648 = vst [vmem:[#allocation27_spill] sm:$0xff] %v5580_v51  ;;  %v5582_v22 = vpop.f32.mrf.mxu1 }
 0x202   : > { %6649 = vst [vmem:[#allocation28_spill] sm:$0xff] %v5582_v22 }
 0x203   : > { %3941 = vmatmul.msk.f32.gmra.mxu0 %vm313_vm1, %v5033_v61  ;;  %4000 = vmatmul.msk.f32.gmra.mxu3 %vm313_vm1, %v4308_v48  ;;  %v4310_v48 = vld [vmem:[%s4510_s23 + $0x130] sm:$0xff] }
 0x204   : > { %3958 = vmatmul.msk.f32.gmra.mxu1 %vm313_vm1, %v5039_v21 }
 0x205   : > { %3991 = vmatmul.msk.f32.gmra.mxu2 %vm313_vm1, %v5585_v39 }
 0x206   : > { %v1837_v19 = vpop.f32.mrf.mxu3 }
 0x207   : > { %v5596_v58 = vadd.f32 %v1837_v19, %v5464_v23  ;;  %v4311_v23 = vld [vmem:[%s4510_s23 + $0xe8] sm:$0xff]  ;;  %v4312_v19 = vld [vmem:[%s4510_s23 + $0x138] sm:$0xff] }
 0x208   : > { %v5598_v51 = vpop.f32.mrf.mxu0 }
 0x209   : > { %v5600_v22 = vpop.f32.mrf.mxu1 }
 0x20b   : > { %4001 = vmatmul.msk.f32.gmra.mxu3 %vm313_vm1, %v4309_v46  ;;  %4010 = vmatmul.msk.f32.vlgmr.msra.gmra.mxu0 %vm313_vm1, %v4310_v48 }
 0x20c   : > { %4043 = vmatmul.msk.f32.vlgmr.msra.gmra.mxu1 %vm313_vm1, %v5218_v43 }
 0x20e   : > { %v5620_v46 = vpop.f32.mrf.mxu3 }
 0x210   : > { %v5608_v54 = vpop.f32.mrf.mxu0 }
 0x211   : > { %v5610_v42 = vpop.f32.mrf.mxu1 }
 0x213   : > { %4002 = vmatmul.msk.f32.gmra.mxu3 %vm313_vm1, %v4311_v23  ;;  %4011 = vmatmul.msk.f32.gmra.mxu0 %vm313_vm1, %v4312_v19  ;;  %v4314_v23 = vld [vmem:[%s4510_s23 + $0x140] sm:$0xff]  ;;  %v5632_v19 = vpop.f32.mrf.mxu2 }
 0x214   : > { %4044 = vmatmul.msk.f32.gmra.mxu1 %vm313_vm1, %v5235_v62 }
 0x216   : > { %v5634_v37 = vpop.f32.mrf.mxu3 }
 0x217   : > { %6650 = vst [vmem:[#allocation29_spill] sm:$0xff] %v5634_v37 }
 0x218   : > { %v5622_v43 = vpop.f32.mrf.mxu0 }
 0x219   : > { %v5624_v48 = vpop.f32.mrf.mxu1 }
 0x21b   : > { %4003 = vmatmul.msk.f32.gmra.mxu3 %vm313_vm1, %v4313_v14  ;;  %4012 = vmatmul.msk.f32.gmra.mxu0 %vm313_vm1, %v4314_v23  ;;  %v4316_v14 = vld [vmem:[%s4510_s23 + $0x148] sm:$0xff]  ;;  %v5646_v23 = vpop.f32.mrf.mxu2 }
 0x21c   : > { %4045 = vmatmul.msk.f32.gmra.mxu1 %vm313_vm1, %v5252_v36  ;;  %6651 = vst [vmem:[#allocation30_spill] sm:$0xff] %v5646_v23 }
 0x21e   : > { %v5652_v28 = vpop.f32.mrf.mxu3 }
 0x21f   : > { %6652 = vst [vmem:[#allocation31_spill] sm:$0xff] %v5652_v28  ;;  %v4318_v28 = vld [vmem:[%s4510_s23 + $0x158] sm:$0xff] }
 0x220   : > { %v5636_v62 = vpop.f32.mrf.mxu0 }
 0x221   : > { %v5638_v35 = vpop.f32.mrf.mxu1 }
 0x223   : > { %4004 = vmatmul.msk.f32.gmra.mxu3 %vm313_vm1, %v4315_v10  ;;  %4013 = vmatmul.msk.f32.gmra.mxu0 %vm313_vm1, %v4316_v14  ;;  %v4317_v10 = vld [vmem:[%s4510_s23 + $0x150] sm:$0xff]  ;;  %v5664_v23 = vpop.f32.mrf.mxu2 }
 0x224   : > { %4046 = vmatmul.msk.f32.gmra.mxu1 %vm313_vm1, %v5269_v38  ;;  %6653 = vst [vmem:[#allocation32_spill] sm:$0xff] %v5664_v23  ;;  %v4321_v23 = vld [vmem:[%s4510_s23 + $0x170] sm:$0xff] }
 0x226   : > { %v5669_v53 = vpop.f32.mrf.mxu3 }
 0x227   : > { %6654 = vst [vmem:[#allocation33_spill] sm:$0xff] %v5669_v53 }
 0x228   : > { %v5648_v36 = vpop.f32.mrf.mxu0 }
 0x229   : > { %v5650_v34 = vpop.f32.mrf.mxu1 }
 0x22b   : > { %4005 = vmatmul.msk.f32.gmra.mxu3 %vm313_vm1, %v5546_v52  ;;  %4014 = vmatmul.msk.f32.gmra.mxu0 %vm313_vm1, %v4317_v10  ;;  %v4319_v10 = vld [vmem:[%s4510_s23 + $0x160] sm:$0xff] }
 0x22c   : > { %4047 = vmatmul.msk.f32.gmra.mxu1 %vm313_vm1, %v5286_v59 }
 0x230   : > { %v5660_v14 = vpop.f32.mrf.mxu0 }
 0x231   : > { %v5662_v38 = vpop.f32.mrf.mxu1 }
 0x233   : > { %4006 = vmatmul.msk.f32.gmra.mxu3 %vm313_vm1, %v4305_v17  ;;  %4015 = vmatmul.msk.f32.gmra.mxu0 %vm313_vm1, %v4318_v28  ;;  %v5681_v17 = vpop.f32.mrf.mxu2  ;;  %v5685_v28 = vpop.f32.mrf.mxu3 }
 0x234   : > { %4048 = vmatmul.msk.f32.gmra.mxu1 %vm313_vm1, %v5306_v40  ;;  %6655 = vst [vmem:[#allocation34_spill] sm:$0xff] %v5681_v17 }
 0x235   : > { %6656 = vst [vmem:[#allocation35_spill] sm:$0xff] %v5685_v28 }
 0x238   : > { %v5673_v52 = vpop.f32.mrf.mxu0 }
 0x239   : > { %v5675_v59 = vpop.f32.mrf.mxu1 }
 0x23b   : > { %4007 = vmatmul.msk.f32.gmra.mxu3 %vm313_vm1, %v5033_v61  ;;  %4016 = vmatmul.msk.f32.gmra.mxu0 %vm313_vm1, %v4319_v10  ;;  %v4320_v61 = vld [vmem:[%s4510_s23 + $0x168] sm:$0xff]  ;;  %v5697_v10 = vpop.f32.mrf.mxu2  ;;  %v5699_v17 = vpop.f32.mrf.mxu3 }
 0x23c   : > { %4049 = vmatmul.msk.f32.gmra.mxu1 %vm313_vm1, %v5325_v18  ;;  %6657 = vst [vmem:[#allocation36_spill] sm:$0xff] %v5697_v10 }
 0x23d   : > { %6658 = vst [vmem:[#allocation37_spill] sm:$0xff] %v5699_v17  ;;  %v4322_v17 = vld [vmem:[%s4510_s23 + $0x178] sm:$0xff] }
 0x240   : > { %v5687_v53 = vpop.f32.mrf.mxu0 }
 0x241   : > { %v5689_v40 = vpop.f32.mrf.mxu1 }
 0x243   : > { %4008 = vmatmul.msk.f32.gmra.mxu3 %vm313_vm1, %v5170_v13  ;;  %4017 = vmatmul.msk.f32.gmra.mxu0 %vm313_vm1, %v4320_v61  ;;  %v5709_v13 = vpop.f32.mrf.mxu2  ;;  %v5715_v10 = vpop.f32.mrf.mxu3 }
 0x244   : > { %4050 = vmatmul.msk.f32.gmra.mxu1 %vm313_vm1, %v5343_v4  ;;  %6660 = vst [vmem:[#allocation39_spill] sm:$0xff] %v5709_v13  ;;  %v4323_v13 = vld [vmem:[%s4510_s23 + $0x180] sm:$0xff] }
 0x245   : > { %6663 = vst [vmem:[#allocation42_spill] sm:$0xff] %v5715_v10 }
 0x248   : > { %v5701_v18 = vpop.f32.mrf.mxu0 }
 0x249   : > { %v5703_v28 = vpop.f32.mrf.mxu1 }
 0x24a   : > { %6659 = vst [vmem:[#allocation38_spill] sm:$0xff] %v5703_v28 }
 0x24b   : > { %4018 = vmatmul.msk.f32.gmra.mxu0 %vm313_vm1, %v4321_v23 }
 0x24c   : > { %4051 = vmatmul.msk.f32.gmra.mxu1 %vm313_vm1, %v5361_v2  ;;  %v5725_v2 = vpop.f32.mrf.mxu2 }
 0x24d   : > { %6666 = vst [vmem:[#allocation45_spill] sm:$0xff] %v5725_v2 }
 0x250   : > { %v5711_v61 = vpop.f32.mrf.mxu0 }
 0x251   : > { %6661 = vst [vmem:[#allocation40_spill] sm:$0xff] %v5711_v61  ;;  %v5713_v4 = vpop.f32.mrf.mxu1  ;;  %v5729_v61 = vpop.f32.mrf.mxu3 }
 0x252   : > { %6662 = vst [vmem:[#allocation41_spill] sm:$0xff] %v5713_v4  ;;  %v4324_v4 = vld [vmem:[%s4510_s23 + $0x188] sm:$0xff] }
 0x253   : > { %4019 = vmatmul.msk.f32.gmra.mxu0 %vm313_vm1, %v4322_v17  ;;  %6667 = vst [vmem:[#allocation46_spill] sm:$0xff] %v5729_v61 }
 0x254   : > { %4052 = vmatmul.msk.f32.gmra.mxu1 %vm313_vm1, %v5379_v15  ;;  %v5739_v15 = vpop.f32.mrf.mxu2 }
 0x258   : > { %v5721_v37 = vpop.f32.mrf.mxu0 }
 0x259   : > { %6664 = vst [vmem:[#allocation43_spill] sm:$0xff] %v5721_v37  ;;  %v5723_v23 = vpop.f32.mrf.mxu1  ;;  %v5743_v2 = vpop.f32.mrf.mxu3 }
 0x25a   : > { %6665 = vst [vmem:[#allocation44_spill] sm:$0xff] %v5723_v23  ;;  %v4116_v23 = vld [vmem:[%s6587_s3 + $0xc8] sm:$0xff] }
 0x25b   : > { %4020 = vmatmul.msk.f32.gmra.mxu0 %vm313_vm1, %v4323_v13 }
 0x25c   : > { %4053 = vmatmul.msk.f32.gmra.mxu1 %vm313_vm1, %v5397_v11  ;;  %v5753_v11 = vpop.f32.mrf.mxu2 }
 0x260   : > { %v5733_v10 = vpop.f32.mrf.mxu0 }
 0x261   : > { %6668 = vst [vmem:[#allocation47_spill] sm:$0xff] %v5733_v10  ;;  %v5735_v17 = vpop.f32.mrf.mxu1  ;;  %v4120_v10 = vld [vmem:[%s6587_s3 + $0xe8] sm:$0xff] }
 0x262   : > { %6669 = vst [vmem:[#allocation48_spill] sm:$0xff] %v5735_v17 }
 0x263   : > { %4021 = vmatmul.msk.f32.gmra.mxu0 %vm313_vm1, %v4324_v4  ;;  %v2584_v4 = vld [vmem:[%s6587_s3 + $0x38] sm:$0xff] }
 0x264   : > { %4054 = vmatmul.msk.f32.gmra.mxu1 %vm313_vm1, %v5415_v0  ;;  %v4082_v0 = vld [vmem:[%s6587_s3 + $0xb8] sm:$0xff]  ;;  %2617 = vmatpush.msra.mxu2 %v2584_v4  ;;  %v2582_v4 = vld [vmem:[%s6587_s3 + $0x28] sm:$0xff] }
 0x265   : > { %2676 = vmatpush.msrb.mxu3 %v4082_v0  ;;  %v4080_v0 = vld [vmem:[%s6587_s3 + $0xa8] sm:$0xff] }
 0x268   : > { %v5745_v13 = vpop.f32.mrf.mxu0 }
 0x269   : > { %6670 = vst [vmem:[#allocation49_spill] sm:$0xff] %v5745_v13  ;;  %v5747_v61 = vpop.f32.mrf.mxu1  ;;  %v5761_v13 = vpop.f32.mrf.mxu3 }
 0x26a   : > { %6671 = vst [vmem:[#allocation50_spill] sm:$0xff] %v5747_v61 }
 0x26b   : > { %4022 = vmatmul.msk.f32.gmra.mxu0 %vm313_vm1, %v5555_v63  ;;  %v4081_v63 = vld [vmem:[%s6587_s3 + $0xb0] sm:$0xff] }
 0x26c   : > { %4055 = vmatmul.msk.f32.gmra.mxu1 %vm313_vm1, %v5433_v47  ;;  %v2583_v47 = vld [vmem:[%s6587_s3 + $0x30] sm:$0xff]  ;;  %2677 = vmatpush.msrb.mxu3 %v4081_v63  ;;  %v4079_v63 = vld [vmem:[%s6587_s3 + $0xa0] sm:$0xff] }
 0x26d   : > { %2618 = vmatpush.msra.mxu2 %v2583_v47  ;;  %v2581_v47 = vld [vmem:[%s6587_s3 + $0x20] sm:$0xff] }
 0x26e   : > { %2678 = vmatpush.msrb.mxu3 %v4080_v0  ;;  %v4389_v0 = vmov 0.0  }
 0x26f   : > { %2619 = vmatpush.msra.mxu2 %v2582_v4  ;;  %v4122_v4 = vld [vmem:[%s6587_s3 + $0xf8] sm:$0xff]  ;;  %2541 = vst.msk [vmem:[#allocation2] sm:$0xff] %vm2540_vm2, %v4389_v0 }
 0x270   : > { %v5763_v61 = vpop.f32.mrf.mxu0  ;;  %2679 = vmatpush.msrb.mxu3 %v4079_v63  ;;  %2937 = vmatpush.msrb.mxu1 %v4122_v4  ;;  %2543 = vst.msk [vmem:[#allocation2 + $0x48] sm:$0xff] %vm2540_vm2, %v4389_v0 }
 0x271   : > { %6672 = vst [vmem:[#allocation51_spill] sm:$0xff] %v5763_v61  ;;  %v5771_v17 = vpop.f32.mrf.mxu1  ;;  %2620 = vmatpush.msra.mxu2 %v2581_v47  ;;  %v5800_v47 = vpop.f32.mrf.mxu2  ;;  %v4077_v61 = vld [vmem:[%s6587_s3 + $0x90] sm:$0xff] }
 0x272   : > { %6673 = vst [vmem:[#allocation52_spill] sm:$0xff] %v5771_v17  ;;  %v2579_v17 = vld [vmem:[%s6587_s3 + $0x10] sm:$0xff]  ;;  %v2211_v0 = vpop.f32.mrf.mxu3 }
 0x273   : > { %4023 = vmatmul.msk.f32.gmra.mxu0 %vm313_vm1, %v5573_v44  ;;  %v2580_v44 = vld [vmem:[%s6587_s3 + $0x18] sm:$0xff] }
 0x274   : > { %4056 = vmatmul.msk.f32.gmra.mxu1 %vm313_vm1, %v5451_v50  ;;  %v4078_v50 = vld [vmem:[%s6587_s3 + $0x98] sm:$0xff]  ;;  %2621 = vmatpush.msra.mxu2 %v2580_v44  ;;  %v4121_v44 = vld [vmem:[%s6587_s3 + $0xf0] sm:$0xff] }
 0x275   : > { %2680 = vmatpush.msrb.mxu3 %v4078_v50  ;;  %2938 = vmatpush.msrb.mxu1 %v4121_v44  ;;  %v2578_v50 = vld [vmem:[%s6587_s3 + $0x8] sm:$0xff]  ;;  %v4119_v44 = vld [vmem:[%s6587_s3 + $0xe0] sm:$0xff] }
 0x276   : > { %2622 = vmatpush.msra.mxu2 %v2579_v17  ;;  %v4075_v17 = vld [vmem:[%s6587_s3 + $0x80] sm:$0xff] }
 0x277   : > { %2681 = vmatpush.msrb.mxu3 %v4077_v61  ;;  %v2577_v61 = vld [vmem:[%s6587_s3] sm:$0xff]  ;;  %2939 = vmatpush.msrb.mxu1 %v4120_v10  ;;  %v4117_v10 = vld [vmem:[%s6587_s3 + $0xd0] sm:$0xff] }
 0x278   : > { %v5802_v63 = vpop.f32.mrf.mxu0  ;;  %2623 = vmatpush.msra.mxu2 %v2578_v50 }
 0x279   : > { %6674 = vst [vmem:[#allocation53_spill] sm:$0xff] %v5802_v63  ;;  %v5813_v4 = vpop.f32.mrf.mxu1  ;;  %v4076_v63 = vld [vmem:[%s6587_s3 + $0x88] sm:$0xff]  ;;  %2940 = vmatpush.msrb.mxu1 %v4119_v44  ;;  %v4115_v44 = vld [vmem:[%s6587_s3 + $0xc0] sm:$0xff] }
 0x27a   : > { %6675 = vst [vmem:[#allocation54_spill] sm:$0xff] %v5813_v4  ;;  %2682 = vmatpush.msrb.mxu3 %v4076_v63  ;;  %2624 = vmatpush.msra.mxu2 %v2577_v61  ;;  %v1945_v63 = vadd.f32 %v5598_v51, %v5479_v25  ;;  %v2133_v4 = vpop.f32.mrf.mxu2  ;;  %v2214_v51 = vpop.f32.mrf.mxu3 }
 0x27b   : > { %4024 = vmatmul.msk.f32.gmra.mxu0 %vm313_vm1, %v5039_v21  ;;  %v5837_v21 = vld [vmem:[#allocation2] sm:$0xff] }
 0x27c   : > { %4057 = vmatmul.msk.f32.gmra.mxu1 %vm313_vm1, %v5585_v39  ;;  %6676 = vst [vmem:[#allocation55_spill] sm:$0xff] %v5837_v21  ;;  %2683 = vmatpush.msrb.mxu3 %v4075_v17  ;;  %v4118_v39 = vld [vmem:[%s6587_s3 + $0xd8] sm:$0xff]  ;;  %v2026_v25 = vadd.f32 %v5600_v22, %v1945_v63 }
 0x27d   : > { %4059 = vmatmul.msk.f32.vlgmr.msra.gmra.mxu2 %vm2540_vm2, %v5837_v21  ;;  %4083 = vmatmul.msk.f32.vlgmr.msrb.gmra.mxu3 %vm2540_vm2, %v5837_v21  ;;  %v4041_v17 = vld [vmem:[%s4510_s23 + $0x238] sm:$0xff]  ;;  %v1946_v21 = vadd.f32 %v5608_v54, %v5494_v29  ;;  %v1947_v29 = vadd.f32 %v5622_v43, %v5509_v45  ;;  %v1948_v43 = vadd.f32 %v5636_v62, %v5524_v8  ;;  %s3500_s23 = sshll.u32 %s3497_s16, 4  ;;  %s3501_s23 = int_to_ptr.hbm [resolvable:$true] %s3500_s23 }
 0x27e   : > { %2941 = vmatpush.msrb.mxu1 %v4118_v39  ;;  %v2172_v39 = vadd.f32 %v5739_v15, %v2026_v25  ;;  %v1949_v8 = vadd.f32 %v5648_v36, %v5539_v1  ;;  %v1950_v1 = vadd.f32 %v5660_v14, %v5560_v49  ;;  %v1951_v14 = vadd.f32 %v5673_v52, %v5578_v7  ;;  %s4339_s18 = sshra.s32 %s3501_s23, 4  ;;  %s4340_s18 = int_to_ptr.hbm [resolvable:$true] %s4339_s18 }
 0x27f   : > { %s4341_s19 = scalar_lea.hbm %s4340_s18, 64  ;;  %p4346_p0 = scmp.lt.s32.totalorder %s4340_s18, %s6591_s7 }
 0x280   : > { %v5848_v50 = vpop.f32.mrf.mxu0  ;;  %2942 = vmatpush.msrb.mxu1 %v4117_v10  ;;  %v1588_v10 = vadd.f32 %v5322_v12, %v5196_v9  ;;  %v2028_v9 = vadd.f32 %v5624_v48, %v1947_v29  ;;  %p4342_p11 = scmp.ne.s32.totalorder %s4340_s18, %s4341_s19  ;;  %p4347_p1 = scmp.lt.s32.totalorder %s4345_s29, %s4341_s19 }
 0x281   : > { %6677 = vst [vmem:[#allocation56_spill] sm:$0xff] %v5848_v50  ;;  %v5853_v61 = vpop.f32.mrf.mxu1 }
 0x282   : > { %6678 = vst [vmem:[#allocation57_spill] sm:$0xff] %v5853_v61  ;;  %2943 = vmatpush.msrb.mxu1 %v4116_v23  ;;  %v2253_v61 = vadd.f32 %v5743_v2, %v2172_v39  ;;  %v2136_v37 = vpop.f32.mrf.mxu2  ;;  %v2217_v23 = vpop.f32.mrf.mxu3  ;;  %p4343_p12 = pnand %p4342_p11, %p4470_p5  ;;  %p4348_p2 = por %p4347_p1, %p4346_p0 }
 0x283   : > { %4025 = vmatmul.msk.f32.gmra.mxu0 %vm313_vm1, %v5303_v55 }
 0x284   : > { %4058 = vmatmul.msk.f32.gmra.mxu1 %vm313_vm1, %v4041_v17  ;;  %v2027_v17 = vadd.f32 %v5610_v42, %v1946_v21  ;;  %v2174_v42 = vadd.f32 %v5800_v47, %v2028_v9  ;;  %v1590_v47 = vadd.f32 %v5358_v26, %v5230_v33  ;;  %v1591_v33 = vadd.f32 %v5376_v57, %v5247_v32  ;;  %p4344_p13 = pneg %p4343_p12 }
 0x285   : > { %2944 = vmatpush.msrb.mxu1 %v4115_v44  ;;  %v1589_v44 = vadd.f32 %v5340_v60, %v5213_v41  ;;  %v2030_v26 = vadd.f32 %v5650_v34, %v1949_v8  ;;  %v1592_v9 = vadd.f32 %v5394_v27, %v5264_v3  ;;  %v2032_v3 = vadd.f32 %v5675_v59, %v1951_v14  ;;  %v6687_v14 = vld [vmem:[#allocation41_spill] sm:$0xff] }
 0x286   : > { %v2173_v28 = vadd.f32 %v5753_v11, %v2027_v17  ;;  %v5884_v11 = vld [vmem:[%s6586_s2] ss:$0 sm:$0xff]  ;;  %v1711_v8 = vadd.f32 %v5616_v56, %v5468_v30  ;;  %v1595_v30 = vadd.f32 %v5448_v24, %v5318_v6  ;;  %v1714_v56 = vadd.f32 %v5632_v19, %v5483_v31  ;;  %p4349_p3 = pnand %p4348_p2, %p4344_p13 }
 0x287   : > { %v6682_v6 = vld [vmem:[#allocation40_spill] sm:$0xff] }
 0x288   : > { %v2286_v22 = vpop.f32.mrf.mxu0  ;;  %v2254_v54 = vadd.f32 %v5761_v13, %v2173_v28  ;;  %v2255_v28 = vadd.f32 %v2211_v0, %v2174_v42 }
 0x289   : > { %v2334_v63 = vadd.f32 %v2286_v22, %v2253_v61  ;;  %v2432_v55 = vpop.f32.mrf.mxu1  ;;  %v2029_v22 = vadd.f32 %v5638_v35, %v1948_v43 }
 0x28a   : > { %v2139_v45 = vpop.f32.mrf.mxu2 }
 0x28b   : > { %v2480_v50 = vadd.f32 %v2432_v55, %v2334_v63 }
 0x28d   : > { %v2496_v15 = vmax.f32 %v1588_v10, %v2480_v50  ;;  %v2220_v50 = vpop.f32.mrf.mxu3  ;;  %v2175_v10 = vadd.f32 %v2133_v4, %v2029_v22  ;;  %v2176_v4 = vadd.f32 %v2136_v37, %v2030_v26 }
 0x28f   : > { %v2256_v62 = vadd.f32 %v2214_v51, %v2175_v10  ;;  %v2257_v32 = vadd.f32 %v2217_v23, %v2176_v4 }
 0x290   : > { %v2289_v2 = vpop.f32.mrf.mxu0 }
 0x291   : > { %v2335_v25 = vadd.f32 %v2289_v2, %v2254_v54  ;;  %v2435_v61 = vpop.f32.mrf.mxu1 }
 0x292   : > { %v2142_v0 = vpop.f32.mrf.mxu2 }
 0x293   : > { %v2481_v12 = vadd.f32 %v2435_v61, %v2335_v25 }
 0x295   : > { %v2497_v21 = vmax.f32 %v1589_v44, %v2481_v12  ;;  %v2223_v2 = vpop.f32.mrf.mxu3  ;;  %v2031_v12 = vadd.f32 %v5662_v38, %v1950_v1  ;;  %v6681_v1 = vld [vmem:[#allocation29_spill] sm:$0xff] }
 0x297   : > { %v2512_v13 = vmax.f32 %v2496_v15, %v2497_v21 }
 0x298   : > { %v2292_v39 = vpop.f32.mrf.mxu0 }
 0x299   : > { %v2524_v41 = vadd.f32 %v5884_v11, %v2512_v13  ;;  %v2336_v60 = vadd.f32 %v2292_v39, %v2255_v28  ;;  %v2438_v48 = vpop.f32.mrf.mxu1  ;;  %v2177_v28 = vadd.f32 %v2139_v45, %v2031_v12  ;;  %v2178_v45 = vadd.f32 %v2142_v0, %v2032_v3  ;;  %v6684_v12 = vld [vmem:[#allocation15_spill] sm:$0xff] }
 0x29a   : > { %v2145_v44 = vpop.f32.mrf.mxu2 }
 0x29b   : > { %v2532_v63 = vmax.f32 %v2524_v41, 0.0  ;;  %v2482_v55 = vadd.f32 %v2438_v48, %v2336_v60  ;;  %v2258_v23 = vadd.f32 %v2220_v50, %v2177_v28  ;;  %v6679_v60 = vld [vmem:[#allocation8_spill] sm:$0xff]  ;;  %v2259_v52 = vadd.f32 %v2223_v2, %v2178_v45  ;;  %v6686_v28 = vld [vmem:[#allocation30_spill] sm:$0xff] }
 0x29c   : > { %v1593_v48 = vadd.f32 %v5412_v16, %v6679_v60  ;;  %v1952_v16 = vadd.f32 %v5687_v53, %v5596_v58 }
 0x29d   : > { %2545 = vst.msk [vmem:[#allocation2 + $0x8] sm:$0xff] %vm2540_vm2, %v2532_v63  ;;  %v2498_v17 = vmax.f32 %v1590_v47, %v2482_v55  ;;  %v2226_v43 = vpop.f32.mrf.mxu3 }
 0x2a0   : > { %v2295_v15 = vpop.f32.mrf.mxu0 }
 0x2a1   : > { %v2337_v29 = vadd.f32 %v2295_v15, %v2256_v62  ;;  %v2441_v54 = vpop.f32.mrf.mxu1  ;;  %v2033_v62 = vadd.f32 %v5689_v40, %v1952_v16  ;;  %v6680_v40 = vld [vmem:[#allocation38_spill] sm:$0xff] }
 0x2a2   : > { %v2148_v38 = vpop.f32.mrf.mxu2 }
 0x2a3   : > { %v2483_v35 = vadd.f32 %v2441_v54, %v2337_v29  ;;  %v1872_v29 = vadd.f32 %v5620_v46, %v1711_v8  ;;  %v2179_v53 = vadd.f32 %v2145_v44, %v2033_v62  ;;  %v6694_v8 = vld [vmem:[#allocation44_spill] sm:$0xff] }
 0x2a4   : > { %v5898_v25 = vld [vmem:[#allocation2 + $0x8] sm:$0xff] }
 0x2a5   : > { %v2499_v61 = vmax.f32 %v1591_v33, %v2483_v35  ;;  %4060 = vmatmul.msk.f32.gmra.mxu2 %vm2540_vm2, %v5898_v25  ;;  %4084 = vmatmul.msk.f32.gmra.mxu3 %vm2540_vm2, %v5898_v25  ;;  %v2229_v7 = vpop.f32.mrf.mxu3  ;;  %v1953_v2 = vadd.f32 %v5701_v18, %v1872_v29  ;;  %v2260_v33 = vadd.f32 %v2226_v43, %v2179_v53  ;;  %v6685_v43 = vld [vmem:[#allocation18_spill] sm:$0xff]  ;;  %v6695_v53 = vld [vmem:[#allocation33_spill] sm:$0xff] }
 0x2a6   : > { %4123 = vmatmul.msk.f32.vlgmr.msrb.gmra.mxu1 %vm2540_vm2, %v5898_v25 }
 0x2a7   : > { %v2513_v57 = vmax.f32 %v2498_v17, %v2499_v61  ;;  %v1594_v17 = vadd.f32 %v5430_v20, %v5298_v5  ;;  %v2034_v46 = vadd.f32 %v6680_v40, %v1953_v2 }
 0x2a8   : > { %v2298_v34 = vpop.f32.mrf.mxu0 }
 0x2a9   : > { %v2525_v36 = vadd.f32 %v5884_v11, %v2513_v57  ;;  %v2338_v51 = vadd.f32 %v2298_v34, %v2257_v32  ;;  %v2444_v37 = vpop.f32.mrf.mxu1  ;;  %v1873_v32 = vadd.f32 %v6681_v1, %v1714_v56  ;;  %v2180_v57 = vadd.f32 %v2148_v38, %v2034_v46  ;;  %v6697_v46 = vld [vmem:[#allocation11_spill] sm:$0xff] }
 0x2aa   : > { %v2151_v54 = vpop.f32.mrf.mxu2 }
 0x2ab   : > { %v2533_v42 = vmax.f32 %v2525_v36, 0.0  ;;  %v2484_v21 = vadd.f32 %v2444_v37, %v2338_v51  ;;  %v1954_v24 = vadd.f32 %v6682_v6, %v1873_v32  ;;  %v2261_v31 = vadd.f32 %v2229_v7, %v2180_v57  ;;  %v6699_v32 = vld [vmem:[#allocation22_spill] sm:$0xff]  ;;  %v6701_v6 = vld [vmem:[#allocation48_spill] sm:$0xff] }
 0x2ac   : > { %v6700_v57 = vld [vmem:[#allocation34_spill] sm:$0xff] }
 0x2ad   : > { %2546 = vst.msk [vmem:[#allocation2 + $0x10] sm:$0xff] %vm2540_vm2, %v2533_v42  ;;  %v2500_v49 = vmax.f32 %v1592_v9, %v2484_v21  ;;  %v2232_v26 = vpop.f32.mrf.mxu3  ;;  %v6683_v9 = vld [vmem:[#allocation9_spill] sm:$0xff] }
 0x2ae   : > { %v1596_v42 = vadd.f32 %v6684_v12, %v6683_v9  ;;  %v4074_v9 = vld [vmem:[%s6587_s3 + $0x78] sm:$0xff] }
 0x2af   : > { %2782 = vmatpush.msra.mxu3 %v4074_v9 }
 0x2b0   : > { %v2301_v13 = vpop.f32.mrf.mxu0 }
 0x2b1   : > { %v2339_v39 = vadd.f32 %v2301_v13, %v2258_v23  ;;  %v2447_v41 = vpop.f32.mrf.mxu1  ;;  %v2035_v23 = vadd.f32 %v6687_v14, %v1954_v24 }
 0x2b2   : > { %v2154_v34 = vpop.f32.mrf.mxu2 }
 0x2b3   : > { %v2485_v27 = vadd.f32 %v2447_v41, %v2339_v39  ;;  %v6688_v41 = vld [vmem:[#allocation31_spill] sm:$0xff] }
 0x2b4   : > { %v5918_v47 = vld [vmem:[#allocation2 + $0x10] sm:$0xff] }
 0x2b5   : > { %v2501_v22 = vmax.f32 %v1593_v48, %v2485_v27  ;;  %4061 = vmatmul.msk.f32.gmra.mxu2 %vm2540_vm2, %v5918_v47  ;;  %4085 = vmatmul.msk.f32.gmra.mxu3 %vm2540_vm2, %v5918_v47  ;;  %v2235_v21 = vpop.f32.mrf.mxu3  ;;  %v2181_v48 = vadd.f32 %v2151_v54, %v2035_v23  ;;  %v6689_v27 = vld [vmem:[#allocation43_spill] sm:$0xff] }
 0x2b6   : > { %4124 = vmatmul.msk.f32.gmra.mxu1 %vm2540_vm2, %v5918_v47 }
 0x2b7   : > { %v2514_v59 = vmax.f32 %v2500_v49, %v2501_v22  ;;  %v1717_v49 = vadd.f32 %v6686_v28, %v6685_v43  ;;  %v2262_v45 = vadd.f32 %v2232_v26, %v2181_v48  ;;  %v6706_v48 = vld [vmem:[#allocation24_spill] sm:$0xff] }
 0x2b8   : > { %v2304_v50 = vpop.f32.mrf.mxu0 }
 0x2b9   : > { %v2526_v63 = vadd.f32 %v5884_v11, %v2514_v59  ;;  %v2340_v55 = vadd.f32 %v2304_v50, %v2259_v52  ;;  %v2450_v10 = vpop.f32.mrf.mxu1  ;;  %v1874_v60 = vadd.f32 %v6688_v41, %v1717_v49  ;;  %v6690_v59 = vld [vmem:[#allocation10_spill] sm:$0xff]  ;;  %v6691_v50 = vld [vmem:[#allocation16_spill] sm:$0xff]  ;;  %v6705_v41 = vld [vmem:[#allocation19_spill] sm:$0xff] }
 0x2ba   : > { %v2157_v52 = vpop.f32.mrf.mxu2  ;;  %v4073_v49 = vld [vmem:[%s6587_s3 + $0x70] sm:$0xff] }
 0x2bb   : > { %v2534_v0 = vmax.f32 %v2526_v63, 0.0  ;;  %v2486_v15 = vadd.f32 %v2450_v10, %v2340_v55  ;;  %v1955_v38 = vadd.f32 %v6689_v27, %v1874_v60  ;;  %v1597_v63 = vadd.f32 %v6691_v50, %v6690_v59  ;;  %v6692_v55 = vld [vmem:[#allocation20_spill] sm:$0xff]  ;;  %2783 = vmatpush.msra.mxu3 %v4073_v49  ;;  %v6721_v49 = vld [vmem:[#allocation45_spill] sm:$0xff] }
 0x2bc   : > { %v6693_v10 = vld [vmem:[#allocation32_spill] sm:$0xff] }
 0x2bd   : > { %2547 = vst.msk [vmem:[#allocation2 + $0x18] sm:$0xff] %vm2540_vm2, %v2534_v0  ;;  %v2502_v58 = vmax.f32 %v1594_v17, %v2486_v15  ;;  %v1720_v17 = vadd.f32 %v6693_v10, %v6692_v55  ;;  %v2036_v62 = vadd.f32 %v6694_v8, %v1955_v38  ;;  %v2238_v15 = vpop.f32.mrf.mxu3  ;;  %v6708_v38 = vld [vmem:[#allocation50_spill] sm:$0xff]  ;;  %v4070_v10 = vld [vmem:[%s6587_s3 + $0x58] sm:$0xff] }
 0x2bf   : > { %v2182_v54 = vadd.f32 %v2154_v34, %v2036_v62 }
 0x2c0   : > { %v2307_v35 = vpop.f32.mrf.mxu0 }
 0x2c1   : > { %v2341_v5 = vadd.f32 %v2307_v35, %v2260_v33  ;;  %v2453_v20 = vpop.f32.mrf.mxu1  ;;  %v6696_v33 = vld [vmem:[#allocation47_spill] sm:$0xff]  ;;  %v2263_v35 = vadd.f32 %v2235_v21, %v2182_v54 }
 0x2c2   : > { %v2160_v34 = vpop.f32.mrf.mxu2 }
 0x2c3   : > { %v2487_v4 = vadd.f32 %v2453_v20, %v2341_v5 }
 0x2c4   : > { %v5942_v61 = vld [vmem:[#allocation2 + $0x18] sm:$0xff] }
 0x2c5   : > { %v2503_v18 = vmax.f32 %v1595_v30, %v2487_v4  ;;  %4062 = vmatmul.msk.f32.gmra.mxu2 %vm2540_vm2, %v5942_v61  ;;  %4086 = vmatmul.msk.f32.gmra.mxu3 %vm2540_vm2, %v5942_v61  ;;  %v6698_v4 = vld [vmem:[#allocation17_spill] sm:$0xff]  ;;  %v2241_v12 = vpop.f32.mrf.mxu3 }
 0x2c6   : > { %4125 = vmatmul.msk.f32.gmra.mxu1 %vm2540_vm2, %v5942_v61  ;;  %v1598_v1 = vadd.f32 %v6698_v4, %v6697_v46  ;;  %v6715_v46 = vld [vmem:[#allocation52_spill] sm:$0xff] }
 0x2c7   : > { %v2515_v19 = vmax.f32 %v2502_v58, %v2503_v18  ;;  %v1875_v58 = vadd.f32 %v6695_v53, %v1720_v17  ;;  %v1723_v18 = vadd.f32 %v6700_v57, %v6699_v32  ;;  %v6710_v17 = vld [vmem:[#allocation51_spill] sm:$0xff]  ;;  %v4067_v57 = vld [vmem:[%s6587_s3 + $0x40] sm:$0xff] }
 0x2c8   : > { %v2310_v36 = vpop.f32.mrf.mxu0 }
 0x2c9   : > { %v2527_v51 = vadd.f32 %v5884_v11, %v2515_v19  ;;  %v2342_v37 = vadd.f32 %v2310_v36, %v2261_v31  ;;  %v2456_v44 = vpop.f32.mrf.mxu1  ;;  %v1956_v26 = vadd.f32 %v6696_v33, %v1875_v58  ;;  %v6702_v36 = vld [vmem:[#allocation35_spill] sm:$0xff]  ;;  %v4069_v58 = vld [vmem:[%s6587_s3 + $0x50] sm:$0xff] }
 0x2ca   : > { %v2163_v55 = vpop.f32.mrf.mxu2 }
 0x2cb   : > { %v2535_v13 = vmax.f32 %v2527_v51, 0.0  ;;  %v2488_v39 = vadd.f32 %v2456_v44, %v2342_v37  ;;  %v2037_v24 = vadd.f32 %v6701_v6, %v1956_v26  ;;  %v1876_v51 = vadd.f32 %v6702_v36, %v1723_v18  ;;  %v6711_v26 = vld [vmem:[#allocation14_spill] sm:$0xff] }
 0x2cc   : > { %v6716_v18 = vld [vmem:[#allocation42_spill] sm:$0xff] }
 0x2cd   : > { %2548 = vst.msk [vmem:[#allocation2 + $0x20] sm:$0xff] %vm2540_vm2, %v2535_v13  ;;  %v2504_v3 = vmax.f32 %v1596_v42, %v2488_v39  ;;  %v2183_v37 = vadd.f32 %v2157_v52, %v2037_v24  ;;  %v6703_v42 = vld [vmem:[#allocation49_spill] sm:$0xff] }
 0x2ce   : > { %v1957_v21 = vadd.f32 %v6703_v42, %v1876_v51  ;;  %v4072_v13 = vld [vmem:[%s6587_s3 + $0x68] sm:$0xff]  ;;  %v6718_v42 = vld [vmem:[#allocation12_spill] sm:$0xff] }
 0x2cf   : > { %v2264_v43 = vadd.f32 %v2238_v15, %v2183_v37  ;;  %v6704_v39 = vld [vmem:[#allocation13_spill] sm:$0xff]  ;;  %2784 = vmatpush.msra.mxu3 %v4072_v13  ;;  %v2244_v15 = vpop.f32.mrf.mxu3 }
 0x2d0   : > { %v2313_v22 = vpop.f32.mrf.mxu0  ;;  %v1599_v60 = vadd.f32 %v6705_v41, %v6704_v39  ;;  %v6709_v52 = vld [vmem:[#allocation37_spill] sm:$0xff] }
 0x2d1   : > { %v2343_v7 = vadd.f32 %v2313_v22, %v2262_v45  ;;  %v2459_v16 = vpop.f32.mrf.mxu1  ;;  %v2038_v45 = vadd.f32 %v6708_v38, %v1957_v21  ;;  %v6719_v21 = vld [vmem:[#allocation23_spill] sm:$0xff]  ;;  %v6724_v38 = vld [vmem:[#allocation56_spill] sm:$0xff] }
 0x2d2   : > { %v2166_v51 = vpop.f32.mrf.mxu2 }
 0x2d3   : > { %v2489_v0 = vadd.f32 %v2459_v16, %v2343_v7  ;;  %v4071_v16 = vld [vmem:[%s6587_s3 + $0x60] sm:$0xff]  ;;  %v2184_v50 = vadd.f32 %v2160_v34, %v2038_v45 }
 0x2d4   : > { %v5966_v29 = vld [vmem:[#allocation2 + $0x20] sm:$0xff]  ;;  %2785 = vmatpush.msra.mxu3 %v4071_v16 }
 0x2d5   : > { %v2505_v2 = vmax.f32 %v1597_v63, %v2489_v0  ;;  %4063 = vmatmul.msk.f32.gmra.mxu2 %vm2540_vm2, %v5966_v29  ;;  %4087 = vmatmul.msk.f32.gmra.mxu3 %vm2540_vm2, %v5966_v29  ;;  %v2265_v62 = vadd.f32 %v2241_v12, %v2184_v50 }
 0x2d6   : > { %4126 = vmatmul.msk.f32.gmra.mxu1 %vm2540_vm2, %v5966_v29  ;;  %2786 = vmatpush.msra.mxu3 %v4070_v10  ;;  %v6725_v10 = vld [vmem:[#allocation6_spill] sm:$0xff] }
 0x2d7   : > { %v2516_v5 = vmax.f32 %v2504_v3, %v2505_v2  ;;  %v6707_v3 = vld [vmem:[#allocation36_spill] sm:$0xff]  ;;  %v2247_v12 = vpop.f32.mrf.mxu3 }
 0x2d8   : > { %v2316_v20 = vpop.f32.mrf.mxu0  ;;  %v1726_v27 = vadd.f32 %v6707_v3, %v6706_v48  ;;  %2787 = vmatpush.msra.mxu3 %v4069_v58 }
 0x2d9   : > { %v2528_v30 = vadd.f32 %v5884_v11, %v2516_v5  ;;  %v2344_v56 = vadd.f32 %v2316_v20, %v2263_v35  ;;  %v2462_v40 = vpop.f32.mrf.mxu1  ;;  %v6712_v35 = vld [vmem:[#allocation21_spill] sm:$0xff] }
 0x2da   : > { %v1877_v59 = vadd.f32 %v6709_v52, %v1726_v27  ;;  %v1600_v5 = vadd.f32 %v6712_v35, %v6711_v26  ;;  %v4068_v20 = vld [vmem:[%s6587_s3 + $0x48] sm:$0xff] }
 0x2db   : > { %v2536_v31 = vmax.f32 %v2528_v30, 0.0  ;;  %v2490_v19 = vadd.f32 %v2462_v40, %v2344_v56  ;;  %v6713_v30 = vld [vmem:[#allocation26_spill] sm:$0xff]  ;;  %v6714_v56 = vld [vmem:[#allocation39_spill] sm:$0xff]  ;;  %2788 = vmatpush.msra.mxu3 %v4068_v20 }
 0x2dc   : > { %v1958_v8 = vadd.f32 %v6710_v17, %v1877_v59  ;;  %v1729_v40 = vadd.f32 %v6714_v56, %v6713_v30  ;;  %v6726_v17 = vld [vmem:[#allocation25_spill] sm:$0xff]  ;;  %v6728_v20 = vld [vmem:[#allocation7_spill] sm:$0xff] }
 0x2dd   : > { %2549 = vst.msk [vmem:[#allocation2 + $0x28] sm:$0xff] %vm2540_vm2, %v2536_v31  ;;  %v2506_v44 = vmax.f32 %v1598_v1, %v2490_v19  ;;  %2789 = vmatpush.msra.mxu3 %v4067_v57  ;;  %v6717_v19 = vld [vmem:[#allocation53_spill] sm:$0xff]  ;;  %v6729_v30 = vld [vmem:[#allocation27_spill] sm:$0xff] }
 0x2de   : > { %v2039_v4 = vadd.f32 %v6715_v46, %v1958_v8  ;;  %v1878_v6 = vadd.f32 %v6716_v18, %v1729_v40  ;;  %v1602_v8 = vadd.f32 %v6726_v17, %v6725_v10  ;;  %v1603_v56 = vadd.f32 %v6729_v30, %v6728_v20  ;;  %v6730_v18 = vld [vmem:[#allocation55_spill] sm:$0xff]  ;;  %v6203_v20 = vld [vmem:[%s6589_s5 + $0x10] sm:$0xff] }
 0x2df   : > { %v2250_v58 = vpop.f32.mrf.mxu3  ;;  %v6208_v30 = vld [vmem:[%s6590_s6 + $0x10] sm:$0xff] }
 0x2e0   : > { %v2319_v28 = vpop.f32.mrf.mxu0  ;;  %v2185_v24 = vadd.f32 %v2163_v55, %v2039_v4  ;;  %v1959_v34 = vadd.f32 %v6717_v19, %v1878_v6  ;;  %v2169_v55 = vpop.f32.mrf.mxu2  ;;  %v4151_v19 = vld [vmem:[%s6587_s3 + $0x160] sm:$0xff] }
 0x2e1   : > { %v2345_v14 = vadd.f32 %v2319_v28, %v2264_v43  ;;  %v2465_v23 = vpop.f32.mrf.mxu1  ;;  %v1601_v43 = vadd.f32 %v6719_v21, %v6718_v42  ;;  %v6720_v28 = vld [vmem:[#allocation28_spill] sm:$0xff]  ;;  %v4202_v21 = vld [vmem:[%s6587_s3 + $0x1f8] sm:$0xff] }
 0x2e2   : > { %v2266_v36 = vadd.f32 %v2244_v15, %v2185_v24  ;;  %v4153_v24 = vld [vmem:[%s6587_s3 + $0x170] sm:$0xff] }
 0x2e3   : > { %v2491_v22 = vadd.f32 %v2465_v23, %v2345_v14  ;;  %v1732_v14 = vadd.f32 %v6721_v49, %v6720_v28  ;;  %v6722_v23 = vld [vmem:[#allocation54_spill] sm:$0xff] }
 0x2e4   : > { %v5999_v7 = vld [vmem:[#allocation2 + $0x28] sm:$0xff]  ;;  %v2040_v13 = vadd.f32 %v6722_v23, %v1959_v34  ;;  %v4150_v34 = vld [vmem:[%s6587_s3 + $0x158] sm:$0xff] }
 0x2e5   : > { %v2507_v63 = vmax.f32 %v1599_v60, %v2491_v22  ;;  %4064 = vmatmul.msk.f32.gmra.mxu2 %vm2540_vm2, %v5999_v7  ;;  %4088 = vmatmul.msk.f32.gmra.mxu3 %vm2540_vm2, %v5999_v7  ;;  %v6723_v60 = vld [vmem:[#allocation46_spill] sm:$0xff]  ;;  %v4200_v23 = vld [vmem:[%s6587_s3 + $0x1e8] sm:$0xff] }
 0x2e6   : > { %4127 = vmatmul.msk.f32.gmra.mxu1 %vm2540_vm2, %v5999_v7  ;;  %v1879_v48 = vadd.f32 %v6723_v60, %v1732_v14  ;;  %v2186_v3 = vadd.f32 %v2166_v51, %v2040_v13  ;;  %v4148_v51 = vld [vmem:[%s6587_s3 + $0x148] sm:$0xff]  ;;  %v4199_v13 = vld [vmem:[%s6587_s3 + $0x1e0] sm:$0xff] }
 0x2e7   : > { %v2517_v0 = vmax.f32 %v2506_v44, %v2507_v63 }
 0x2e8   : > { %v2322_v53 = vpop.f32.mrf.mxu0  ;;  %v1960_v45 = vadd.f32 %v6724_v38, %v1879_v48  ;;  %v2267_v22 = vadd.f32 %v2247_v12, %v2186_v3  ;;  %v4196_v38 = vld [vmem:[%s6587_s3 + $0x1c8] sm:$0xff] }
 0x2e9   : > { %v2529_v54 = vadd.f32 %v5884_v11, %v2517_v0  ;;  %v2346_v2 = vadd.f32 %v2322_v53, %v2265_v62  ;;  %v2468_v33 = vpop.f32.mrf.mxu1  ;;  %v6727_v62 = vld [vmem:[#allocation57_spill] sm:$0xff] }
 0x2ea   : > { %v2041_v0 = vadd.f32 %v6727_v62, %v1960_v45  ;;  %v4195_v45 = vld [vmem:[%s6587_s3 + $0x1c0] sm:$0xff] }
 0x2eb   : > { %v2537_v1 = vmax.f32 %v2529_v54, 0.0  ;;  %v2492_v32 = vadd.f32 %v2468_v33, %v2346_v2 }
 0x2ec   : > { %v2187_v54 = vadd.f32 %v2169_v55, %v2041_v0 }
 0x2ed   : > { %2550 = vst.msk [vmem:[#allocation2 + $0x30] sm:$0xff] %vm2540_vm2, %v2537_v1  ;;  %v2508_v31 = vmax.f32 %v1600_v5, %v2492_v32 }
 0x2ee   : > { %v2268_v33 = vadd.f32 %v2250_v58, %v2187_v54  ;;  %v6164_v58 = vld [vmem:[%s6589_s5] sm:$0xff] }
 0x2ef   : > { %v6169_v54 = vld [vmem:[%s6590_s6] sm:$0xff] }
 0x2f0   : > { %v2325_v37 = vpop.f32.mrf.mxu0 }
 0x2f1   : > { %v2347_v44 = vadd.f32 %v2325_v37, %v2266_v36  ;;  %v2471_v9 = vpop.f32.mrf.mxu1  ;;  %v4149_v36 = vld [vmem:[%s6587_s3 + $0x150] sm:$0xff]  ;;  %v4147_v37 = vld [vmem:[%s6587_s3 + $0x140] sm:$0xff] }
 0x2f3   : > { %v2493_v39 = vadd.f32 %v2471_v9, %v2347_v44 }
 0x2f4   : > { %v6038_v41 = vld [vmem:[#allocation2 + $0x30] sm:$0xff] }
 0x2f5   : > { %v2509_v27 = vmax.f32 %v1601_v43, %v2493_v39  ;;  %4065 = vmatmul.msk.f32.gmra.mxu2 %vm2540_vm2, %v6038_v41  ;;  %4089 = vmatmul.msk.f32.gmra.mxu3 %vm2540_vm2, %v6038_v41  ;;  %v4201_v43 = vld [vmem:[%s6587_s3 + $0x1f0] sm:$0xff]  ;;  %v4198_v39 = vld [vmem:[%s6587_s3 + $0x1d8] sm:$0xff] }
 0x2f6   : > { %4128 = vmatmul.msk.f32.gmra.mxu1 %vm2540_vm2, %v6038_v41 }
 0x2f7   : > { %v2518_v16 = vmax.f32 %v2508_v31, %v2509_v27  ;;  %v4152_v31 = vld [vmem:[%s6587_s3 + $0x168] sm:$0xff]  ;;  %v4197_v27 = vld [vmem:[%s6587_s3 + $0x1d0] sm:$0xff] }
 0x2f8   : > { %v2328_v52 = vpop.f32.mrf.mxu0 }
 0x2f9   : > { %v2530_v59 = vadd.f32 %v5884_v11, %v2518_v16  ;;  %v2348_v50 = vadd.f32 %v2328_v52, %v2267_v22  ;;  %v2474_v63 = vpop.f32.mrf.mxu1 }
 0x2fb   : > { %v2538_v15 = vmax.f32 %v2530_v59, 0.0  ;;  %v2494_v53 = vadd.f32 %v2474_v63, %v2348_v50 }
 0x2fd   : > { %2551 = vst.msk [vmem:[#allocation2 + $0x38] sm:$0xff] %vm2540_vm2, %v2538_v15  ;;  %v2510_v2 = vmax.f32 %v1602_v8, %v2494_v53 }
 0x300   : > { %v2331_v26 = vpop.f32.mrf.mxu0  ;;  %v6111_v44 = vpop.f32.mrf.mxu2 }
 0x301   : > { %v2349_v35 = vadd.f32 %v2331_v26, %v2268_v33  ;;  %v2477_v5 = vpop.f32.mrf.mxu1  ;;  %v6113_v9 = vpop.f32.mrf.mxu3  ;;  %v6184_v26 = vld [vmem:[%s6589_s5 + $0x8] sm:$0xff] }
 0x303   : > { %v2495_v40 = vadd.f32 %v2477_v5, %v2349_v35  ;;  %v6189_v35 = vld [vmem:[%s6590_s6 + $0x8] sm:$0xff] }
 0x304   : > { %v6055_v46 = vld [vmem:[#allocation2 + $0x38] sm:$0xff] }
 0x305   : > { %v2511_v4 = vmax.f32 %v1603_v56, %v2495_v40  ;;  %4066 = vmatmul.msk.f32.gmra.mxu2 %vm2540_vm2, %v6055_v46  ;;  %4090 = vmatmul.msk.f32.gmra.mxu3 %vm2540_vm2, %v6055_v46  ;;  %v4138_v40 = vld [vmem:[%s6587_s3 + $0x138] sm:$0xff] }
 0x306   : > { %4129 = vmatmul.msk.f32.gmra.mxu1 %vm2540_vm2, %v6055_v46 }
 0x307   : > { %v2519_v1 = vmax.f32 %v2510_v2, %v2511_v4  ;;  %v4137_v4 = vld [vmem:[%s6587_s3 + $0x130] sm:$0xff] }
 0x309   : > { %v2531_v32 = vadd.f32 %v5884_v11, %v2519_v1  ;;  %v4154_v11 = vld [vmem:[%s6587_s3 + $0x178] sm:$0xff]  ;;  %v4136_v1 = vld [vmem:[%s6587_s3 + $0x128] sm:$0xff] }
 0x30a   : > { %3037 = vmatpush.msrb.mxu3 %v4154_v11 }
 0x30b   : > { %v2539_v57 = vmax.f32 %v2531_v32, 0.0  ;;  %v4135_v32 = vld [vmem:[%s6587_s3 + $0x120] sm:$0xff] }
 0x30c   : > { %3038 = vmatpush.msrb.mxu3 %v4153_v24  ;;  %v4134_v24 = vld [vmem:[%s6587_s3 + $0x118] sm:$0xff] }
 0x30d   : > { %2552 = vst.msk [vmem:[#allocation2 + $0x40] sm:$0xff] %vm2540_vm2, %v2539_v57  ;;  %4099 = vmatmul.msk.f32.vlgmr.msra.gmra.mxu3 %vm2540_vm2, %v6730_v18  ;;  %v6234_v57 = vld [vmem:[%s6589_s5 + $0x18] sm:$0xff] }
 0x30e   : > { %3039 = vmatpush.msrb.mxu3 %v4152_v31  ;;  %v6239_v18 = vld [vmem:[%s6590_s6 + $0x18] sm:$0xff]  ;;  %v4133_v31 = vld [vmem:[%s6587_s3 + $0x110] sm:$0xff] }
 0x310   : > { %3040 = vmatpush.msrb.mxu3 %v4151_v19  ;;  %v4132_v19 = vld [vmem:[%s6587_s3 + $0x108] sm:$0xff] }
 0x312   : > { %3041 = vmatpush.msrb.mxu3 %v4150_v34  ;;  %v4131_v34 = vld [vmem:[%s6587_s3 + $0x100] sm:$0xff] }
 0x314   : > { %v6067_v6 = vld [vmem:[#allocation2 + $0x40] sm:$0xff]  ;;  %3042 = vmatpush.msrb.mxu3 %v4149_v36 }
 0x315   : > { %4100 = vmatmul.msk.f32.gmra.mxu3 %vm2540_vm2, %v5898_v25  ;;  %4130 = vmatmul.msk.f32.gmra.mxu1 %vm2540_vm2, %v6067_v6  ;;  %v6264_v36 = vld [vmem:[%s6589_s5 + $0x20] sm:$0xff] }
 0x316   : > { %3043 = vmatpush.msrb.mxu3 %v4148_v51  ;;  %v6269_v51 = vld [vmem:[%s6590_s6 + $0x20] sm:$0xff] }
 0x318   : > { %3044 = vmatpush.msrb.mxu3 %v4147_v37 }
 0x31a   : > { %3276 = vmatpush.msra.mxu3 %v4202_v21  ;;  %v6305_v21 = vld [vmem:[%s6590_s6 + $0x30] sm:$0xff] }
 0x31c   : > { %3277 = vmatpush.msra.mxu3 %v4201_v43 }
 0x31d   : > { %4101 = vmatmul.msk.f32.gmra.mxu3 %vm2540_vm2, %v5918_v47 }
 0x31e   : > { %3278 = vmatpush.msra.mxu3 %v4200_v23 }
 0x320   : > { %3279 = vmatpush.msra.mxu3 %v4199_v13 }
 0x322   : > { %3280 = vmatpush.msra.mxu3 %v4198_v39 }
 0x323   : > { %v6125_v28 = vpop.f32.mrf.mxu1 }
 0x324   : > { %3281 = vmatpush.msra.mxu3 %v4197_v27  ;;  %v4184_v27 = vld [vmem:[%s6587_s3 + $0x1a8] sm:$0xff] }
 0x325   : > { %4102 = vmatmul.msk.f32.gmra.mxu3 %vm2540_vm2, %v5942_v61 }
 0x326   : > { %3282 = vmatpush.msra.mxu3 %v4196_v38  ;;  %v4216_v38 = vld [vmem:[%s6587_s3 + $0x228] sm:$0xff] }
 0x328   : > { %v2629_v12 = vpop.f32.mrf.mxu2  ;;  %v2688_v42 = vpop.f32.mrf.mxu3  ;;  %3283 = vmatpush.msra.mxu3 %v4195_v45  ;;  %v4183_v45 = vld [vmem:[%s6587_s3 + $0x1a0] sm:$0xff] }
 0x32d   : > { %4103 = vmatmul.msk.f32.gmra.mxu3 %vm2540_vm2, %v5966_v29 }
 0x333   : > { %v6138_v60 = vpop.f32.mrf.mxu1 }
 0x335   : > { %4104 = vmatmul.msk.f32.gmra.mxu3 %vm2540_vm2, %v5999_v7 }
 0x338   : > { %v2632_v49 = vpop.f32.mrf.mxu2  ;;  %v2691_v14 = vpop.f32.mrf.mxu3 }
 0x33d   : > { %4105 = vmatmul.msk.f32.gmra.mxu3 %vm2540_vm2, %v6038_v41 }
 0x343   : > { %v2952_v22 = vpop.f32.mrf.mxu1 }
 0x345   : > { %4106 = vmatmul.msk.f32.gmra.mxu3 %vm2540_vm2, %v6055_v46 }
 0x348   : > { %v2635_v48 = vpop.f32.mrf.mxu2  ;;  %v2694_v3 = vpop.f32.mrf.mxu3 }
 0x34d   : > { %4155 = vmatmul.msk.f32.vlgmr.msrb.gmra.mxu3 %vm2540_vm2, %v5898_v25 }
 0x353   : > { %v2955_v59 = vpop.f32.mrf.mxu1 }
 0x355   : > { %4156 = vmatmul.msk.f32.gmra.mxu3 %vm2540_vm2, %v5918_v47 }
 0x358   : > { %v2638_v16 = vpop.f32.mrf.mxu2  ;;  %v2697_v52 = vpop.f32.mrf.mxu3 }
 0x35d   : > { %4157 = vmatmul.msk.f32.gmra.mxu3 %vm2540_vm2, %v5942_v61 }
 0x363   : > { %v2958_v55 = vpop.f32.mrf.mxu1 }
 0x365   : > { %4158 = vmatmul.msk.f32.gmra.mxu3 %vm2540_vm2, %v5966_v29 }
 0x368   : > { %v2641_v50 = vpop.f32.mrf.mxu2  ;;  %v2700_v63 = vpop.f32.mrf.mxu3 }
 0x36d   : > { %4159 = vmatmul.msk.f32.gmra.mxu3 %vm2540_vm2, %v5999_v7 }
 0x373   : > { %v2961_v8 = vpop.f32.mrf.mxu1 }
 0x375   : > { %4160 = vmatmul.msk.f32.gmra.mxu3 %vm2540_vm2, %v6038_v41 }
 0x378   : > { %v2644_v10 = vpop.f32.mrf.mxu2  ;;  %v2703_v17 = vpop.f32.mrf.mxu3 }
 0x37d   : > { %4161 = vmatmul.msk.f32.gmra.mxu3 %vm2540_vm2, %v6055_v46 }
 0x383   : > { %v2964_v15 = vpop.f32.mrf.mxu1 }
 0x385   : > { %4162 = vmatmul.msk.f32.gmra.mxu3 %vm2540_vm2, %v6067_v6 }
 0x388   : > { %v2647_v62 = vpop.f32.mrf.mxu2  ;;  %v2706_v0 = vpop.f32.mrf.mxu3 }
 0x389   : > { %2741 = vmatpush.msrb.mxu2 %v2647_v62  ;;  %2847 = vmatpush.msrb.mxu0 %v2706_v0 }
 0x38b   : > { %2742 = vmatpush.msrb.mxu2 %v2644_v10  ;;  %2848 = vmatpush.msrb.mxu0 %v2703_v17  ;;  %v4212_v10 = vld [vmem:[%s6587_s3 + $0x208] sm:$0xff]  ;;  %v4179_v17 = vld [vmem:[%s6587_s3 + $0x180] sm:$0xff] }
 0x38d   : > { %2743 = vmatpush.msrb.mxu2 %v2641_v50  ;;  %2849 = vmatpush.msrb.mxu0 %v2700_v63  ;;  %v4181_v50 = vld [vmem:[%s6587_s3 + $0x190] sm:$0xff] }
 0x38e   : > { %4203 = vmatmul.msk.f32.vlgmr.msra.gmra.mxu3 %vm2540_vm2, %v5918_v47  ;;  %v4213_v63 = vld [vmem:[%s6587_s3 + $0x210] sm:$0xff] }
 0x38f   : > { %2744 = vmatpush.msrb.mxu2 %v2638_v16  ;;  %2850 = vmatpush.msrb.mxu0 %v2697_v52  ;;  %v4182_v52 = vld [vmem:[%s6587_s3 + $0x198] sm:$0xff] }
 0x390   : > { %v6159_v53 = vpop.f32.mrf.mxu3 }
 0x391   : > { %2745 = vmatpush.msrb.mxu2 %v2635_v48  ;;  %2851 = vmatpush.msrb.mxu0 %v2694_v3  ;;  %v4185_v48 = vld [vmem:[%s6587_s3 + $0x1b0] sm:$0xff] }
 0x392   : > { %v2967_v2 = vpop.f32.mrf.mxu1  ;;  %v4217_v3 = vld [vmem:[%s6587_s3 + $0x230] sm:$0xff] }
 0x393   : > { %2746 = vmatpush.msrb.mxu2 %v2632_v49  ;;  %2852 = vmatpush.msrb.mxu0 %v2691_v14  ;;  %v6321_v49 = vld [vmem:[%s6590_s6 + $0x38] sm:$0xff] }
 0x395   : > { %2747 = vmatpush.msrb.mxu2 %v2629_v12  ;;  %2853 = vmatpush.msrb.mxu0 %v2688_v42  ;;  %v6300_v42 = vld [vmem:[%s6589_s5 + $0x30] sm:$0xff] }
 0x396   : > { %4204 = vmatmul.msk.f32.gmra.mxu3 %vm2540_vm2, %v5942_v61 }
 0x397   : > { %2748 = vmatpush.msrb.mxu2 %v6111_v44  ;;  %2854 = vmatpush.msrb.mxu0 %v6113_v9  ;;  %v6282_v44 = vld [vmem:[%s6589_s5 + $0x28] sm:$0xff] }
 0x398   : > { %4091 = vmatmul.msk.f32.vlgmr.msrb.gmra.mxu2 %vm2540_vm2, %v6164_v58  ;;  %v6177_v33 = vpop.f32.mrf.mxu3  ;;  %4107 = vmatmul.msk.f32.vlgmr.msrb.gmra.mxu0 %vm2540_vm2, %v6169_v54  ;;  %v6287_v9 = vld [vmem:[%s6590_s6 + $0x28] sm:$0xff] }
 0x399   : > { %3086 = vmatpush.msra.mxu0 %v2967_v2  ;;  %2987 = vmatpush.msra.mxu2 %v4138_v40 }
 0x39b   : > { %3087 = vmatpush.msra.mxu0 %v2964_v15  ;;  %2988 = vmatpush.msra.mxu2 %v4137_v4 }
 0x39d   : > { %3088 = vmatpush.msra.mxu0 %v2961_v8  ;;  %2989 = vmatpush.msra.mxu2 %v4136_v1  ;;  %v4211_v8 = vld [vmem:[%s6587_s3 + $0x200] sm:$0xff] }
 0x39e   : > { %4205 = vmatmul.msk.f32.gmra.mxu3 %vm2540_vm2, %v5966_v29 }
 0x39f   : > { %3089 = vmatpush.msra.mxu0 %v2958_v55  ;;  %2990 = vmatpush.msra.mxu2 %v4135_v32  ;;  %v4180_v55 = vld [vmem:[%s6587_s3 + $0x188] sm:$0xff] }
 0x3a0   : > { %4092 = vmatmul.msk.f32.gmra.mxu2 %vm2540_vm2, %v6184_v26  ;;  %v6195_v5 = vpop.f32.mrf.mxu3  ;;  %4108 = vmatmul.msk.f32.gmra.mxu0 %vm2540_vm2, %v6189_v35 }
 0x3a1   : > { %3090 = vmatpush.msra.mxu0 %v2955_v59  ;;  %2991 = vmatpush.msra.mxu2 %v4134_v24  ;;  %v4214_v59 = vld [vmem:[%s6587_s3 + $0x218] sm:$0xff]  ;;  %v3184_v24 = vld [vmem:[#allocation2 + $0x48] sm:$0xff] }
 0x3a3   : > { %3091 = vmatpush.msra.mxu0 %v2952_v22  ;;  %2992 = vmatpush.msra.mxu2 %v4133_v31  ;;  %v4215_v22 = vld [vmem:[%s6587_s3 + $0x220] sm:$0xff] }
 0x3a5   : > { %3092 = vmatpush.msra.mxu0 %v6138_v60  ;;  %2993 = vmatpush.msra.mxu2 %v4132_v19  ;;  %v4218_v60 = vld [vmem:[%s6587_s3 + $0x238] sm:$0xff] }
 0x3a6   : > { %4206 = vmatmul.msk.f32.gmra.mxu3 %vm2540_vm2, %v5999_v7 }
 0x3a7   : > { %3093 = vmatpush.msra.mxu0 %v6125_v28  ;;  %2994 = vmatpush.msra.mxu2 %v4131_v34  ;;  %v6316_v28 = vld [vmem:[%s6589_s5 + $0x38] sm:$0xff] }
 0x3a8   : > { %4093 = vmatmul.msk.f32.gmra.mxu2 %vm2540_vm2, %v6203_v20  ;;  %v6215_v56 = vpop.f32.mrf.mxu3  ;;  %4109 = vmatmul.msk.f32.gmra.mxu0 %vm2540_vm2, %v6208_v30 }
 0x3a9   : > { %3326 = vmatpush.msrb.mxu0 %v4218_v60 }
 0x3ab   : > { %3327 = vmatpush.msrb.mxu0 %v4217_v3 }
 0x3ad   : > { %3328 = vmatpush.msrb.mxu0 %v4216_v38 }
 0x3ae   : > { %4207 = vmatmul.msk.f32.gmra.mxu3 %vm2540_vm2, %v6038_v41 }
 0x3af   : > { %3329 = vmatpush.msrb.mxu0 %v4215_v22 }
 0x3b0   : > { %4094 = vmatmul.msk.f32.gmra.mxu2 %vm2540_vm2, %v6234_v57  ;;  %v6245_v11 = vpop.f32.mrf.mxu3  ;;  %4110 = vmatmul.msk.f32.gmra.mxu0 %vm2540_vm2, %v6239_v18 }
 0x3b1   : > { %3330 = vmatpush.msrb.mxu0 %v4214_v59 }
 0x3b3   : > { %3331 = vmatpush.msrb.mxu0 %v4213_v63 }
 0x3b5   : > { %3332 = vmatpush.msrb.mxu0 %v4212_v10 }
 0x3b6   : > { %4208 = vmatmul.msk.f32.gmra.mxu3 %vm2540_vm2, %v6055_v46 }
 0x3b7   : > { %3333 = vmatpush.msrb.mxu0 %v4211_v8 }
 0x3b8   : > { %4095 = vmatmul.msk.f32.gmra.mxu2 %vm2540_vm2, %v6264_v36  ;;  %v6275_v37 = vpop.f32.mrf.mxu3  ;;  %4111 = vmatmul.msk.f32.gmra.mxu0 %vm2540_vm2, %v6269_v51 }
 0x3be   : > { %4209 = vmatmul.msk.f32.gmra.mxu3 %vm2540_vm2, %v6067_v6 }
 0x3c0   : > { %4096 = vmatmul.msk.f32.gmra.mxu2 %vm2540_vm2, %v6282_v44  ;;  %v6293_v12 = vpop.f32.mrf.mxu3  ;;  %4112 = vmatmul.msk.f32.gmra.mxu0 %vm2540_vm2, %v6287_v9 }
 0x3c6   : > { %4210 = vmatmul.msk.f32.gmra.mxu3 %vm2540_vm2, %v3184_v24 }
 0x3c8   : > { %4097 = vmatmul.msk.f32.gmra.mxu2 %vm2540_vm2, %v6300_v42  ;;  %v6309_v43 = vpop.f32.mrf.mxu3  ;;  %4113 = vmatmul.msk.f32.gmra.mxu0 %vm2540_vm2, %v6305_v21 }
 0x3d0   : > { %4098 = vmatmul.msk.f32.gmra.mxu2 %vm2540_vm2, %v6316_v28  ;;  %4114 = vmatmul.msk.f32.gmra.mxu0 %vm2540_vm2, %v6321_v49  ;;  %v6327_v14 = vpop.f32.mrf.mxu3 }
 0x3d8   : > { %4139 = vmatmul.msk.f32.vlgmr.msra.gmra.mxu2 %vm2540_vm2, %v5898_v25  ;;  %v3049_v23 = vpop.f32.mrf.mxu3  ;;  %4163 = vmatmul.msk.f32.vlgmr.msra.gmra.mxu0 %vm2540_vm2, %v6164_v58  ;;  %v4186_v25 = vld [vmem:[%s6587_s3 + $0x1b8] sm:$0xff] }
 0x3d9   : > { %3226 = vmatpush.msrb.mxu2 %v4186_v25 }
 0x3db   : > { %3227 = vmatpush.msrb.mxu2 %v4185_v48 }
 0x3dd   : > { %3228 = vmatpush.msrb.mxu2 %v4184_v27 }
 0x3df   : > { %3229 = vmatpush.msrb.mxu2 %v4183_v45 }
 0x3e0   : > { %4140 = vmatmul.msk.f32.gmra.mxu2 %vm2540_vm2, %v5918_v47  ;;  %v3052_v13 = vpop.f32.mrf.mxu3  ;;  %4164 = vmatmul.msk.f32.gmra.mxu0 %vm2540_vm2, %v6184_v26 }
 0x3e1   : > { %3230 = vmatpush.msrb.mxu2 %v4182_v52 }
 0x3e3   : > { %3231 = vmatpush.msrb.mxu2 %v4181_v50 }
 0x3e5   : > { %3232 = vmatpush.msrb.mxu2 %v4180_v55 }
 0x3e7   : > { %3233 = vmatpush.msrb.mxu2 %v4179_v17 }
 0x3e8   : > { %4141 = vmatmul.msk.f32.gmra.mxu2 %vm2540_vm2, %v5942_v61  ;;  %v3055_v39 = vpop.f32.mrf.mxu3  ;;  %4165 = vmatmul.msk.f32.gmra.mxu0 %vm2540_vm2, %v6203_v20 }
 0x3f0   : > { %4142 = vmatmul.msk.f32.gmra.mxu2 %vm2540_vm2, %v5966_v29  ;;  %v3058_v16 = vpop.f32.mrf.mxu3  ;;  %4166 = vmatmul.msk.f32.gmra.mxu0 %vm2540_vm2, %v6234_v57 }
 0x3f8   : > { %4143 = vmatmul.msk.f32.gmra.mxu2 %vm2540_vm2, %v5999_v7  ;;  %v3061_v62 = vpop.f32.mrf.mxu3  ;;  %4167 = vmatmul.msk.f32.gmra.mxu0 %vm2540_vm2, %v6264_v36 }
 0x400   : > { %4144 = vmatmul.msk.f32.gmra.mxu2 %vm2540_vm2, %v6038_v41  ;;  %v3064_v0 = vpop.f32.mrf.mxu3  ;;  %4168 = vmatmul.msk.f32.gmra.mxu0 %vm2540_vm2, %v6282_v44 }
 0x408   : > { %4145 = vmatmul.msk.f32.gmra.mxu2 %vm2540_vm2, %v6055_v46  ;;  %v3067_v15 = vpop.f32.mrf.mxu3  ;;  %4169 = vmatmul.msk.f32.gmra.mxu0 %vm2540_vm2, %v6300_v42 }
 0x409   : > { %3135 = vmatpush.msra.mxu1 %v3067_v15 }
 0x40b   : > { %3136 = vmatpush.msra.mxu1 %v3064_v0 }
 0x40d   : > { %3137 = vmatpush.msra.mxu1 %v3061_v62 }
 0x40f   : > { %3138 = vmatpush.msra.mxu1 %v3058_v16 }
 0x410   : > { %4146 = vmatmul.msk.f32.gmra.mxu2 %vm2540_vm2, %v6067_v6  ;;  %4170 = vmatmul.msk.f32.gmra.mxu0 %vm2540_vm2, %v6316_v28 }
 0x411   : > { %3139 = vmatpush.msra.mxu1 %v3055_v39 }
 0x413   : > { %3140 = vmatpush.msra.mxu1 %v3052_v13 }
 0x415   : > { %v2856_v2 = vpop.f32.mrf.mxu0  ;;  %3141 = vmatpush.msra.mxu1 %v3049_v23 }
 0x417   : > { %3142 = vmatpush.msra.mxu1 %v6327_v14 }
 0x418   : > { %4171 = vmatmul.msk.f32.vlgmr.msra.gmra.mxu1 %vm2540_vm2, %v6169_v54  ;;  %4187 = vmatmul.msk.f32.vlgmr.msrb.gmra.mxu2 %vm2540_vm2, %v5918_v47 }
 0x419   : > { %4219 = vmatmul.msk.f32.vlgmr.msrb.gmra.mxu0 %vm2540_vm2, %v5918_v47 }
 0x41b   : > { %v2750_v40 = vpop.f32.mrf.mxu2 }
 0x41c   : > { %v2792_v39 = vadd.f32 %v6159_v53, %v2750_v40 }
 0x41d   : > { %v2859_v4 = vpop.f32.mrf.mxu0 }
 0x41e   : > { %v2880_v25 = vadd.f32 %v2856_v2, %v2792_v39 }
 0x420   : > { %4172 = vmatmul.msk.f32.gmra.mxu1 %vm2540_vm2, %v6189_v35  ;;  %4188 = vmatmul.msk.f32.gmra.mxu2 %vm2540_vm2, %v5942_v61 }
 0x421   : > { %4220 = vmatmul.msk.f32.gmra.mxu0 %vm2540_vm2, %v5942_v61 }
 0x423   : > { %v2753_v1 = vpop.f32.mrf.mxu2 }
 0x424   : > { %v2795_v27 = vadd.f32 %v6177_v33, %v2753_v1 }
 0x425   : > { %v2862_v32 = vpop.f32.mrf.mxu0 }
 0x426   : > { %v2881_v38 = vadd.f32 %v2859_v4, %v2795_v27 }
 0x428   : > { %4173 = vmatmul.msk.f32.gmra.mxu1 %vm2540_vm2, %v6208_v30  ;;  %4189 = vmatmul.msk.f32.gmra.mxu2 %vm2540_vm2, %v5966_v29 }
 0x429   : > { %4221 = vmatmul.msk.f32.gmra.mxu0 %vm2540_vm2, %v5966_v29 }
 0x42b   : > { %v2756_v47 = vpop.f32.mrf.mxu2 }
 0x42c   : > { %v2798_v52 = vadd.f32 %v6195_v5, %v2756_v47 }
 0x42d   : > { %v2865_v31 = vpop.f32.mrf.mxu0 }
 0x42e   : > { %v2882_v50 = vadd.f32 %v2862_v32, %v2798_v52 }
 0x430   : > { %4174 = vmatmul.msk.f32.gmra.mxu1 %vm2540_vm2, %v6239_v18  ;;  %4190 = vmatmul.msk.f32.gmra.mxu2 %vm2540_vm2, %v5999_v7 }
 0x431   : > { %4222 = vmatmul.msk.f32.gmra.mxu0 %vm2540_vm2, %v5999_v7 }
 0x433   : > { %v2759_v61 = vpop.f32.mrf.mxu2 }
 0x434   : > { %v2801_v10 = vadd.f32 %v6215_v56, %v2759_v61 }
 0x435   : > { %v2868_v19 = vpop.f32.mrf.mxu0 }
 0x436   : > { %v2883_v8 = vadd.f32 %v2865_v31, %v2801_v10 }
 0x438   : > { %4175 = vmatmul.msk.f32.gmra.mxu1 %vm2540_vm2, %v6269_v51  ;;  %4191 = vmatmul.msk.f32.gmra.mxu2 %vm2540_vm2, %v6038_v41 }
 0x439   : > { %4223 = vmatmul.msk.f32.gmra.mxu0 %vm2540_vm2, %v6038_v41 }
 0x43b   : > { %v2762_v29 = vpop.f32.mrf.mxu2 }
 0x43c   : > { %v2804_v15 = vadd.f32 %v6245_v11, %v2762_v29 }
 0x43d   : > { %v2871_v34 = vpop.f32.mrf.mxu0 }
 0x43e   : > { %v2884_v40 = vadd.f32 %v2868_v19, %v2804_v15 }
 0x440   : > { %4176 = vmatmul.msk.f32.gmra.mxu1 %vm2540_vm2, %v6287_v9  ;;  %4192 = vmatmul.msk.f32.gmra.mxu2 %vm2540_vm2, %v6055_v46 }
 0x441   : > { %4224 = vmatmul.msk.f32.gmra.mxu0 %vm2540_vm2, %v6055_v46 }
 0x443   : > { %v2765_v7 = vpop.f32.mrf.mxu2 }
 0x444   : > { %v2807_v32 = vadd.f32 %v6275_v37, %v2765_v7 }
 0x445   : > { %v2874_v14 = vpop.f32.mrf.mxu0 }
 0x448   : > { %4177 = vmatmul.msk.f32.gmra.mxu1 %vm2540_vm2, %v6305_v21  ;;  %4193 = vmatmul.msk.f32.gmra.mxu2 %vm2540_vm2, %v6067_v6 }
 0x449   : > { %4225 = vmatmul.msk.f32.gmra.mxu0 %vm2540_vm2, %v6067_v6 }
 0x44b   : > { %v2768_v41 = vpop.f32.mrf.mxu2 }
 0x44c   : > { %v2810_v31 = vadd.f32 %v6293_v12, %v2768_v41 }
 0x44d   : > { %v2877_v23 = vpop.f32.mrf.mxu0 }
 0x450   : > { %4178 = vmatmul.msk.f32.gmra.mxu1 %vm2540_vm2, %v6321_v49  ;;  %4194 = vmatmul.msk.f32.gmra.mxu2 %vm2540_vm2, %v3184_v24 }
 0x451   : > { %4226 = vmatmul.msk.f32.gmra.mxu0 %vm2540_vm2, %v3184_v24  ;;  %v2885_v24 = vadd.f32 %v2871_v34, %v2807_v32 }
 0x453   : > { %v2771_v46 = vpop.f32.mrf.mxu2 }
 0x454   : > { %v2813_v19 = vadd.f32 %v6309_v43, %v2771_v46 }
 0x455   : > { %v3095_v13 = vpop.f32.mrf.mxu0 }
 0x45b   : > { %v2996_v60 = vpop.f32.mrf.mxu2 }
 0x45c   : > { %v3070_v48 = vadd.f32 %v2996_v60, %v2880_v25  ;;  %v2886_v25 = vadd.f32 %v2874_v14, %v2810_v31 }
 0x45d   : > { %v3098_v3 = vpop.f32.mrf.mxu0 }
 0x45e   : > { %v6459_v6 = vadd.f32 %v3095_v13, %v3070_v48 }
 0x463   : > { %v2999_v45 = vpop.f32.mrf.mxu2 }
 0x464   : > { %v3071_v22 = vadd.f32 %v2999_v45, %v2881_v38 }
 0x465   : > { %v3101_v16 = vpop.f32.mrf.mxu0 }
 0x466   : > { %v6462_v59 = vadd.f32 %v3098_v3, %v3071_v22  ;;  %v2887_v3 = vadd.f32 %v2877_v23, %v2813_v19 }
 0x46b   : > { %v3002_v63 = vpop.f32.mrf.mxu2 }
 0x46c   : > { %v3072_v55 = vadd.f32 %v3002_v63, %v2882_v50 }
 0x46d   : > { %v3104_v53 = vpop.f32.mrf.mxu0 }
 0x46e   : > { %v6465_v17 = vadd.f32 %v3101_v16, %v3072_v55 }
 0x473   : > { %v3005_v33 = vpop.f32.mrf.mxu2 }
 0x474   : > { %v3073_v62 = vadd.f32 %v3005_v33, %v2883_v8 }
 0x475   : > { %v3107_v0 = vpop.f32.mrf.mxu0 }
 0x476   : > { %v6468_v2 = vadd.f32 %v3104_v53, %v3073_v62 }
 0x47b   : > { %v3008_v5 = vpop.f32.mrf.mxu2 }
 0x47c   : > { %v3074_v4 = vadd.f32 %v3008_v5, %v2884_v40 }
 0x47d   : > { %v3110_v1 = vpop.f32.mrf.mxu0 }
 0x47e   : > { %v6471_v47 = vadd.f32 %v3107_v0, %v3074_v4 }
 0x483   : > { %v3011_v56 = vpop.f32.mrf.mxu2 }
 0x484   : > { %v3075_v61 = vadd.f32 %v3011_v56, %v2885_v24 }
 0x485   : > { %v3113_v13 = vpop.f32.mrf.mxu0 }
 0x486   : > { %v6474_v39 = vadd.f32 %v3110_v1, %v3075_v61 }
 0x48b   : > { %v3014_v11 = vpop.f32.mrf.mxu2 }
 0x48c   : > { %v3076_v29 = vadd.f32 %v3014_v11, %v2886_v25 }
 0x48d   : > { %v3116_v60 = vpop.f32.mrf.mxu0 }
 0x48e   : > { %v6477_v48 = vadd.f32 %v3113_v13, %v3076_v29 }
 0x493   : > { %v3017_v37 = vpop.f32.mrf.mxu2 }
 0x494   : > { %v3077_v7 = vadd.f32 %v3017_v37, %v2887_v3 }
 0x496   : > { %v3335_v27 = vpop.f32.mrf.mxu0  ;;  %v6479_v34 = vadd.f32 %v3116_v60, %v3077_v7 }
 0x49b   : > { %v3235_v38 = vpop.f32.mrf.mxu2 }
 0x49e   : > { %v3338_v45 = vpop.f32.mrf.mxu0 }
 0x4a3   : > { %v3238_v22 = vpop.f32.mrf.mxu2 }
 0x4a6   : > { %v3341_v12 = vpop.f32.mrf.mxu0 }
 0x4ab   : > { %v3241_v41 = vpop.f32.mrf.mxu2 }
 0x4ae   : > { %v3344_v16 = vpop.f32.mrf.mxu0 }
 0x4b3   : > { %v3244_v14 = vpop.f32.mrf.mxu2 }
 0x4b6   : > { %v3347_v52 = vpop.f32.mrf.mxu0 }
 0x4bb   : > { %v3247_v50 = vpop.f32.mrf.mxu2 }
 0x4be   : > { %v3350_v63 = vpop.f32.mrf.mxu0 }
 0x4c3   : > { %v3250_v55 = vpop.f32.mrf.mxu2 }
 0x4c6   : > { %v3353_v43 = vpop.f32.mrf.mxu0 }
 0x4cb   : > { %v3253_v46 = vpop.f32.mrf.mxu2 }
 0x4ce   : > { %v3356_v53 = vpop.f32.mrf.mxu0 }
 0x4cf   : > { %3424 = vmatpush.msra.mxu2 %v3356_v53 }
 0x4d1   : > { %3425 = vmatpush.msra.mxu2 %v3353_v43 }
 0x4d3   : > { %3426 = vmatpush.msra.mxu2 %v3350_v63  ;;  %v3256_v23 = vpop.f32.mrf.mxu2 }
 0x4d4   : > { %3375 = vmatpush.msrb.mxu1 %v3256_v23 }
 0x4d5   : > { %3427 = vmatpush.msra.mxu2 %v3347_v52 }
 0x4d6   : > { %3376 = vmatpush.msrb.mxu1 %v3253_v46 }
 0x4d7   : > { %3428 = vmatpush.msra.mxu2 %v3344_v16 }
 0x4d8   : > { %3377 = vmatpush.msrb.mxu1 %v3250_v55 }
 0x4d9   : > { %3429 = vmatpush.msra.mxu2 %v3341_v12 }
 0x4da   : > { %3378 = vmatpush.msrb.mxu1 %v3247_v50 }
 0x4db   : > { %3430 = vmatpush.msra.mxu2 %v3338_v45 }
 0x4dc   : > { %3379 = vmatpush.msrb.mxu1 %v3244_v14 }
 0x4dd   : > { %3431 = vmatpush.msra.mxu2 %v3335_v27 }
 0x4de   : > { %3380 = vmatpush.msrb.mxu1 %v3241_v41  ;;  %4235 = vmatmul.msk.f32.vlgmr.msra.gmra.mxu2 %vm2540_vm2, %v6169_v54 }
 0x4e0   : > { %3381 = vmatpush.msrb.mxu1 %v3238_v22 }
 0x4e2   : > { %3382 = vmatpush.msrb.mxu1 %v3235_v38 }
 0x4e3   : > { %4227 = vmatmul.msk.f32.vlgmr.msrb.gmra.mxu1 %vm2540_vm2, %v6164_v58  ;;  %v3144_v58 = vpop.f32.mrf.mxu1 }
 0x4e6   : > { %4236 = vmatmul.msk.f32.gmra.mxu2 %vm2540_vm2, %v6189_v35 }
 0x4eb   : > { %4228 = vmatmul.msk.f32.gmra.mxu1 %vm2540_vm2, %v6184_v26  ;;  %v3147_v54 = vpop.f32.mrf.mxu1 }
 0x4ec   : > { %v3169_v10 = vadd.f32 %v3147_v54, %v6462_v59 }
 0x4ee   : > { %4237 = vmatmul.msk.f32.gmra.mxu2 %vm2540_vm2, %v6208_v30 }
 0x4f3   : > { %4229 = vmatmul.msk.f32.gmra.mxu1 %vm2540_vm2, %v6203_v20  ;;  %v3150_v26 = vpop.f32.mrf.mxu1 }
 0x4f4   : > { %v3170_v5 = vadd.f32 %v3150_v26, %v6465_v17 }
 0x4f6   : > { %4238 = vmatmul.msk.f32.gmra.mxu2 %vm2540_vm2, %v6239_v18  ;;  %v3285_v18 = vpop.f32.mrf.mxu3 }
 0x4fb   : > { %4230 = vmatmul.msk.f32.gmra.mxu1 %vm2540_vm2, %v6234_v57  ;;  %v3153_v35 = vpop.f32.mrf.mxu1 }
 0x4fc   : > { %v3171_v13 = vadd.f32 %v3153_v35, %v6468_v2 }
 0x4fe   : > { %4239 = vmatmul.msk.f32.gmra.mxu2 %vm2540_vm2, %v6269_v51  ;;  %v3288_v51 = vpop.f32.mrf.mxu3 }
 0x503   : > { %4231 = vmatmul.msk.f32.gmra.mxu1 %vm2540_vm2, %v6264_v36  ;;  %v3156_v20 = vpop.f32.mrf.mxu1 }
 0x504   : > { %v3172_v3 = vadd.f32 %v3156_v20, %v6471_v47 }
 0x506   : > { %4240 = vmatmul.msk.f32.gmra.mxu2 %vm2540_vm2, %v6287_v9  ;;  %v3291_v33 = vpop.f32.mrf.mxu3 }
 0x507   : > { %v3361_v32 = vadd.f32 %v3291_v33, %v3170_v5 }
 0x50b   : > { %4232 = vmatmul.msk.f32.gmra.mxu1 %vm2540_vm2, %v6282_v44  ;;  %v3159_v30 = vpop.f32.mrf.mxu1  ;;  %v3168_v44 = vadd.f32 %v3144_v58, %v6459_v6  ;;  %v3360_v6 = vadd.f32 %v3288_v51, %v3169_v10 }
 0x50c   : > { %v3173_v12 = vadd.f32 %v3159_v30, %v6474_v39 }
 0x50d   : > { %v3359_v9 = vadd.f32 %v3285_v18, %v3168_v44 }
 0x50e   : > { %4241 = vmatmul.msk.f32.gmra.mxu2 %vm2540_vm2, %v6305_v21  ;;  %v3294_v59 = vpop.f32.mrf.mxu3 }
 0x50f   : > { %v3362_v11 = vadd.f32 %v3294_v59, %v3171_v13 }
 0x513   : > { %4233 = vmatmul.msk.f32.gmra.mxu1 %vm2540_vm2, %v6300_v42  ;;  %v3162_v57 = vpop.f32.mrf.mxu1 }
 0x514   : > { %v3174_v63 = vadd.f32 %v3162_v57, %v6477_v48 }
 0x516   : > { %4242 = vmatmul.msk.f32.gmra.mxu2 %vm2540_vm2, %v6321_v49  ;;  %v3297_v29 = vpop.f32.mrf.mxu3 }
 0x517   : > { %v3363_v27 = vadd.f32 %v3297_v29, %v3172_v3 }
 0x51b   : > { %4234 = vmatmul.msk.f32.gmra.mxu1 %vm2540_vm2, %v6316_v28  ;;  %v6513_v36 = vpop.f32.mrf.mxu1  ;;  %v6522_v28 = vld [vmem:[%s6588_s4] ss:$0 sm:$0xff] }
 0x51c   : > { %v3175_v54 = vadd.f32 %v6513_v36, %v6479_v34 }
 0x51e   : > { %v3300_v22 = vpop.f32.mrf.mxu3 }
 0x51f   : > { %v3364_v14 = vadd.f32 %v3300_v22, %v3173_v12 }
 0x526   : > { %v3303_v43 = vpop.f32.mrf.mxu3 }
 0x527   : > { %v3365_v53 = vadd.f32 %v3303_v43, %v3174_v63 }
 0x52e   : > { %v3306_v35 = vpop.f32.mrf.mxu3 }
 0x52f   : > { %v3366_v20 = vadd.f32 %v3306_v35, %v3175_v54 }
 0x560   : > { %v3384_v42 = vpop.f32.mrf.mxu1 }
 0x561   : > { %v3408_v21 = vadd.f32 %v3384_v42, %v3359_v9  ;;  %v3433_v49 = vpop.f32.mrf.mxu2 }
 0x563   : > { %v3457_v8 = vadd.f32 %v3433_v49, %v3408_v21 }
 0x565   : > { %v3469_v62 = vadd.f32 %v6522_v28, %v3457_v8 }
 0x567   : > { %3477 = vst [vmem:[%s6526_s9] sm:$0xff] %v3469_v62 }
 0x568   : > { %v3387_v0 = vpop.f32.mrf.mxu1 }
 0x569   : > { %v3409_v15 = vadd.f32 %v3387_v0, %v3360_v6  ;;  %v3436_v40 = vpop.f32.mrf.mxu2 }
 0x56b   : > { %v3458_v4 = vadd.f32 %v3436_v40, %v3409_v15 }
 0x56d   : > { %v3470_v1 = vadd.f32 %v6522_v28, %v3458_v4 }
 0x56f   : > { %3478 = vst [vmem:[%s6526_s9 + $0x8] sm:$0xff] %v3470_v1 }
 0x570   : > { %v3390_v24 = vpop.f32.mrf.mxu1 }
 0x571   : > { %v3410_v56 = vadd.f32 %v3390_v24, %v3361_v32  ;;  %v3439_v61 = vpop.f32.mrf.mxu2 }
 0x573   : > { %v3459_v31 = vadd.f32 %v3439_v61, %v3410_v56 }
 0x575   : > { %v3471_v25 = vadd.f32 %v6522_v28, %v3459_v31 }
 0x577   : > { %3479 = vst [vmem:[%s6526_s9 + $0x10] sm:$0xff] %v3471_v25 }
 0x578   : > { %v3393_v17 = vpop.f32.mrf.mxu1 }
 0x579   : > { %v3411_v60 = vadd.f32 %v3393_v17, %v3362_v11  ;;  %v3442_v19 = vpop.f32.mrf.mxu2 }
 0x57b   : > { %v3460_v37 = vadd.f32 %v3442_v19, %v3411_v60 }
 0x57d   : > { %v3472_v7 = vadd.f32 %v6522_v28, %v3460_v37 }
 0x57f   : > { %3480 = vst [vmem:[%s6526_s9 + $0x18] sm:$0xff] %v3472_v7 }
 0x580   : > { %v3396_v38 = vpop.f32.mrf.mxu1 }
 0x581   : > { %v3412_v2 = vadd.f32 %v3396_v38, %v3363_v27  ;;  %v3445_v45 = vpop.f32.mrf.mxu2 }
 0x583   : > { %v3461_v41 = vadd.f32 %v3445_v45, %v3412_v2 }
 0x585   : > { %v3473_v16 = vadd.f32 %v6522_v28, %v3461_v41 }
 0x587   : > { %3481 = vst [vmem:[%s6526_s9 + $0x20] sm:$0xff] %v3473_v16 }
 0x588   : > { %v3399_v52 = vpop.f32.mrf.mxu1 }
 0x589   : > { %v3413_v47 = vadd.f32 %v3399_v52, %v3364_v14  ;;  %v3448_v50 = vpop.f32.mrf.mxu2 }
 0x58b   : > { %v3462_v55 = vadd.f32 %v3448_v50, %v3413_v47 }
 0x58d   : > { %v3474_v46 = vadd.f32 %v6522_v28, %v3462_v55 }
 0x58f   : > { %3482 = vst [vmem:[%s6526_s9 + $0x28] sm:$0xff] %v3474_v46 }
 0x590   : > { %v3402_v39 = vpop.f32.mrf.mxu1 }
 0x591   : > { %v3414_v23 = vadd.f32 %v3402_v39, %v3365_v53  ;;  %v3451_v58 = vpop.f32.mrf.mxu2 }
 0x593   : > { %v3463_v26 = vadd.f32 %v3451_v58, %v3414_v23 }
 0x595   : > { %v3475_v48 = vadd.f32 %v6522_v28, %v3463_v26 }
 0x597   : > { %3483 = vst [vmem:[%s6526_s9 + $0x30] sm:$0xff] %v3475_v48 }
 0x598   : > { %v3405_v30 = vpop.f32.mrf.mxu1 }
 0x599   : > { %v3415_v57 = vadd.f32 %v3405_v30, %v3366_v20  ;;  %v3454_v18 = vpop.f32.mrf.mxu2 }
 0x59b   : > { %v3464_v34 = vadd.f32 %v3454_v18, %v3415_v57 }
 0x59d   : > { %v3476_v36 = vadd.f32 %v6522_v28, %v3464_v34 }
 0x59f   : > { %3484 = vst [vmem:[%s6526_s9 + $0x38] sm:$0xff] %v3476_v36 }
 0x5a0   : > { %4352 = shalt.err (!%p4349_p3)
}
 0x5a1   : > { %s4390_s21 = smov 128   ;;  %s4391_s9 = smov 8  }
 0x5a2   : > { %4253 = dma.vmem_to_hbm [thread:$0]  (%p4470_p5), %s3499_s17, 1024, %s3501_s23, %s3486_s28, %s4390_s21, %s4390_s21, %s4391_s9  }
 0x5a3 PF: > { %p4259_p4 = scmp.ge.s32.totalorder %s4387_s27, 2  ;;  %s3515_s14 = sand.u32 1, %s4375_s24  }
 0x5a4   : > { %s3516_s15 = scalar_lea.sflag [#allocation4], %s3515_s14 }
 0x5a5   : > { %p4256_p7 = pnand %p4259_p4, %p4474_p6 }
 0x5a7   : > { %p4257_p8 = pneg %p4256_p7 }
 0x5a9   : > { %4370 = dma.done.wait (%p4257_p8), %s3516_s15, 1024  }
 0x5aa   : > { %4372 = vsyncadd (%p4257_p8), %s3516_s15, 4294966272  ;;  %p17_p9 = scmp.ge.s32.totalorder %s4457_s30, 4   ;;  %s6731_s24 = smov %s4379_s25 }
 0x5ab   : > { %s6732_s25 = smov %s4383_s26  ;;  %s6733_s26 = smov %s4468_s10 }
 0x5ac   : > { %s6734_s27 = smov %s4457_s30  ;;  %19 = sbr.rel (!%p17_p9) target bundleno = 3 (0x3), region = 113 }
 0x5b1   :  { %3522 = vsyncpa [#allocation4], 1 }
 0x5b2   :  { %3524 = vsyncpa [#allocation4 + $0x1], 1 }

</bundles_post_ra>
